<compile_context>
chip_gen: v5e
topology: v5e:2x2
jax: 0.10.0
libtpu: 0.0.40
codegen_flags: <defaults>
</compile_context>

<pallas_src>
import math

import numpy as np
import jax
import jax.numpy as jnp
from jax.experimental import pallas as pl
from jax.experimental.pallas import tpu as pltpu


def _harmonic_kernel(xf_ref, g_ref, b_ref, o_ref):
    """xf_ref: (BR, FOLD*dim), g_ref: (FOLD*dim, FOLD*out_dim),
    b_ref: (1, FOLD*out_dim), o_ref: (BR, FOLD*out_dim)."""
    x = xf_ref[...].astype(jnp.float32)
    e = jnp.dot(x, g_ref[...],
                precision=jax.lax.Precision.HIGHEST,
                preferred_element_type=jnp.float32)
    o_ref[...] = jnp.sin(e + b_ref[...]).astype(o_ref.dtype)   # one dense store


def _round_up(a, b):
    return ((a + b - 1) // b) * b


def _cdiv(a, b):
    return -(-a // b)


def _build_folded_constants(freqs, dim, fold):
    """G (fold*dim, fold*out_dim) block-diagonal frequency matrix + phase bias."""
    n_harm = int(freqs.shape[0])
    dh = dim * n_harm
    out_dim = 2 * dh
    f = np.zeros((dim, out_dim), np.float32)
    bias = np.zeros((out_dim,), np.float32)
    for j in range(out_dim):
        jj = j % dh
        d, h = jj // n_harm, jj % n_harm
        f[d, j] = freqs[h]
        if j >= dh:                       # cos half: cos(t) = sin(t + pi/2)
            bias[j] = np.float32(np.pi / 2)
    g = np.zeros((fold * dim, fold * out_dim), np.float32)
    for r in range(fold):
        g[r * dim:(r + 1) * dim, r * out_dim:(r + 1) * out_dim] = f
    bias_f = np.tile(bias, fold)[None, :].astype(np.float32)
    return g, bias_f


def harmonic_embedding(x, frequencies, *, tile_rows=8192, out_block_budget=4 << 20):
    """Pallas implementation of HarmonicEmbedding.forward.

    Args:
      x: float array of shape [..., dim]
      frequencies: concrete float array of shape [n_harmonic_functions]
    Returns:
      array of shape [..., 2 * dim * n_harmonic_functions]
    """
    *batch, dim = x.shape
    # TODO(synk): `frequencies` must be concrete (like the PyTorch buffer); a traced
    # array would require building G/bias with jnp ops instead of numpy.
    freqs = np.asarray(frequencies, dtype=np.float32)
    n_harm = int(freqs.shape[0])
    out_dim = 2 * dim * n_harm
    n_rows = int(np.prod(batch)) if batch else 1
    itemsize = np.dtype(x.dtype).itemsize

    # Fold rows into lanes so the output block's last dim is a multiple of 128.
    fold = 128 // math.gcd(out_dim, 128)
    sub = {4: 8, 2: 16, 1: 32}.get(itemsize, 8)      # dtype-dependent sublane multiple
    gran = fold * sub                                # row granularity per block
    in_fold = fold * dim
    out_fold = fold * out_dim

    # Rows per grid step: large (amortize ~0.35us/step), capped so the dense
    # output block stays well inside VMEM even when double-buffered.
    rows_cap = max(gran, (out_block_budget // max(out_dim * itemsize, 1)) // gran * gran)
    target = max(gran, min(_round_up(tile_rows, gran), rows_cap))

    rows_g = _round_up(max(n_rows, 1), gran)
    n_tiles = _cdiv(rows_g, target)
    if rows_g >= 2 * gran:
        n_tiles = max(n_tiles, 2)        # >=2 tiles so both v7x TensorCores get work
    rows_per_tile = _round_up(_cdiv(rows_g, n_tiles), gran)
    padded = rows_per_tile * n_tiles
    br = rows_per_tile // fold           # folded rows per block (multiple of `sub`)

    g_np, b_np = _build_folded_constants(freqs, dim, fold)
    g = jnp.asarray(g_np)
    b = jnp.asarray(b_np)

    x2 = x.reshape(n_rows, dim)
    if padded != n_rows:
        x2 = jnp.pad(x2, ((0, padded - n_rows), (0, 0)))   # padded rows: wasted compute only
    xf = x2.reshape(padded // fold, in_fold)                # lane-dense folded view

    cost = pl.CostEstimate(
        flops=2 * padded * dim * out_dim,
        transcendentals=padded * out_dim,
        bytes_accessed=(padded * dim + padded * out_dim) * itemsize + g_np.size * 4,
    )

    out_f = pl.pallas_call(
        _harmonic_kernel,
        out_shape=jax.ShapeDtypeStruct((padded // fold, out_fold), x.dtype),
        grid=(n_tiles,),
        in_specs=[
            pl.BlockSpec((br, in_fold), lambda i: (i, 0)),
            pl.BlockSpec((in_fold, out_fold), lambda i: (0, 0)),   # resident constant
            pl.BlockSpec((1, out_fold), lambda i: (0, 0)),         # resident constant
        ],
        out_specs=pl.BlockSpec((br, out_fold), lambda i: (i, 0)),
        compiler_params=pltpu.CompilerParams(dimension_semantics=("parallel",)),
        cost_estimate=cost,
    )(xf, g, b)

    out = out_f.reshape(padded, out_dim)
    if padded != n_rows:
        out = out[:n_rows]
    return out.reshape(*batch, out_dim)


def harmonic_embedding_ref(x, frequencies):
    """Pure-JAX reference matching the PyTorch module exactly."""
    embed = (x[..., None] * frequencies).reshape(*x.shape[:-1], -1)
    return jnp.concatenate([jnp.sin(embed), jnp.cos(embed)], axis=-1)


if __name__ == "__main__":
    # NeRF-like small shapes: 2 rays x 8 samples, 3-D points.
    n_harmonic_functions = 6
    omega0 = 0.1
    frequencies = omega0 * (2.0 ** jnp.arange(n_harmonic_functions, dtype=jnp.float32))

    key = jax.random.PRNGKey(0)
    x = jax.random.normal(key, (2, 8, 3), dtype=jnp.float32)

    out = jax.block_until_ready(harmonic_embedding(x, frequencies))
    ref = harmonic_embedding_ref(x, frequencies)
    assert out.shape == (2, 8, 2 * 3 * n_harmonic_functions), out.shape
    assert np.allclose(np.asarray(out), np.asarray(ref), atol=1e-5, rtol=1e-5)

    # Second check: ragged row count (300 rows) -> padding + a 2-tile grid.
    x2 = jax.random.normal(jax.random.PRNGKey(1), (3, 100, 3), dtype=jnp.float32)
    out2 = jax.block_until_ready(harmonic_embedding(x2, frequencies))
    ref2 = harmonic_embedding_ref(x2, frequencies)
    assert out2.shape == (3, 100, 2 * 3 * n_harmonic_functions), out2.shape
    assert np.allclose(np.asarray(out2), np.asarray(ref2), atol=1e-5, rtol=1e-5)

    print("KERNEL_OK")
</pallas_src>

<mosaic_0001>
module attributes {stable_mosaic.version = 11 : i64} {
  func.func @_harmonic_kernel(%arg0: i32, %arg1: memref<8x96xf32, #tpu.memory_space<vmem>>, %arg2: memref<96x1152xf32, #tpu.memory_space<vmem>>, %arg3: memref<1x1152xf32, #tpu.memory_space<vmem>>, %arg4: memref<8x1152xf32, #tpu.memory_space<vmem>>) attributes {dimension_semantics = [#tpu.dimension_semantics<parallel>], iteration_bounds = array<i64: 1>, scalar_prefetch = 0 : i64, scratch_operands = 0 : i64, tpu.core_type = #tpu.core_type<tc>, window_params = [{transform_indices = @transform_0, window_bounds = array<i64: 8, 96>}, {pipeline_mode = #tpu.pipeline_mode<synchronous>, transform_indices = @transform_1, window_bounds = array<i64: 96, 1152>}, {pipeline_mode = #tpu.pipeline_mode<synchronous>, transform_indices = @transform_2, window_bounds = array<i64: 1, 1152>}, {transform_indices = @transform_3, window_bounds = array<i64: 8, 1152>}]} {
    %c0 = arith.constant 0 : index
    %c0_0 = arith.constant 0 : index
    %0 = vector.load %arg1[%c0, %c0_0] : memref<8x96xf32, #tpu.memory_space<vmem>>, vector<8x96xf32>
    %c0_1 = arith.constant 0 : index
    %c0_2 = arith.constant 0 : index
    %1 = vector.load %arg2[%c0_1, %c0_2] : memref<96x1152xf32, #tpu.memory_space<vmem>>, vector<96x1152xf32>
    %cst = arith.constant dense<0.000000e+00> : vector<8x1152xf32>
    %2 = tpu.matmul %0, %1, %cst {dimension_numbers = #tpu.dot_dimension_numbers<[1], [0], [0], [1], [0, 0, 1, 1], [], []>, precision = #tpu.contract_precision<fp32>} : vector<8x96xf32>, vector<96x1152xf32>, vector<8x1152xf32> -> vector<8x1152xf32>
    %c0_3 = arith.constant 0 : index
    %c0_4 = arith.constant 0 : index
    %3 = vector.load %arg3[%c0_3, %c0_4] : memref<1x1152xf32, #tpu.memory_space<vmem>>, vector<1x1152xf32>
    %4 = vector.broadcast %3 : vector<1x1152xf32> to vector<8x1152xf32>
    %5 = arith.addf %2, %4 : vector<8x1152xf32>
    %6 = math.sin %5 : vector<8x1152xf32>
    %c0_5 = arith.constant 0 : index
    %c0_6 = arith.constant 0 : index
    %7 = vector.load %arg4[%c0_5, %c0_6] : memref<8x1152xf32, #tpu.memory_space<vmem>>, vector<8x1152xf32>
    tpu.vector_store %arg4[%c0_5, %c0_6], %6 {strides = array<i32>} : memref<8x1152xf32, #tpu.memory_space<vmem>>, vector<8x1152xf32>,
    return
  }
  func.func @transform_0(%arg0: i32) -> (i32, i32) {
    %c0_i32 = arith.constant 0 : i32
    %c0_i32_0 = arith.constant 0 : i32
    return %arg0, %c0_i32 : i32, i32
  }
  func.func @transform_1(%arg0: i32) -> (i32, i32) {
    %c0_i32 = arith.constant 0 : i32
    %c0_i32_0 = arith.constant 0 : i32
    %c0_i32_1 = arith.constant 0 : i32
    return %c0_i32, %c0_i32_0 : i32, i32
  }
  func.func @transform_2(%arg0: i32) -> (i32, i32) {
    %c0_i32 = arith.constant 0 : i32
    %c0_i32_0 = arith.constant 0 : i32
    %c0_i32_1 = arith.constant 0 : i32
    return %c0_i32, %c0_i32_0 : i32, i32
  }
  func.func @transform_3(%arg0: i32) -> (i32, i32) {
    %c0_i32 = arith.constant 0 : i32
    %c0_i32_0 = arith.constant 0 : i32
    return %arg0, %c0_i32 : i32, i32
  }
}

</mosaic_0001>

<bundles_post_ra>
// kernel: tpu_custom_call.1
= control target key start
LH: loop header
LB: loop body
LE: loop exit
PB: predicated region body
PF: predicated region fallthrough
CT: control target
= control target key end

     0   :  { %8 = vsyncpa [#allocation3], 0  ;;  %s7101_s0 = inlined_call_operand.hbm [shape: f32[8,96], index: 0, kind: input, shape index: {}]   ;;  %s7102_s1 = inlined_call_operand.hbm [shape: f32[96,1152], index: 1, kind: input, shape index: {}]   ;;  %s7103_s2 = inlined_call_operand.hbm [shape: f32[1,1152], index: 2, kind: input, shape index: {}]   ;;  %s7104_s3 = inlined_call_operand.hbm [shape: f32[8,1152], index: 3, kind: output, shape index: {}]  }
   0x1   :  { %9 = vsyncpa [#allocation6], 0  ;;  %s26_s14 = sshll.u32 %s7102_s1, 4  ;;  %s27_s14 = int_to_ptr.hbm [resolvable:$true] %s26_s14 }
   0x2   :  { %10 = vsyncpa [#allocation4], 0  ;;  %s4361_s15 = smov [#allocation5]   ;;  %s16_s19 = sshll.u32 %s7101_s0, 4  ;;  %s17_s19 = int_to_ptr.hbm [resolvable:$true] %s16_s19 }
   0x3   :  { %s28_s16 = sshll.u32 %s4361_s15, 4  ;;  %s4362_s20 = smov 1152   ;;  %s29_s16 = int_to_ptr.vmem [resolvable:$true] %s28_s16 }
   0x4   :  { %s4363_s21 = smov 72   ;;  %s4364_s22 = smov [#allocation2]  }
   0x5   :  { %34 = dma.hbm_to_vmem [thread:$0]  %s27_s14, 13824, %s29_s16, [#allocation6], %s4362_s20, %s4362_s20, %s4363_s21  }
   0x6   :  { %s18_s23 = sshll.u32 %s4364_s22, 4  ;;  %s40_s26 = sshll.u32 %s7103_s2, 4  ;;  %s19_s23 = int_to_ptr.vmem [resolvable:$true] %s18_s23  ;;  %s41_s26 = int_to_ptr.hbm [resolvable:$true] %s40_s26 }
   0x7   :  { %21 = dma.hbm_to_vmem [thread:$0]  %s17_s19, 128, %s19_s23, [#allocation3]  }
   0x8   :  { %s4365_s1 = smov [#allocation7]  }
   0x9   :  { %s42_s27 = sshll.u32 %s4365_s1, 4  ;;  %s43_s27 = int_to_ptr.vmem [resolvable:$true] %s42_s27 }
   0xa   :  { %45 = dma.hbm_to_vmem [thread:$0]  %s41_s26, 144, %s43_s27, [#allocation6]  }
   0xb   :  { %4355 = dma.done.wait [#allocation3], 128  }
   0xc   :  { %4356 = vsyncadd [#allocation3], 4294967168 }
   0xd   :  { %4357 = dma.done.wait [#allocation6], 13968  }
   0xe   :  { %4358 = vsyncadd [#allocation6], 4294953328  ;;  %v158_v0 = vld [vmem:[#allocation5 + $0x318] sm:$0xff]  ;;  %v149_v1 = vld [vmem:[#allocation5 + $0x2d0] sm:$0xff]  ;;  %vm189_vm0 = vcmask 785408   ;;  %s4373_s0 = smov [#allocation8]  }
   0xf   :  { %v140_v2 = vld [vmem:[#allocation5 + $0x288] sm:$0xff]  ;;  %v4403_v3 = vand.u32 4294901760, %v158_v0  ;;  %v4405_v4 = vand.u32 4294901760, %v149_v1  ;;  %v131_v6 = vld [vmem:[#allocation5 + $0x240] sm:$0xff]  ;;  %v122_v7 = vld [vmem:[#allocation5 + $0x1f8] sm:$0xff]  ;;  %s4203_s2 = sshll.u32 %s4373_s0, 4  ;;  %s4204_s2 = int_to_ptr.vmem [resolvable:$true] %s4203_s2 }
  0x10   :  { %v4407_v5 = vand.u32 4294901760, %v140_v2  ;;  %v113_v8 = vld [vmem:[#allocation5 + $0x1b0] sm:$0xff]  ;;  %v4409_v9 = vand.u32 4294901760, %v131_v6  ;;  %v4411_v10 = vand.u32 4294901760, %v122_v7  ;;  %v104_v12 = vld [vmem:[#allocation5 + $0x168] sm:$0xff]  ;;  %v95_v13 = vld [vmem:[#allocation5 + $0x120] sm:$0xff] }
  0x11   :  { %v4413_v11 = vand.u32 4294901760, %v113_v8  ;;  %v4416_v14 = vsub.f32 %v158_v0, %v4403_v3  ;;  %198 = vmatpush.msra.mxu0 %v4403_v3  ;;  %v4420_v15 = vsub.f32 %v149_v1, %v4405_v4  ;;  %362 = vmatpush.msra.mxu3 %v4403_v3  ;;  %v4426_v17 = vand.u32 4294901760, %v104_v12  ;;  %v86_v25 = vld [vmem:[#allocation5 + $0xd8] sm:$0xff]  ;;  %v77_v34 = vld [vmem:[#allocation5 + $0x90] sm:$0xff]  ;;  %v68_v35 = vld [vmem:[#allocation5 + $0x48] sm:$0xff]  ;;  %s4205_s30 = sshll.u32 %s7104_s3, 4  ;;  %s4206_s30 = int_to_ptr.hbm [resolvable:$true] %s4205_s30 }
  0x12   :  { %v4424_v16 = vsub.f32 %v140_v2, %v4407_v5  ;;  %v4429_v18 = vsub.f32 %v131_v6, %v4409_v9  ;;  %v4432_v19 = vsub.f32 %v122_v7, %v4411_v10  ;;  %v4442_v24 = vand.u32 4294901760, %v95_v13  ;;  %v59_v40 = vld [vmem:[#allocation5] sm:$0xff]  ;;  %v150_v42 = vld [vmem:[#allocation5 + $0x2d8] sm:$0xff]  ;;  %v141_v45 = vld [vmem:[#allocation5 + $0x290] sm:$0xff] }
  0x13   :  { %v4435_v20 = vsub.f32 %v113_v8, %v4413_v11  ;;  %317 = vmatpush.msra.mxu2 %v4416_v14  ;;  %200 = vmatpush.msra.mxu0 %v4405_v4  ;;  %v236_v21 = vand.u32 4294901760, %v4416_v14  ;;  %v242_v22 = vand.u32 4294901760, %v4420_v15  ;;  %v4447_v27 = vsub.f32 %v104_v12, %v4426_v17  ;;  %v159_v41 = vld [vmem:[#allocation5 + $0x320] sm:$0xff]  ;;  %v132_v54 = vld [vmem:[#allocation5 + $0x248] sm:$0xff]  ;;  %v114_v12 = vld [vmem:[#allocation5 + $0x1b8] sm:$0xff] }
  0x14   :  { %v248_v23 = vand.u32 4294901760, %v4424_v16  ;;  %364 = vmatpush.msra.mxu3 %v4405_v4  ;;  %v254_v26 = vand.u32 4294901760, %v4429_v18  ;;  %v7116_v31 = vand.u32 4294901760, %v4432_v19  ;;  %v4463_v33 = vand.u32 4294901760, %v86_v25  ;;  %v123_v62 = vld [vmem:[#allocation5 + $0x200] sm:$0xff] }
  0x15   :  { %320 = vmatpush.msra.mxu2 %v4420_v15  ;;  %v237_v28 = vsub.f32 %v4416_v14, %v236_v21  ;;  %202 = vmatpush.msra.mxu0 %v4407_v5  ;;  %v243_v29 = vsub.f32 %v4420_v15, %v242_v22  ;;  %v7114_v32 = vand.u32 4294901760, %v4435_v20  ;;  %v4471_v39 = vsub.f32 %v95_v13, %v4442_v24  ;;  %v69_v14 = vld [vmem:[#allocation5 + $0x50] sm:$0xff] }
  0x16   :  { %v249_v30 = vsub.f32 %v4424_v16, %v248_v23  ;;  %366 = vmatpush.msra.mxu3 %v4407_v5  ;;  %v255_v38 = vsub.f32 %v4429_v18, %v254_v26  ;;  %v7113_v43 = vand.u32 4294901760, %v4447_v27  ;;  %v4476_v44 = vsub.f32 %v86_v25, %v4463_v33 }
  0x17   :  { %v238_v36 = vand.u32 4294901760, %v237_v28  ;;  %323 = vmatpush.msra.mxu2 %v4424_v16  ;;  %v244_v37 = vand.u32 4294901760, %v243_v29  ;;  %204 = vmatpush.msra.mxu0 %v4409_v9  ;;  %v261_v47 = vsub.f32 %v4432_v19, %v7116_v31  ;;  %v4482_v48 = vand.u32 4294901760, %v77_v34 }
  0x18   :  { %368 = vmatpush.msra.mxu3 %v4409_v9  ;;  %v250_v46 = vand.u32 4294901760, %v249_v30  ;;  %v4484_v49 = vand.u32 4294901760, %v68_v35  ;;  %v267_v50 = vsub.f32 %v4435_v20, %v7114_v32  ;;  %v4491_v51 = vand.u32 4294901760, %v59_v40  ;;  %v78_v32 = vld [vmem:[#allocation5 + $0x98] sm:$0xff] }
  0x19   :  { %239 = vmatpush.msra.mxu1 %v238_v36  ;;  %326 = vmatpush.msra.mxu2 %v4429_v18  ;;  %v4493_v52 = vand.u32 4294901760, %v159_v41  ;;  %v4495_v53 = vand.u32 4294901760, %v150_v42  ;;  %v256_v55 = vand.u32 4294901760, %v255_v38  ;;  %v7112_v56 = vand.u32 4294901760, %v4471_v39 }
  0x1a   :  { %206 = vmatpush.msra.mxu0 %v4411_v10  ;;  %370 = vmatpush.msra.mxu3 %v4411_v10  ;;  %v4500_v57 = vsub.f32 %v77_v34, %v4482_v48  ;;  %v4502_v58 = vand.u32 4294901760, %v141_v45  ;;  %v7108_v59 = vand.u32 4294901760, %v4476_v44  ;;  %v4508_v60 = vsub.f32 %v68_v35, %v4484_v49  ;;  %v105_v35 = vld [vmem:[#allocation5 + $0x170] sm:$0xff] }
  0x1b   :  { %245 = vmatpush.msra.mxu1 %v244_v37  ;;  %329 = vmatpush.msra.mxu2 %v4432_v19  ;;  %v4511_v61 = vsub.f32 %v159_v41, %v4493_v52  ;;  %v262_v63 = vand.u32 4294901760, %v261_v47  ;;  %v273_v0 = vsub.f32 %v4447_v27, %v7113_v43  ;;  %v4518_v1 = vsub.f32 %v150_v42, %v4495_v53 }
  0x1c   :  { %208 = vmatpush.msra.mxu0 %v4413_v11  ;;  %372 = vmatpush.msra.mxu3 %v4413_v11  ;;  %v4520_v2 = vand.u32 4294901760, %v132_v54  ;;  %v7106_v6 = vand.u32 4294901760, %v4500_v57  ;;  %v4526_v7 = vsub.f32 %v59_v40, %v4491_v51  ;;  %v268_v13 = vand.u32 4294901760, %v267_v50 }
  0x1d   :  { %251 = vmatpush.msra.mxu1 %v250_v46  ;;  %332 = vmatpush.msra.mxu2 %v4435_v20  ;;  %v7105_v8 = vand.u32 4294901760, %v4511_v61  ;;  %v279_v25 = vsub.f32 %v4471_v39, %v7112_v56  ;;  %v4534_v28 = vsub.f32 %v141_v45, %v4502_v58  ;;  %v4536_v29 = vand.u32 4294901760, %v123_v62  ;;  %v58_v46 = vld [vmem:[#allocation2] sm:$0xff] }
  0x1e   :  { %210 = vmatpush.msra.mxu0 %v4426_v17  ;;  %374 = vmatpush.msra.mxu3 %v4426_v17  ;;  %v285_v30 = vsub.f32 %v4476_v44, %v7108_v59  ;;  %v7107_v34 = vand.u32 4294901760, %v4508_v60  ;;  %v274_v36 = vand.u32 4294901760, %v273_v0  ;;  %v7109_v37 = vand.u32 4294901760, %v4518_v1 }
  0x1f   :  { %257 = vmatpush.msra.mxu1 %v256_v55  ;;  %335 = vmatpush.msra.mxu2 %v4447_v27  ;;  %v4547_v38 = vsub.f32 %v132_v54, %v4520_v2  ;;  %v4549_v40 = vand.u32 4294901760, %v114_v12  ;;  %v291_v41 = vsub.f32 %v4500_v57, %v7106_v6  ;;  %v526_v42 = vsub.f32 %v4511_v61, %v7105_v8 }
  0x20   :  { %212 = vmatpush.msra.mxu0 %v4442_v24  ;;  %376 = vmatpush.msra.mxu3 %v4442_v24  ;;  %v7110_v45 = vand.u32 4294901760, %v4526_v7  ;;  %v280_v47 = vand.u32 4294901760, %v279_v25  ;;  %v7111_v50 = vand.u32 4294901760, %v4534_v28  ;;  %v4563_v54 = vsub.f32 %v123_v62, %v4536_v29 }
  0x21   :  { %263 = vmatpush.msra.mxu1 %v262_v63  ;;  %338 = vmatpush.msra.mxu2 %v4471_v39  ;;  %v4565_v55 = vand.u32 4294901760, %v105_v35  ;;  %v96_v63 = vld [vmem:[#allocation5 + $0x128] sm:$0xff]  ;;  %v286_v0 = vand.u32 4294901760, %v285_v30  ;;  %v532_v62 = vsub.f32 %v4518_v1, %v7109_v37  ;;  %v7115_v25 = vand.u32 4294901760, %v4547_v38 }
  0x22   :  { %214 = vmatpush.msra.mxu0 %v4463_v33  ;;  %378 = vmatpush.msra.mxu3 %v4463_v33  ;;  %v4578_v8 = vsub.f32 %v114_v12, %v4549_v40  ;;  %v191_v30 = vsel %vm189_vm0, %v58_v46, 0  ;;  %v292_v6 = vand.u32 4294901760, %v291_v41  ;;  %v4585_v59 = vand.u32 4294901760, %v96_v63 }
  0x23   :  { %269 = vmatpush.msra.mxu1 %v268_v13  ;;  %341 = vmatpush.msra.mxu2 %v4476_v44  ;;  %v297_v13 = vsub.f32 %v4508_v60, %v7107_v34  ;;  %v527_v34 = vand.u32 4294901760, %v526_v42  ;;  %v538_v12 = vsub.f32 %v4534_v28, %v7111_v50  ;;  %v549_v46 = vand.u32 4294901760, %v4563_v54  ;;  %v87_v42 = vld [vmem:[#allocation5 + $0xe0] sm:$0xff] }
  0x24   :  { %216 = vmatpush.msra.mxu0 %v4482_v48  ;;  %380 = vmatpush.msra.mxu3 %v4482_v48  ;;  %v4593_v41 = vsub.f32 %v105_v35, %v4565_v55  ;;  %v4595_v37 = vand.u32 4294901760, %v191_v30  ;;  %v544_v50 = vsub.f32 %v4547_v38, %v7115_v25  ;;  %v555_v56 = vand.u32 4294901760, %v4578_v8 }
  0x25   :  { %275 = vmatpush.msra.mxu1 %v274_v36  ;;  %344 = vmatpush.msra.mxu2 %v4500_v57  ;;  %v303_v36 = vsub.f32 %v4526_v7, %v7110_v45  ;;  %v533_v45 = vand.u32 4294901760, %v532_v62  ;;  %v4607_v43 = vand.u32 4294901760, %v87_v42  ;;  %v550_v62 = vsub.f32 %v4563_v54, %v549_v46 }
  0x26   :  { %218 = vmatpush.msra.mxu0 %v4484_v49  ;;  %382 = vmatpush.msra.mxu3 %v4484_v49  ;;  %v561_v25 = vand.u32 4294901760, %v4593_v41  ;;  %v4617_v31 = vsub.f32 %v191_v30, %v4595_v37 }
  0x27   :  { %281 = vmatpush.msra.mxu1 %v280_v47  ;;  %347 = vmatpush.msra.mxu2 %v4508_v60  ;;  %v298_v47 = vand.u32 4294901760, %v297_v13  ;;  %v304_v35 = vand.u32 4294901760, %v303_v36  ;;  %v539_v13 = vand.u32 4294901760, %v538_v12  ;;  %v4632_v15 = vsub.f32 %v87_v42, %v4607_v43 }
  0x28   :  { %220 = vmatpush.msra.mxu0 %v4491_v51  ;;  %384 = vmatpush.msra.mxu3 %v4491_v51  ;;  %7202 = vst [vmem:[#allocation12_spill] sm:$0xff] %v4617_v31  ;;  %v4638_v30 = vand.u32 4294901760, %v4617_v31  ;;  %v4640_v36 = vand.u32 4294901760, %v69_v14 }
  0x29   :  { %287 = vmatpush.msra.mxu1 %v286_v0  ;;  %350 = vmatpush.msra.mxu2 %v4526_v7  ;;  %v4610_v0 = vsub.f32 %v96_v63, %v4585_v59  ;;  %v573_v42 = vand.u32 4294901760, %v4632_v15 }
  0x2a   :  { %399 = vmatpush.msrb.mxu0 %v236_v21  ;;  %528 = vmatpush.msrb.mxu3 %v527_v34  ;;  %v545_v21 = vand.u32 4294901760, %v544_v50  ;;  %v4625_v34 = vand.u32 4294901760, %v78_v32  ;;  %v562_v50 = vsub.f32 %v4593_v41, %v561_v25 }
  0x2b   :  { %487 = vmatpush.msrb.mxu2 %v4493_v52  ;;  %293 = vmatpush.msra.mxu1 %v292_v6  ;;  %v556_v6 = vsub.f32 %v4578_v8, %v555_v56  ;;  %v567_v63 = vand.u32 4294901760, %v4610_v0 }
  0x2c   :  { %403 = vmatpush.msrb.mxu0 %v242_v22  ;;  %534 = vmatpush.msrb.mxu3 %v533_v45  ;;  %v60_v22 = vld [vmem:[#allocation5 + $0x8] sm:$0xff]  ;;  %v551_v45 = vand.u32 4294901760, %v550_v62 }
  0x2d   :  { %489 = vmatpush.msrb.mxu2 %v4495_v53  ;;  %299 = vmatpush.msra.mxu1 %v298_v47  ;;  %v557_v16 = vand.u32 4294901760, %v556_v6  ;;  %v4649_v12 = vand.u32 4294901760, %v60_v22  ;;  %v563_v47 = vand.u32 4294901760, %v562_v50  ;;  %v568_v18 = vsub.f32 %v4610_v0, %v567_v63 }
  0x2e   :  { %407 = vmatpush.msrb.mxu0 %v248_v23  ;;  %540 = vmatpush.msrb.mxu3 %v539_v13  ;;  %v4647_v23 = vsub.f32 %v78_v32, %v4625_v34  ;;  %v4662_v32 = vsub.f32 %v69_v14, %v4640_v36  ;;  %v574_v13 = vsub.f32 %v4632_v15, %v573_v42 }
  0x2f   :  { %491 = vmatpush.msrb.mxu2 %v4502_v58  ;;  %305 = vmatpush.msra.mxu1 %v304_v35  ;;  %v4670_v35 = vsub.f32 %v60_v22, %v4649_v12 }
  0x30   :  { %411 = vmatpush.msrb.mxu0 %v254_v26  ;;  %546 = vmatpush.msrb.mxu3 %v545_v21  ;;  %v224_v26 = vsub.f32 %v4617_v31, %v4638_v30  ;;  %v585_v14 = vand.u32 4294901760, %v4662_v32  ;;  %v575_v6 = vand.u32 4294901760, %v574_v13 }
  0x31   :  { %454 = vmatpush.msrb.mxu1 %v4403_v3  ;;  %493 = vmatpush.msrb.mxu2 %v4520_v2  ;;  %v7203_v3 = vand.u32 4294901760, %v4432_v19  ;;  %v579_v19 = vand.u32 4294901760, %v4647_v23  ;;  %v591_v21 = vand.u32 4294901760, %v4670_v35 }
  0x32   :  { %552 = vmatpush.msrb.mxu3 %v551_v45  ;;  %v4679_v62 = vand.u32 4294901760, %v224_v26  ;;  %353 = vmatmul.f32.vlgmr.msra.gmra.mxu2 %v4617_v31  ;;  %v7208_v45 = vand.u32 4294901760, %v4500_v57  ;;  %v7211_v57 = vand.u32 4294901760, %v4526_v7  ;;  %v124_v7 = vld [vmem:[#allocation5 + $0x208] sm:$0xff] }
  0x33   :  { %456 = vmatpush.msrb.mxu1 %v4405_v4  ;;  %495 = vmatpush.msrb.mxu2 %v4536_v29  ;;  %v7204_v4 = vand.u32 4294901760, %v4435_v20  ;;  %v569_v20 = vand.u32 4294901760, %v568_v18  ;;  %v592_v22 = vsub.f32 %v4670_v35, %v591_v21 }
  0x34   :  { %415 = vmatpush.msrb.mxu0 %v7203_v3  ;;  %558 = vmatpush.msrb.mxu3 %v557_v16  ;;  %v88_v16 = vld [vmem:[#allocation5 + $0xe8] sm:$0xff] }
  0x35   :  { %458 = vmatpush.msrb.mxu1 %v4407_v5  ;;  %497 = vmatpush.msrb.mxu2 %v4549_v40  ;;  %v7205_v5 = vand.u32 4294901760, %v4447_v27  ;;  %v580_v27 = vsub.f32 %v4647_v23, %v579_v19  ;;  %v593_v50 = vand.u32 4294901760, %v592_v22 }
  0x36   :  { %419 = vmatpush.msrb.mxu0 %v7204_v4  ;;  %564 = vmatpush.msrb.mxu3 %v563_v47  ;;  %v79_v47 = vld [vmem:[#allocation5 + $0xa0] sm:$0xff]  ;;  %v4837_v4 = vand.u32 4294901760, %v88_v16 }
  0x37   :  { %460 = vmatpush.msrb.mxu1 %v4409_v9  ;;  %499 = vmatpush.msrb.mxu2 %v4565_v55  ;;  %v7206_v9 = vand.u32 4294901760, %v4471_v39  ;;  %v7207_v39 = vand.u32 4294901760, %v4476_v44  ;;  %v7209_v44 = vand.u32 4294901760, %v4508_v60 }
  0x38   :  { %423 = vmatpush.msrb.mxu0 %v7205_v5  ;;  %570 = vmatpush.msrb.mxu3 %v569_v20  ;;  %v4850_v20 = vand.u32 4294901760, %v79_v47 }
  0x39   :  { %462 = vmatpush.msrb.mxu1 %v4411_v10  ;;  %501 = vmatpush.msrb.mxu2 %v4585_v59  ;;  %v586_v10 = vsub.f32 %v4662_v32, %v585_v14 }
  0x3a   :  { %427 = vmatpush.msrb.mxu0 %v7206_v9  ;;  %388 = vmatmul.f32.vlgmr.msra.gmra.mxu3 %v4638_v30  ;;  %v161_v9 = vld [vmem:[#allocation5 + $0x330] sm:$0xff] }
  0x3b   :  { %464 = vmatpush.msrb.mxu1 %v4413_v11  ;;  %503 = vmatpush.msrb.mxu2 %v4607_v43  ;;  %v581_v11 = vand.u32 4294901760, %v580_v27 }
  0x3c   :  { %226 = vmatmul.f32.vlgmr.msra.gmra.mxu0 %v4679_v62  ;;  %576 = vmatpush.msrb.mxu3 %v575_v6 }
  0x3d   :  { %466 = vmatpush.msrb.mxu1 %v4426_v17  ;;  %431 = vmatpush.msrb.mxu0 %v7207_v39  ;;  %v587_v17 = vand.u32 4294901760, %v586_v10  ;;  %v61_v10 = vld [vmem:[#allocation5 + $0x10] sm:$0xff] }
  0x3e   :  { %505 = vmatpush.msrb.mxu2 %v4625_v34  ;;  %307 = vmatmul.f32.vlgmr.msra.gmra.mxu1 %v4595_v37 }
  0x3f   :  { %468 = vmatpush.msrb.mxu1 %v4442_v24  ;;  %435 = vmatpush.msrb.mxu0 %v7208_v45  ;;  %v7210_v24 = vand.u32 4294901760, %v4511_v61  ;;  %v4872_v45 = vsub.f32 %v79_v47, %v4850_v20 }
  0x40   :  { %507 = vmatpush.msrb.mxu2 %v4640_v36  ;;  %582 = vmatpush.msrb.mxu3 %v581_v11 }
  0x41   :  { %470 = vmatpush.msrb.mxu1 %v4463_v33  ;;  %439 = vmatpush.msrb.mxu0 %v7209_v44  ;;  %v7212_v33 = vand.u32 4294901760, %v4518_v1  ;;  %v152_v44 = vld [vmem:[#allocation5 + $0x2e8] sm:$0xff] }
  0x42   :  { %509 = vmatpush.msrb.mxu2 %v4649_v12  ;;  %588 = vmatpush.msrb.mxu3 %v587_v17  ;;  %v4874_v17 = vand.u32 4294901760, %v161_v9 }
  0x43   :  { %472 = vmatpush.msrb.mxu1 %v4482_v48  ;;  %443 = vmatpush.msrb.mxu0 %v7211_v57  ;;  %v7213_v48 = vand.u32 4294901760, %v4534_v28 }
  0x44   :  { %688 = vmatpush.msra.mxu2 %v7210_v24  ;;  %594 = vmatpush.msrb.mxu3 %v593_v50  ;;  %v4878_v50 = vand.u32 4294901760, %v61_v10 }
  0x45   :  { %474 = vmatpush.msrb.mxu1 %v4484_v49  ;;  %445 = vmatmul.f32.vlgmr.msrb.gmra.mxu0 %v4595_v37  ;;  %v7214_v49 = vand.u32 4294901760, %v4547_v38 }
  0x46   :  { %606 = vmatpush.msra.mxu0 %v4511_v61  ;;  %692 = vmatpush.msra.mxu2 %v7212_v33 }
  0x47   :  { %743 = vmatpush.msra.mxu3 %v4493_v52  ;;  %476 = vmatpush.msrb.mxu1 %v4491_v51  ;;  %v160_v51 = vld [vmem:[#allocation5 + $0x328] sm:$0xff] }
  0x48   :  { %478 = vmatmul.f32.vlgmr.msrb.gmra.mxu1 %v4595_v37  ;;  %609 = vmatpush.msra.mxu0 %v4518_v1 }
  0x49   :  { %651 = vmatpush.msra.mxu1 %v4493_v52  ;;  %696 = vmatpush.msra.mxu2 %v7213_v48  ;;  %v151_v52 = vld [vmem:[#allocation5 + $0x2e0] sm:$0xff] }
  0x4a   :  { %745 = vmatpush.msra.mxu3 %v4495_v53  ;;  %612 = vmatpush.msra.mxu0 %v4534_v28  ;;  %v4755_v60 = vand.u32 4294901760, %v151_v52 }
  0x4b   :  { %653 = vmatpush.msra.mxu1 %v4495_v53  ;;  %700 = vmatpush.msra.mxu2 %v7214_v49  ;;  %v4748_v53 = vand.u32 4294901760, %v160_v51  ;;  %v143_v49 = vld [vmem:[#allocation5 + $0x2a0] sm:$0xff] }
  0x4c   :  { %747 = vmatpush.msra.mxu3 %v4502_v58  ;;  %615 = vmatpush.msra.mxu0 %v4547_v38 }
  0x4d   :  { %655 = vmatpush.msra.mxu1 %v4502_v58  ;;  %704 = vmatpush.msra.mxu2 %v549_v46  ;;  %v142_v58 = vld [vmem:[#allocation5 + $0x298] sm:$0xff]  ;;  %v4765_v1 = vsub.f32 %v160_v51, %v4748_v53  ;;  %v4890_v51 = vand.u32 4294901760, %v152_v44 }
  0x4e   :  { %749 = vmatpush.msra.mxu3 %v4520_v2  ;;  %618 = vmatpush.msra.mxu0 %v4563_v54  ;;  %v4760_v61 = vand.u32 4294901760, %v142_v58 }
  0x4f   :  { %657 = vmatpush.msra.mxu1 %v4520_v2  ;;  %708 = vmatpush.msra.mxu2 %v555_v56  ;;  %v133_v56 = vld [vmem:[#allocation5 + $0x250] sm:$0xff]  ;;  %v814_v38 = vand.u32 4294901760, %v4765_v1  ;;  %v4915_v47 = vsub.f32 %v152_v44, %v4890_v51  ;;  %v107_v44 = vld [vmem:[#allocation5 + $0x180] sm:$0xff] }
  0x50   :  { %751 = vmatpush.msra.mxu3 %v4536_v29  ;;  %621 = vmatpush.msra.mxu0 %v4578_v8  ;;  %v4769_v2 = vand.u32 4294901760, %v133_v56  ;;  %v4775_v8 = vsub.f32 %v151_v52, %v4755_v60  ;;  %v4780_v28 = vsub.f32 %v142_v58, %v4760_v61 }
  0x51   :  { %659 = vmatpush.msra.mxu1 %v4536_v29  ;;  %712 = vmatpush.msra.mxu2 %v561_v25  ;;  %v115_v29 = vld [vmem:[#allocation5 + $0x1c0] sm:$0xff] }
  0x52   :  { %753 = vmatpush.msra.mxu3 %v4549_v40  ;;  %624 = vmatpush.msra.mxu0 %v4593_v41  ;;  %v4791_v54 = vsub.f32 %v133_v56, %v4769_v2  ;;  %v4797_v25 = vand.u32 4294901760, %v115_v29  ;;  %v826_v46 = vand.u32 4294901760, %v4780_v28  ;;  %v97_v41 = vld [vmem:[#allocation5 + $0x130] sm:$0xff]  ;;  %v7120_v56 = vand.u32 4294901760, %v4872_v45 }
  0x53   :  { %661 = vmatpush.msra.mxu1 %v4549_v40  ;;  %716 = vmatpush.msra.mxu2 %v567_v63  ;;  %v4786_v40 = vand.u32 4294901760, %v124_v7 }
  0x54   :  { %755 = vmatpush.msra.mxu3 %v4565_v55  ;;  %515 = vmatmul.f32.vlgmr.msrb.gmra.mxu2 %v4679_v62  ;;  %v827_v3 = vsub.f32 %v4780_v28, %v826_v46 }
  0x55   :  { %627 = vmatpush.msra.mxu0 %v4610_v0  ;;  %663 = vmatpush.msra.mxu1 %v4565_v55  ;;  %v106_v55 = vld [vmem:[#allocation5 + $0x178] sm:$0xff]  ;;  %v4809_v0 = vsub.f32 %v124_v7, %v4786_v40  ;;  %v4898_v7 = vsub.f32 %v161_v9, %v4874_v17 }
  0x56   :  { %720 = vmatpush.msra.mxu2 %v573_v42  ;;  %757 = vmatpush.msra.mxu3 %v4585_v59  ;;  %v4811_v63 = vand.u32 4294901760, %v106_v55  ;;  %v4824_v42 = vand.u32 4294901760, %v97_v41 }
  0x57   :  { %596 = vmatmul.f32.vlgmr.msrb.gmra.mxu3 %v4595_v37  ;;  %630 = vmatpush.msra.mxu0 %v4632_v15  ;;  %v832_v15 = vand.u32 4294901760, %v4791_v54  ;;  %v838_v26 = vand.u32 4294901760, %v4809_v0 }
  0x58   :  { %665 = vmatpush.msra.mxu1 %v4585_v59  ;;  %724 = vmatpush.msra.mxu2 %v579_v19  ;;  %v820_v59 = vand.u32 4294901760, %v4775_v8  ;;  %v70_v19 = vld [vmem:[#allocation5 + $0x58] sm:$0xff]  ;;  %v4848_v5 = vsub.f32 %v97_v41, %v4824_v42  ;;  %v4905_v41 = vand.u32 4294901760, %v143_v49 }
  0x59   :  { %759 = vmatpush.msra.mxu3 %v4607_v43  ;;  %633 = vmatpush.msra.mxu0 %v4647_v23  ;;  %v4822_v23 = vsub.f32 %v115_v29, %v4797_v25  ;;  %v4862_v6 = vand.u32 4294901760, %v70_v19  ;;  %v134_v29 = vld [vmem:[#allocation5 + $0x258] sm:$0xff] }
  0x5a   :  { %667 = vmatpush.msra.mxu1 %v4607_v43  ;;  %728 = vmatpush.msra.mxu2 %v585_v14  ;;  %v815_v43 = vsub.f32 %v4765_v1, %v814_v38  ;;  %v828_v14 = vand.u32 4294901760, %v827_v3  ;;  %v7123_v22 = vand.u32 4294901760, %v4848_v5  ;;  %v125_v3 = vld [vmem:[#allocation5 + $0x210] sm:$0xff] }
  0x5b   :  { %761 = vmatpush.msra.mxu3 %v4625_v34  ;;  %636 = vmatpush.msra.mxu0 %v4662_v32  ;;  %v4835_v32 = vsub.f32 %v106_v55, %v4811_v63  ;;  %v844_v13 = vand.u32 4294901760, %v4822_v23  ;;  %v4886_v48 = vsub.f32 %v70_v19, %v4862_v6  ;;  %v4903_v55 = vsub.f32 %v61_v10, %v4878_v50 }
  0x5c   :  { %669 = vmatpush.msra.mxu1 %v4625_v34  ;;  %732 = vmatpush.msra.mxu2 %v591_v21  ;;  %v821_v34 = vsub.f32 %v4775_v8, %v820_v59  ;;  %v816_v18 = vand.u32 4294901760, %v815_v43  ;;  %v4860_v21 = vsub.f32 %v88_v16, %v4837_v4  ;;  %v857_v58 = vsub.f32 %v4848_v5, %v7123_v22 }
  0x5d   :  { %763 = vmatpush.msra.mxu3 %v4640_v36  ;;  %734 = vmatmul.f32.vlgmr.msra.gmra.mxu2 %v4595_v37  ;;  %v7125_v27 = vand.u32 4294901760, %v4835_v32  ;;  %v845_v11 = vsub.f32 %v4822_v23, %v844_v13  ;;  %v869_v19 = vsub.f32 %v4872_v45, %v7120_v56  ;;  %v7119_v9 = vand.u32 4294901760, %v4903_v55 }
  0x5e   :  { %895 = vmatpush.msrb.mxu2 %v4765_v1  ;;  %639 = vmatpush.msra.mxu0 %v4670_v35  ;;  %v822_v35 = vand.u32 4294901760, %v821_v34  ;;  %v7121_v33 = vand.u32 4294901760, %v4860_v21  ;;  %v7117_v34 = vand.u32 4294901760, %v4886_v48  ;;  %v4930_v10 = vand.u32 4294901760, %v125_v3 }
  0x5f   :  { %671 = vmatpush.msra.mxu1 %v4640_v36  ;;  %765 = vmatpush.msra.mxu3 %v4649_v12  ;;  %v833_v36 = vsub.f32 %v4791_v54, %v832_v15  ;;  %v851_v57 = vsub.f32 %v4835_v32, %v7125_v27  ;;  %v846_v52 = vand.u32 4294901760, %v845_v11 }
  0x60   :  { %642 = vmatmul.f32.vlgmr.msra.gmra.mxu0 %v4617_v31  ;;  %767 = vmatmul.f32.vlgmr.msra.gmra.mxu3 %v4595_v37  ;;  %v863_v16 = vsub.f32 %v4860_v21, %v7121_v33  ;;  %v875_v11 = vsub.f32 %v4886_v48, %v7117_v34  ;;  %v4957_v34 = vand.u32 4294901760, %v107_v44  ;;  %v89_v33 = vld [vmem:[#allocation5 + $0xf0] sm:$0xff] }
  0x61   :  { %776 = vmatpush.msrb.mxu0 %v4748_v53  ;;  %898 = vmatpush.msrb.mxu2 %v4775_v8  ;;  %v834_v39 = vand.u32 4294901760, %v833_v36  ;;  %v852_v43 = vand.u32 4294901760, %v851_v57  ;;  %v858_v36 = vand.u32 4294901760, %v857_v58 }
  0x62   :  { %940 = vmatpush.msrb.mxu3 %v4748_v53  ;;  %673 = vmatpush.msra.mxu1 %v4649_v12  ;;  %v839_v12 = vsub.f32 %v4809_v0, %v838_v26 }
  0x63   :  { %677 = vmatmul.f32.vlgmr.msra.gmra.mxu1 %v4638_v30  ;;  %778 = vmatpush.msrb.mxu0 %v4755_v60 }
  0x64   :  { %817 = vmatpush.msrb.mxu1 %v816_v18  ;;  %901 = vmatpush.msrb.mxu2 %v4780_v28  ;;  %v840_v24 = vand.u32 4294901760, %v839_v12  ;;  %v4917_v18 = vand.u32 4294901760, %v134_v29  ;;  %v4928_v12 = vsub.f32 %v143_v49, %v4905_v41 }
  0x65   :  { %942 = vmatpush.msrb.mxu3 %v4755_v60  ;;  %780 = vmatpush.msrb.mxu0 %v4760_v61 }
  0x66   :  { %823 = vmatpush.msrb.mxu1 %v822_v35  ;;  %904 = vmatpush.msrb.mxu2 %v4791_v54  ;;  %v7118_v35 = vand.u32 4294901760, %v4898_v7  ;;  %v4940_v57 = vsub.f32 %v134_v29, %v4917_v18  ;;  %v881_v29 = vsub.f32 %v4903_v55, %v7119_v9 }
  0x67   :  { %944 = vmatpush.msrb.mxu3 %v4760_v61  ;;  %782 = vmatpush.msrb.mxu0 %v4769_v2 }
  0x68   :  { %829 = vmatpush.msrb.mxu1 %v828_v14  ;;  %907 = vmatpush.msrb.mxu2 %v4809_v0  ;;  %v116_v14 = vld [vmem:[#allocation5 + $0x1c8] sm:$0xff]  ;;  %v1104_v58 = vsub.f32 %v4898_v7, %v7118_v35  ;;  %v7126_v9 = vand.u32 4294901760, %v4940_v57 }
  0x69   :  { %946 = vmatpush.msrb.mxu3 %v4769_v2  ;;  %784 = vmatpush.msrb.mxu0 %v4786_v40  ;;  %v4942_v49 = vand.u32 4294901760, %v116_v14 }
  0x6a   :  { %835 = vmatpush.msrb.mxu1 %v834_v39  ;;  %910 = vmatpush.msrb.mxu2 %v4822_v23  ;;  %v864_v39 = vand.u32 4294901760, %v863_v16  ;;  %v7124_v16 = vand.u32 4294901760, %v4928_v12 }
  0x6b   :  { %948 = vmatpush.msrb.mxu3 %v4786_v40  ;;  %786 = vmatpush.msrb.mxu0 %v4797_v25  ;;  %v4967_v56 = vsub.f32 %v116_v14, %v4942_v49  ;;  %v4979_v14 = vsub.f32 %v107_v44, %v4957_v34 }
  0x6c   :  { %841 = vmatpush.msrb.mxu1 %v840_v24  ;;  %913 = vmatpush.msrb.mxu2 %v4835_v32  ;;  %v7122_v24 = vand.u32 4294901760, %v4915_v47 }
  0x6d   :  { %950 = vmatpush.msrb.mxu3 %v4797_v25  ;;  %788 = vmatpush.msrb.mxu0 %v4811_v63  ;;  %v1133_v27 = vand.u32 4294901760, %v4967_v56 }
  0x6e   :  { %847 = vmatpush.msrb.mxu1 %v846_v52  ;;  %916 = vmatpush.msrb.mxu2 %v4848_v5  ;;  %v870_v52 = vand.u32 4294901760, %v869_v19  ;;  %v876_v19 = vand.u32 4294901760, %v875_v11  ;;  %v1110_v35 = vsub.f32 %v4915_v47, %v7122_v24  ;;  %v882_v11 = vand.u32 4294901760, %v881_v29 }
  0x6f   :  { %952 = vmatpush.msrb.mxu3 %v4811_v63  ;;  %790 = vmatpush.msrb.mxu0 %v4824_v42  ;;  %v1116_v24 = vsub.f32 %v4928_v12, %v7124_v16  ;;  %v1122_v16 = vsub.f32 %v4940_v57, %v7126_v9 }
  0x70   :  { %853 = vmatpush.msrb.mxu1 %v852_v43  ;;  %919 = vmatpush.msrb.mxu2 %v4860_v21  ;;  %v98_v43 = vld [vmem:[#allocation5 + $0x138] sm:$0xff]  ;;  %v1111_v29 = vand.u32 4294901760, %v1110_v35  ;;  %v1139_v35 = vand.u32 4294901760, %v4979_v14 }
  0x71   :  { %954 = vmatpush.msrb.mxu3 %v4824_v42  ;;  %792 = vmatpush.msrb.mxu0 %v4837_v4  ;;  %v1117_v1 = vand.u32 4294901760, %v1116_v24  ;;  %v1123_v8 = vand.u32 4294901760, %v1122_v16 }
  0x72   :  { %859 = vmatpush.msrb.mxu1 %v858_v36  ;;  %922 = vmatpush.msrb.mxu2 %v4872_v45  ;;  %v4955_v36 = vsub.f32 %v125_v3, %v4930_v10  ;;  %v4969_v3 = vand.u32 4294901760, %v98_v43  ;;  %v1140_v28 = vsub.f32 %v4979_v14, %v1139_v35 }
  0x73   :  { %956 = vmatpush.msrb.mxu3 %v4837_v4  ;;  %794 = vmatpush.msrb.mxu0 %v4850_v20 }
  0x74   :  { %865 = vmatpush.msrb.mxu1 %v864_v39  ;;  %925 = vmatpush.msrb.mxu2 %v4886_v48  ;;  %v1105_v39 = vand.u32 4294901760, %v1104_v58  ;;  %v1127_v22 = vand.u32 4294901760, %v4955_v36  ;;  %v80_v58 = vld [vmem:[#allocation5 + $0xa8] sm:$0xff]  ;;  %v4992_v44 = vsub.f32 %v98_v43, %v4969_v3 }
  0x75   :  { %958 = vmatpush.msrb.mxu3 %v4850_v20  ;;  %796 = vmatpush.msrb.mxu0 %v4862_v6  ;;  %v5001_v9 = vand.u32 4294901760, %v80_v58 }
  0x76   :  { %871 = vmatpush.msrb.mxu1 %v870_v52  ;;  %928 = vmatpush.msrb.mxu2 %v4903_v55  ;;  %v4982_v52 = vand.u32 4294901760, %v89_v33  ;;  %v1145_v24 = vand.u32 4294901760, %v4992_v44 }
  0x77   :  { %960 = vmatpush.msrb.mxu3 %v4862_v6  ;;  %798 = vmatpush.msrb.mxu0 %v4878_v50 }
  0x78   :  { %1065 = vmatpush.msra.mxu2 %v4874_v17  ;;  %877 = vmatpush.msrb.mxu1 %v876_v19  ;;  %v71_v19 = vld [vmem:[#allocation5 + $0x60] sm:$0xff]  ;;  %v5006_v43 = vsub.f32 %v89_v33, %v4982_v52 }
  0x79   :  { %962 = vmatpush.msrb.mxu3 %v4878_v50  ;;  %977 = vmatpush.msra.mxu0 %v814_v38  ;;  %v1128_v38 = vsub.f32 %v4955_v36, %v1127_v22 }
  0x7a   :  { %1067 = vmatpush.msra.mxu2 %v4890_v51  ;;  %883 = vmatpush.msrb.mxu1 %v882_v11  ;;  %v5014_v11 = vand.u32 4294901760, %v71_v19 }
  0x7b   :  { %1106 = vmatpush.msra.mxu3 %v1105_v39  ;;  %981 = vmatpush.msra.mxu0 %v820_v59  ;;  %v62_v39 = vld [vmem:[#allocation5 + $0x18] sm:$0xff]  ;;  %v1134_v59 = vsub.f32 %v4967_v56, %v1133_v27 }
  0x7c   :  { %1032 = vmatpush.msra.mxu1 %v4748_v53  ;;  %1069 = vmatpush.msra.mxu2 %v4905_v41  ;;  %v1129_v53 = vand.u32 4294901760, %v1128_v38  ;;  %v5026_v33 = vand.u32 4294901760, %v62_v39  ;;  %v5037_v16 = vsub.f32 %v71_v19, %v5014_v11  ;;  %v7216_v19 = vand.u32 4294901760, %v4848_v5 }
  0x7d   :  { %1112 = vmatpush.msra.mxu3 %v1111_v29  ;;  %985 = vmatpush.msra.mxu0 %v826_v46  ;;  %v5024_v46 = vsub.f32 %v80_v58, %v5001_v9  ;;  %v1135_v54 = vand.u32 4294901760, %v1134_v59  ;;  %v7215_v58 = vand.u32 4294901760, %v4835_v32  ;;  %v7218_v38 = vand.u32 4294901760, %v4872_v45 }
  0x7e   :  { %1034 = vmatpush.msra.mxu1 %v4755_v60  ;;  %1071 = vmatpush.msra.mxu2 %v4917_v18  ;;  %v1151_v60 = vand.u32 4294901760, %v5006_v43  ;;  %v7221_v45 = vand.u32 4294901760, %v4903_v55 }
  0x7f   :  { %1118 = vmatpush.msra.mxu3 %v1117_v1  ;;  %989 = vmatpush.msra.mxu0 %v832_v15  ;;  %v1146_v15 = vsub.f32 %v4992_v44, %v1145_v24  ;;  %v1157_v0 = vand.u32 4294901760, %v5024_v46  ;;  %v7217_v1 = vand.u32 4294901760, %v4860_v21 }
  0x80   :  { %1036 = vmatpush.msra.mxu1 %v4760_v61  ;;  %1073 = vmatpush.msra.mxu2 %v4930_v10  ;;  %v1141_v61 = vand.u32 4294901760, %v1140_v28 }
  0x81   :  { %1124 = vmatpush.msra.mxu3 %v1123_v8  ;;  %993 = vmatpush.msra.mxu0 %v838_v26  ;;  %v5045_v26 = vsub.f32 %v62_v39, %v5026_v33  ;;  %v1147_v23 = vand.u32 4294901760, %v1146_v15  ;;  %v7220_v8 = vand.u32 4294901760, %v4898_v7 }
  0x82   :  { %1038 = vmatpush.msra.mxu1 %v4769_v2  ;;  %1075 = vmatpush.msra.mxu2 %v4942_v49  ;;  %v1152_v2 = vsub.f32 %v5006_v43, %v1151_v60 }
  0x83   :  { %1130 = vmatpush.msra.mxu3 %v1129_v53  ;;  %997 = vmatpush.msra.mxu0 %v844_v13  ;;  %v1163_v13 = vand.u32 4294901760, %v5037_v16  ;;  %v1169_v29 = vand.u32 4294901760, %v5045_v26 }
  0x84   :  { %1040 = vmatpush.msra.mxu1 %v4786_v40  ;;  %1077 = vmatpush.msra.mxu2 %v4957_v34  ;;  %v1158_v40 = vsub.f32 %v5024_v46, %v1157_v0  ;;  %v1153_v32 = vand.u32 4294901760, %v1152_v2 }
  0x85   :  { %1136 = vmatpush.msra.mxu3 %v1135_v54  ;;  %1001 = vmatpush.msra.mxu0 %v7215_v58  ;;  %v72_v54 = vld [vmem:[#allocation5 + $0x68] sm:$0xff] }
  0x86   :  { %1042 = vmatpush.msra.mxu1 %v4797_v25  ;;  %1079 = vmatpush.msra.mxu2 %v4969_v3  ;;  %v1164_v25 = vsub.f32 %v5037_v16, %v1163_v13  ;;  %v1159_v5 = vand.u32 4294901760, %v1158_v40  ;;  %v63_v40 = vld [vmem:[#allocation5 + $0x20] sm:$0xff] }
  0x87   :  { %1142 = vmatpush.msra.mxu3 %v1141_v61  ;;  %931 = vmatmul.f32.vlgmr.msrb.gmra.mxu2 %v4617_v31 }
  0x88   :  { %1005 = vmatpush.msra.mxu0 %v7216_v19  ;;  %1044 = vmatpush.msra.mxu1 %v4811_v63  ;;  %v1170_v63 = vsub.f32 %v5045_v26, %v1169_v29  ;;  %v1165_v39 = vand.u32 4294901760, %v1164_v25 }
  0x89   :  { %1081 = vmatpush.msra.mxu2 %v4982_v52  ;;  %1148 = vmatpush.msra.mxu3 %v1147_v23 }
  0x8a   :  { %804 = vmatmul.f32.vlgmr.msrb.gmra.mxu0 %v4679_v62  ;;  %966 = vmatmul.f32.vlgmr.msrb.gmra.mxu3 %v4638_v30  ;;  %v1171_v21 = vand.u32 4294901760, %v1170_v63 }
  0x8b   :  { %1009 = vmatpush.msra.mxu0 %v7217_v1  ;;  %1046 = vmatpush.msra.mxu1 %v4824_v42  ;;  %v7219_v42 = vand.u32 4294901760, %v4886_v48  ;;  %v153_v48 = vld [vmem:[#allocation5 + $0x2f0] sm:$0xff]  ;;  %v154_v1 = vld [vmem:[#allocation5 + $0x2f8] sm:$0xff] }
  0x8c   :  { %1083 = vmatpush.msra.mxu2 %v5001_v9  ;;  %1154 = vmatpush.msra.mxu3 %v1153_v32 }
  0x8d   :  { %885 = vmatmul.f32.vlgmr.msrb.gmra.mxu1 %v4595_v37  ;;  %1013 = vmatpush.msra.mxu0 %v7218_v38 }
  0x8e   :  { %1048 = vmatpush.msra.mxu1 %v4837_v4  ;;  %1085 = vmatpush.msra.mxu2 %v5014_v11  ;;  %v7222_v4 = vand.u32 4294901760, %v4915_v47 }
  0x8f   :  { %1160 = vmatpush.msra.mxu3 %v1159_v5  ;;  %1017 = vmatpush.msra.mxu0 %v7219_v42  ;;  %v5236_v5 = vld [vmem:[#allocation7] sm:$0xff] }
  0x90   :  { %1050 = vmatpush.msra.mxu1 %v4850_v20  ;;  %1087 = vmatpush.msra.mxu2 %v5026_v33  ;;  %v7223_v20 = vand.u32 4294901760, %v4928_v12 }
  0x91   :  { %1166 = vmatpush.msra.mxu3 %v1165_v39  ;;  %1021 = vmatpush.msra.mxu0 %v7221_v45 }
  0x92   :  { %1266 = vmatpush.msrb.mxu2 %v7220_v8  ;;  %1052 = vmatpush.msra.mxu1 %v4862_v6  ;;  %v7224_v6 = vand.u32 4294901760, %v4940_v57  ;;  %v5251_v8 = vand.u32 4294901760, %v63_v40 }
  0x93   :  { %1172 = vmatpush.msra.mxu3 %v1171_v21  ;;  %1023 = vmatmul.f32.vlgmr.msra.gmra.mxu0 %v4595_v37 }
  0x94   :  { %1184 = vmatpush.msrb.mxu0 %v4898_v7  ;;  %1270 = vmatpush.msrb.mxu2 %v7222_v4  ;;  %v5257_v4 = vand.u32 4294901760, %v154_v1 }
  0x95   :  { %1321 = vmatpush.msrb.mxu3 %v4874_v17  ;;  %1054 = vmatpush.msra.mxu1 %v4878_v50  ;;  %v162_v50 = vld [vmem:[#allocation5 + $0x338] sm:$0xff] }
  0x96   :  { %1056 = vmatmul.f32.vlgmr.msra.gmra.mxu1 %v4595_v37  ;;  %1187 = vmatpush.msrb.mxu0 %v4915_v47 }
  0x97   :  { %1229 = vmatpush.msrb.mxu1 %v4874_v17  ;;  %1274 = vmatpush.msrb.mxu2 %v7223_v20  ;;  %v5118_v17 = vand.u32 4294901760, %v162_v50  ;;  %v171_v20 = vperm.slane %v5236_v5, 0 }
  0x98   :  { %1323 = vmatpush.msrb.mxu3 %v4890_v51  ;;  %1190 = vmatpush.msrb.mxu0 %v4928_v12 }
  0x99   :  { %1231 = vmatpush.msrb.mxu1 %v4890_v51  ;;  %1278 = vmatpush.msrb.mxu2 %v7224_v6  ;;  %v5127_v51 = vand.u32 4294901760, %v153_v48 }
  0x9a   :  { %1325 = vmatpush.msrb.mxu3 %v4905_v41  ;;  %1193 = vmatpush.msrb.mxu0 %v4940_v57 }
  0x9b   :  { %1233 = vmatpush.msrb.mxu1 %v4905_v41  ;;  %1282 = vmatpush.msrb.mxu2 %v1127_v22  ;;  %v144_v22 = vld [vmem:[#allocation5 + $0x2a8] sm:$0xff]  ;;  %v126_v41 = vld [vmem:[#allocation5 + $0x218] sm:$0xff]  ;;  %v5147_v47 = vsub.f32 %v153_v48, %v5127_v51 }
  0x9c   :  { %1327 = vmatpush.msrb.mxu3 %v4917_v18  ;;  %1196 = vmatpush.msrb.mxu0 %v4955_v36  ;;  %v5137_v7 = vand.u32 4294901760, %v144_v22  ;;  %v108_v36 = vld [vmem:[#allocation5 + $0x188] sm:$0xff] }
  0x9d   :  { %1235 = vmatpush.msrb.mxu1 %v4917_v18  ;;  %1286 = vmatpush.msrb.mxu2 %v1133_v27  ;;  %v135_v27 = vld [vmem:[#allocation5 + $0x260] sm:$0xff]  ;;  %v117_v18 = vld [vmem:[#allocation5 + $0x1d0] sm:$0xff] }
  0x9e   :  { %1329 = vmatpush.msrb.mxu3 %v4930_v10  ;;  %1199 = vmatpush.msrb.mxu0 %v4967_v56  ;;  %v5133_v56 = vsub.f32 %v162_v50, %v5118_v17  ;;  %v5141_v55 = vand.u32 4294901760, %v135_v27 }
  0x9f   :  { %1237 = vmatpush.msrb.mxu1 %v4930_v10  ;;  %1290 = vmatpush.msrb.mxu2 %v1139_v35  ;;  %v5158_v10 = vand.u32 4294901760, %v126_v41 }
  0xa0   :  { %1331 = vmatpush.msrb.mxu3 %v4942_v49  ;;  %1202 = vmatpush.msrb.mxu0 %v4979_v14  ;;  %v7139_v12 = vand.u32 4294901760, %v5133_v56  ;;  %v5163_v57 = vsub.f32 %v135_v27, %v5141_v55 }
  0xa1   :  { %1239 = vmatpush.msrb.mxu1 %v4942_v49  ;;  %1294 = vmatpush.msrb.mxu2 %v1145_v24  ;;  %v5165_v49 = vand.u32 4294901760, %v117_v18  ;;  %v5181_v35 = vsub.f32 %v126_v41, %v5158_v10 }
  0xa2   :  { %1333 = vmatpush.msrb.mxu3 %v4957_v34  ;;  %1093 = vmatmul.f32.vlgmr.msra.gmra.mxu2 %v4679_v62  ;;  %v1393_v14 = vsub.f32 %v5133_v56, %v7139_v12  ;;  %v7134_v59 = vand.u32 4294901760, %v5163_v57 }
  0xa3   :  { %1205 = vmatpush.msrb.mxu0 %v4992_v44  ;;  %1241 = vmatpush.msrb.mxu1 %v4957_v34  ;;  %v5156_v34 = vsub.f32 %v144_v22, %v5137_v7  ;;  %v99_v44 = vld [vmem:[#allocation5 + $0x140] sm:$0xff]  ;;  %v5189_v24 = vsub.f32 %v117_v18, %v5165_v49  ;;  %v145_v22 = vld [vmem:[#allocation5 + $0x2b0] sm:$0xff]  ;;  %v136_v18 = vld [vmem:[#allocation5 + $0x268] sm:$0xff] }
  0xa4   :  { %1298 = vmatpush.msrb.mxu2 %v1151_v60  ;;  %1335 = vmatpush.msrb.mxu3 %v4969_v3  ;;  %v5196_v28 = vand.u32 4294901760, %v99_v44  ;;  %v1394_v60 = vand.u32 4294901760, %v1393_v14  ;;  %v5273_v14 = vsub.f32 %v63_v40, %v5251_v8  ;;  %v127_v40 = vld [vmem:[#allocation5 + $0x220] sm:$0xff] }
  0xa5   :  { %1174 = vmatmul.f32.vlgmr.msra.gmra.mxu3 %v4595_v37  ;;  %1208 = vmatpush.msrb.mxu0 %v5006_v43  ;;  %v5183_v43 = vand.u32 4294901760, %v108_v36 }
  0xa6   :  { %1243 = vmatpush.msrb.mxu1 %v4969_v3  ;;  %1302 = vmatpush.msrb.mxu2 %v1157_v0  ;;  %v7138_v3 = vand.u32 4294901760, %v5147_v47  ;;  %v5222_v23 = vsub.f32 %v99_v44, %v5196_v28 }
  0xa7   :  { %1337 = vmatpush.msrb.mxu3 %v4982_v52  ;;  %1211 = vmatpush.msrb.mxu0 %v5024_v46  ;;  %v81_v46 = vld [vmem:[#allocation5 + $0xb0] sm:$0xff]  ;;  %v5207_v61 = vsub.f32 %v108_v36, %v5183_v43 }
  0xa8   :  { %1245 = vmatpush.msrb.mxu1 %v4982_v52  ;;  %1306 = vmatpush.msrb.mxu2 %v1163_v13  ;;  %v7135_v52 = vand.u32 4294901760, %v5156_v34  ;;  %v1399_v53 = vsub.f32 %v5147_v47, %v7138_v3  ;;  %v5217_v2 = vand.u32 4294901760, %v81_v46  ;;  %v5224_v13 = vand.u32 4294901760, %v72_v54 }
  0xa9   :  { %1339 = vmatpush.msrb.mxu3 %v5001_v9  ;;  %1214 = vmatpush.msrb.mxu0 %v5037_v16  ;;  %v7133_v16 = vand.u32 4294901760, %v5181_v35  ;;  %v7131_v32 = vand.u32 4294901760, %v5207_v61  ;;  %v7130_v42 = vand.u32 4294901760, %v5222_v23 }
  0xaa   :  { %1247 = vmatpush.msrb.mxu1 %v5001_v9  ;;  %1310 = vmatpush.msrb.mxu2 %v1169_v29  ;;  %v90_v9 = vld [vmem:[#allocation5 + $0xf8] sm:$0xff]  ;;  %v1405_v15 = vsub.f32 %v5156_v34, %v7135_v52  ;;  %v1400_v58 = vand.u32 4294901760, %v1399_v53  ;;  %7226 = vst [vmem:[#allocation14_spill] sm:$0xff] %v5224_v13  ;;  %v163_v29 = vld [vmem:[#allocation5 + $0x340] sm:$0xff]  ;;  %v5244_v39 = vsub.f32 %v81_v46, %v5217_v2 }
  0xab   :  { %1341 = vmatpush.msrb.mxu3 %v5014_v11  ;;  %1312 = vmatmul.f32.vlgmr.msrb.gmra.mxu2 %v4595_v37  ;;  %v5209_v0 = vand.u32 4294901760, %v90_v9  ;;  %v5249_v21 = vsub.f32 %v72_v54, %v5224_v13  ;;  %v5253_v45 = vand.u32 4294901760, %v163_v29  ;;  %v1429_v50 = vsub.f32 %v5207_v61, %v7131_v32  ;;  %v82_v52 = vld [vmem:[#allocation5 + $0xb8] sm:$0xff] }
  0xac   :  { %1473 = vmatpush.msra.mxu2 %v5133_v56  ;;  %1217 = vmatpush.msrb.mxu0 %v5045_v26  ;;  %v7132_v26 = vand.u32 4294901760, %v5189_v24  ;;  %v1406_v19 = vand.u32 4294901760, %v1405_v15  ;;  %v7127_v41 = vand.u32 4294901760, %v5244_v39  ;;  %v1435_v36 = vsub.f32 %v5222_v23, %v7130_v42 }
  0xad   :  { %1249 = vmatpush.msrb.mxu1 %v5014_v11  ;;  %1343 = vmatpush.msrb.mxu3 %v5026_v33  ;;  %7225 = vst [vmem:[#allocation13_spill] sm:$0xff] %v5209_v0  ;;  %v1411_v11 = vsub.f32 %v5163_v57, %v7134_v59  ;;  %v5234_v25 = vsub.f32 %v90_v9, %v5209_v0  ;;  %v7128_v9 = vand.u32 4294901760, %v5249_v21  ;;  %v1430_v15 = vand.u32 4294901760, %v1429_v50 }
  0xae   :  { %1220 = vmatmul.f32.vlgmr.msrb.gmra.mxu0 %v4617_v31  ;;  %1345 = vmatmul.f32.vlgmr.msrb.gmra.mxu3 %v4595_v37  ;;  %v1423_v38 = vsub.f32 %v5189_v24, %v7132_v26  ;;  %v5276_v44 = vsub.f32 %v163_v29, %v5253_v45  ;;  %v5284_v54 = vsub.f32 %v154_v1, %v5257_v4  ;;  %v1436_v1 = vand.u32 4294901760, %v1435_v36 }
  0xaf   :  { %1354 = vmatpush.msra.mxu0 %v5118_v17  ;;  %1476 = vmatpush.msra.mxu2 %v5147_v47  ;;  %v1412_v63 = vand.u32 4294901760, %v1411_v11  ;;  %v7129_v48 = vand.u32 4294901760, %v5234_v25  ;;  %v1447_v29 = vsub.f32 %v5244_v39, %v7127_v41  ;;  %v5311_v41 = vand.u32 4294901760, %v127_v40 }
  0xb0   :  { %1518 = vmatpush.msra.mxu3 %v5118_v17  ;;  %1251 = vmatpush.msrb.mxu1 %v5026_v33  ;;  %v1417_v33 = vsub.f32 %v5181_v35, %v7133_v16  ;;  %v1424_v27 = vand.u32 4294901760, %v1423_v38  ;;  %7227 = vst [vmem:[#allocation15_spill] sm:$0xff] %v5276_v44  ;;  %v7136_v38 = vand.u32 4294901760, %v5276_v44  ;;  %v91_v16 = vld [vmem:[#allocation5 + $0x100] sm:$0xff] }
  0xb1   :  { %1255 = vmatmul.f32.vlgmr.msrb.gmra.mxu1 %v4638_v30  ;;  %1356 = vmatpush.msra.mxu0 %v5127_v51  ;;  %7228 = vst [vmem:[#allocation16_spill] sm:$0xff] %v5284_v54  ;;  %v1441_v11 = vsub.f32 %v5234_v25, %v7129_v48 }
  0xb2   :  { %1395 = vmatpush.msra.mxu1 %v1394_v60  ;;  %1479 = vmatpush.msra.mxu2 %v5156_v34  ;;  %v1418_v6 = vand.u32 4294901760, %v1417_v33  ;;  %v5281_v60 = vand.u32 4294901760, %v145_v22  ;;  %v109_v33 = vld [vmem:[#allocation5 + $0x190] sm:$0xff] }
  0xb3   :  { %1520 = vmatpush.msra.mxu3 %v5127_v51  ;;  %1358 = vmatpush.msra.mxu0 %v5137_v7  ;;  %v1442_v48 = vand.u32 4294901760, %v1441_v11  ;;  %v5319_v26 = vand.u32 4294901760, %v109_v33 }
  0xb4   :  { %1401 = vmatpush.msra.mxu1 %v1400_v58  ;;  %1482 = vmatpush.msra.mxu2 %v5163_v57  ;;  %v5290_v58 = vand.u32 4294901760, %v136_v18  ;;  %v5309_v36 = vsub.f32 %v145_v22, %v5281_v60  ;;  %v1448_v22 = vand.u32 4294901760, %v1447_v29  ;;  %v73_v29 = vld [vmem:[#allocation5 + $0x70] sm:$0xff] }
  0xb5   :  { %1522 = vmatpush.msra.mxu3 %v5137_v7  ;;  %1360 = vmatpush.msra.mxu0 %v5141_v55  ;;  %v354_v50 = vpop.f32.mrf.mxu2 }
  0xb6   :  { %1407 = vmatpush.msra.mxu1 %v1406_v19  ;;  %1485 = vmatpush.msra.mxu2 %v5181_v35  ;;  %v118_v19 = vld [vmem:[#allocation5 + $0x1d8] sm:$0xff]  ;;  %v5315_v42 = vsub.f32 %v136_v18, %v5290_v58  ;;  %v1682_v18 = vsub.f32 %v5276_v44, %v7136_v38  ;;  %v5340_v38 = vsub.f32 %v127_v40, %v5311_v41 }
  0xb7   :  { %1524 = vmatpush.msra.mxu3 %v5141_v55  ;;  %1362 = vmatpush.msra.mxu0 %v5158_v10  ;;  %v5317_v32 = vand.u32 4294901760, %v118_v19  ;;  %v5348_v44 = vsub.f32 %v109_v33, %v5319_v26 }
  0xb8   :  { %1413 = vmatpush.msra.mxu1 %v1412_v63  ;;  %1488 = vmatpush.msra.mxu2 %v5189_v24  ;;  %v5301_v63 = vsub.f32 %v5249_v21, %v7128_v9  ;;  %v100_v9 = vld [vmem:[#allocation5 + $0x148] sm:$0xff] }
  0xb9   :  { %v227_v53 = vpop.f32.mrf.mxu0  ;;  %1526 = vmatpush.msra.mxu3 %v5158_v10  ;;  %1364 = vmatpush.msra.mxu0 %v5165_v49  ;;  %v5331_v59 = vand.u32 4294901760, %v100_v9  ;;  %v5345_v12 = vsub.f32 %v118_v19, %v5317_v32  ;;  %v1683_v19 = vand.u32 4294901760, %v1682_v18 }
  0xba   :  { %v228_v46 = vadd.f32 %v227_v53, %v171_v20  ;;  %1419 = vmatpush.msra.mxu1 %v1418_v6  ;;  %1491 = vmatpush.msra.mxu2 %v5207_v61  ;;  %v7137_v20 = vand.u32 4294901760, %v5273_v14 }
  0xbb   :  { %1528 = vmatpush.msra.mxu3 %v5165_v49  ;;  %1366 = vmatpush.msra.mxu0 %v5183_v43  ;;  %v308_v6 = vpop.f32.mrf.mxu1  ;;  %v5362_v33 = vsub.f32 %v100_v9, %v5331_v59  ;;  %v7149_v18 = vand.u32 4294901760, %v5345_v12 }
  0xbc   :  { %1425 = vmatpush.msra.mxu1 %v1424_v27  ;;  %1494 = vmatpush.msra.mxu2 %v5222_v23  ;;  %v7143_v27 = vand.u32 4294901760, %v5284_v54  ;;  %v309_v53 = vadd.f32 %v308_v6, %v228_v46  ;;  %v1459_v11 = vsub.f32 %v5273_v14, %v7137_v20 }
  0xbd   :  { %1530 = vmatpush.msra.mxu3 %v5183_v43  ;;  %1368 = vmatpush.msra.mxu0 %v5196_v28  ;;  %v389_v6 = vpop.f32.mrf.mxu3 }
  0xbe   :  { %1431 = vmatpush.msra.mxu1 %v1430_v15  ;;  %1497 = vmatpush.msra.mxu2 %v5234_v25  ;;  %v355_v46 = vadd.f32 %v354_v50, %v309_v53  ;;  %v1454_v15 = vand.u32 4294901760, %v5301_v63  ;;  %v64_v50 = vld [vmem:[#allocation5 + $0x28] sm:$0xff]  ;;  %v7147_v63 = vand.u32 4294901760, %v5309_v36 }
  0xbf   :  { %1532 = vmatpush.msra.mxu3 %v5196_v28  ;;  %1370 = vmatpush.msra.mxu0 %v5209_v0 }
  0xc0   :  { %1437 = vmatpush.msra.mxu1 %v1436_v1  ;;  %1500 = vmatpush.msra.mxu2 %v5244_v39  ;;  %v1688_v1 = vsub.f32 %v5284_v54, %v7143_v27  ;;  %v390_v53 = vadd.f32 %v389_v6, %v355_v46  ;;  %v5354_v46 = vand.u32 4294901760, %v82_v52  ;;  %v5358_v6 = vand.u32 4294901760, %v64_v50 }
  0xc1   :  { %1534 = vmatpush.msra.mxu3 %v5209_v0  ;;  %1372 = vmatpush.msra.mxu0 %v5217_v2  ;;  %v5350_v0 = vand.u32 4294901760, %v91_v16  ;;  %v1460_v27 = vand.u32 4294901760, %v1459_v11 }
  0xc2   :  { %1443 = vmatpush.msra.mxu1 %v1442_v48  ;;  %1503 = vmatpush.msra.mxu2 %v5249_v21  ;;  %v446_v3 = vpop.f32.mrf.mxu0  ;;  %v5356_v48 = vand.u32 4294901760, %v73_v29  ;;  %v1689_v20 = vand.u32 4294901760, %v1688_v1  ;;  %v7230_v1 = vand.u32 4294901760, %v5133_v56  ;;  %v7231_v56 = vand.u32 4294901760, %v5147_v47 }
  0xc3   :  { %1536 = vmatpush.msra.mxu3 %v5217_v2  ;;  %1374 = vmatpush.msra.mxu0 %v5224_v13  ;;  %v447_v40 = vadd.f32 %v446_v3, %v390_v53  ;;  %v1694_v3 = vsub.f32 %v5309_v36, %v7147_v63  ;;  %v5378_v11 = vsub.f32 %v91_v16, %v5350_v0  ;;  %v7148_v63 = vand.u32 4294901760, %v5348_v44 }
  0xc4   :  { %1449 = vmatpush.msra.mxu1 %v1448_v22  ;;  %1506 = vmatpush.msra.mxu2 %v5273_v14  ;;  %v7229_v22 = vand.u32 4294901760, %v5315_v42  ;;  %v5388_v53 = vsub.f32 %v73_v29, %v5356_v48 }
  0xc5   :  { %1538 = vmatpush.msra.mxu3 %v5224_v13  ;;  %v479_v54 = vpop.f32.mrf.mxu1  ;;  %1376 = vmatpush.msra.mxu0 %v5251_v8  ;;  %v7153_v47 = vand.u32 4294901760, %v5378_v11 }
  0xc6   :  { %1643 = vmatpush.msrb.mxu2 %v5253_v45  ;;  %1455 = vmatpush.msra.mxu1 %v1454_v15  ;;  %v1700_v9 = vsub.f32 %v5315_v42, %v7229_v22  ;;  %v5375_v13 = vadd.f32 %v479_v54, %v447_v40  ;;  %v5385_v15 = vsub.f32 %v82_v52, %v5354_v46  ;;  %v7155_v54 = vand.u32 4294901760, %v5362_v33 }
  0xc7   :  { %1540 = vmatpush.msra.mxu3 %v5251_v8  ;;  %1555 = vmatpush.msrb.mxu0 %v7230_v1  ;;  %v5391_v22 = vsub.f32 %v64_v50, %v5358_v6  ;;  %v1695_v40 = vand.u32 4294901760, %v1694_v3  ;;  %v7232_v52 = vand.u32 4294901760, %v5340_v38  ;;  %v7233_v3 = vand.u32 4294901760, %v5156_v34 }
  0xc8   :  { %1645 = vmatpush.msrb.mxu2 %v5257_v4  ;;  %v2797_v16 = vand.u32 2139095040, %v5375_v13  ;;  %1461 = vmatpush.msra.mxu1 %v1460_v27  ;;  %v7154_v1 = vand.u32 2147483647, %v5375_v13  ;;  %v1701_v50 = vand.u32 4294901760, %v1700_v9  ;;  %v5421_v34 = vsub.f32 %v5362_v33, %v7155_v54 }
  0xc9   :  { %1684 = vmatpush.msrb.mxu3 %v1683_v19  ;;  %1559 = vmatpush.msrb.mxu0 %v7231_v56  ;;  %v1706_v29 = vsub.f32 %v5340_v38, %v7232_v52  ;;  %v1712_v19 = vsub.f32 %v5345_v12, %v7149_v18  ;;  %v1718_v56 = vsub.f32 %v5348_v44, %v7148_v63  ;;  %v7151_v52 = vand.u32 4294901760, %v5388_v53 }
  0xca   :  { %1610 = vmatpush.msrb.mxu1 %v5118_v17  ;;  %1647 = vmatpush.msrb.mxu2 %v5281_v60  ;;  %v2798_v27 = vshrl.u32 %v2797_v16, 23  ;;  %v7152_v17 = vand.u32 4294901760, %v5385_v15  ;;  %v7150_v9 = vand.u32 4294901760, %v5391_v22  ;;  %v2801_v63 = vand.u32 8388607, %v7154_v1 }
  0xcb   :  { %1690 = vmatpush.msrb.mxu3 %v1689_v20  ;;  %1563 = vmatpush.msrb.mxu0 %v7233_v3  ;;  %v7234_v20 = vand.u32 4294901760, %v5163_v57  ;;  %v1707_v3 = vand.u32 4294901760, %v1706_v29  ;;  %v1719_v57 = vand.u32 4294901760, %v1718_v56  ;;  %v172_v1 = vperm.slane %v5236_v5, 1 }
  0xcc   :  { %1612 = vmatpush.msrb.mxu1 %v5127_v51  ;;  %1649 = vmatpush.msrb.mxu2 %v5290_v58  ;;  %v4216_v16 = vadd.s32 4294967169, %v2798_v27  ;;  %v1713_v51 = vand.u32 4294901760, %v1712_v19  ;;  %v5432_v27 = vsub.f32 %v5378_v11, %v7153_v47  ;;  %v5439_v29 = vsub.f32 %v5385_v15, %v7152_v17 }
  0xcd   :  { %1696 = vmatpush.msrb.mxu3 %v1695_v40  ;;  %1567 = vmatpush.msrb.mxu0 %v7234_v20  ;;  %v7235_v40 = vand.u32 4294901760, %v5181_v35  ;;  %v5449_v19 = vsub.f32 %v5391_v22, %v7150_v9  ;;  %v1725_v35 = vand.u32 4294901760, %v5421_v34  ;;  %v2802_v56 = vor.u32 8388608, %v2801_v63 }
  0xce   :  { %1614 = vmatpush.msrb.mxu1 %v5137_v7  ;;  %1651 = vmatpush.msrb.mxu2 %v5311_v41  ;;  %v2804_v18 = vadd.s32 1, %v4216_v16  ;;  %v5444_v7 = vsub.f32 %v5388_v53, %v7151_v52  ;;  %v1731_v9 = vand.u32 4294901760, %v5432_v27  ;;  %vm2796_vm11 = vcmp.lt.s32.totalorder %v5375_v13, 0 }
  0xcf   :  { %1702 = vmatpush.msrb.mxu3 %v1701_v50  ;;  %1571 = vmatpush.msrb.mxu0 %v7235_v40  ;;  %v7236_v50 = vand.u32 4294901760, %v5189_v24  ;;  %v5473_v47 = vshll.u32 %v2802_v56, 8  ;;  %v7238_v24 = vand.u32 4294901760, %v5222_v23 }
  0xd0   :  { %1616 = vmatpush.msrb.mxu1 %v5141_v55  ;;  %1653 = vmatpush.msrb.mxu2 %v5317_v32  ;;  %vm2805_vm1 = vcmp.gt.s32.totalorder %v2804_v18, 0  ;;  %v7237_v55 = vand.u32 4294901760, %v5207_v61  ;;  %v7156_v61 = vmov 2102212464  }
  0xd1   :  { %1708 = vmatpush.msrb.mxu3 %v1707_v3  ;;  %1575 = vmatpush.msrb.mxu0 %v7236_v50  ;;  %v2806_v16 = vsel %vm2805_vm1, %v2804_v18, 0  ;;  %v7174_v3 = vmov 683565275   ;;  %v7160_v50 = vmov 2475754826  }
  0xd2   :  { %1618 = vmatpush.msrb.mxu1 %v5158_v10  ;;  %1655 = vmatpush.msrb.mxu2 %v5319_v26  ;;  %v5458_v20 = vshrl.u32 %v2806_v16, 5  ;;  %v2808_v40 = vand.u32 31, %v2806_v16  ;;  %v7158_v16 = vmov 2131351028  }
  0xd3   :  { %1714 = vmatpush.msrb.mxu3 %v1713_v51  ;;  %1579 = vmatpush.msrb.mxu0 %v7237_v55  ;;  %v7176_v55 = vmov 920167782  }
  0xd4   :  { %v2809_v18 = vsub.s32 32, %v2808_v40  ;;  %v2811_v10 = vshll.u32 %v7174_v3, %v2808_v40  ;;  %v2814_v52 = vshll.u32 %v7160_v50, %v2808_v40  ;;  %v2817_v51 = vshll.u32 %v7158_v16, %v2808_v40  ;;  %1620 = vmatpush.msrb.mxu1 %v5165_v49  ;;  %1657 = vmatpush.msrb.mxu2 %v5331_v59 }
  0xd5   :  { %v2820_v27 = vshll.u32 %v7156_v61, %v2808_v40  ;;  %v2823_v17 = vshll.u32 %v7176_v55, %v2808_v40  ;;  %1720 = vmatpush.msrb.mxu3 %v1719_v57  ;;  %1509 = vmatmul.f32.vlgmr.msra.gmra.mxu2 %v4617_v31  ;;  %vm2826_vm2 = vcmp.lt.s32.totalorder %v5458_v20, 1  ;;  %v7164_v57 = vmov 1326507024  }
  0xd6   :  { %v2812_v54 = vshrl.u32 %v7160_v50, %v2809_v18  ;;  %v2815_v63 = vshrl.u32 %v7158_v16, %v2809_v18  ;;  %v2818_v49 = vshrl.u32 %v7156_v61, %v2809_v18  ;;  %1583 = vmatpush.msrb.mxu0 %v7238_v24  ;;  %v2810_v40 = vshrl.u32 %v7174_v3, %v2809_v18  ;;  %v164_v61 = vld [vmem:[#allocation5 + $0x348] sm:$0xff] }
  0xd7   :  { %v2821_v56 = vshrl.u32 %v7176_v55, %v2809_v18  ;;  %v2824_v34 = vshrl.u32 %v7164_v57, %v2809_v18  ;;  %vm2829_vm3 = vcmp.lt.s32.totalorder %v5458_v20, 4  ;;  %1622 = vmatpush.msrb.mxu1 %v5183_v43  ;;  %1659 = vmatpush.msrb.mxu2 %v5350_v0  ;;  %v516_v5 = vpop.f32.mrf.mxu2  ;;  %vm2827_vm4 = vcmp.lt.s32.totalorder %v5458_v20, 2  ;;  %v155_v57 = vld [vmem:[#allocation5 + $0x300] sm:$0xff] }
  0xd8   :  { %v2813_v16 = vor.u32 %v2812_v54, %v2811_v10  ;;  %v2816_v50 = vor.u32 %v2815_v63, %v2814_v52  ;;  %v2819_v31 = vor.u32 %v2818_v49, %v2817_v51  ;;  %1726 = vmatpush.msrb.mxu3 %v1725_v35  ;;  %1382 = vmatmul.f32.vlgmr.msra.gmra.mxu0 %v4679_v62  ;;  %vm2828_vm5 = vcmp.lt.s32.totalorder %v5458_v20, 3  ;;  %v7241_v49 = vld [vmem:[#allocation13_spill] sm:$0xff] }
  0xd9   :  { %v2822_v23 = vor.u32 %v2821_v56, %v2820_v27  ;;  %v2825_v24 = vor.u32 %v2824_v34, %v2823_v17  ;;  %1544 = vmatmul.f32.vlgmr.msra.gmra.mxu3 %v4638_v30  ;;  %v7239_v43 = vand.u32 4294901760, %v5234_v25  ;;  %v517_v18 = vadd.f32 %v516_v5, %v172_v1  ;;  %1624 = vmatpush.msrb.mxu1 %v5196_v28 }
  0xda   :  { %v2831_v54 = vsel %vm2829_vm3, %v2819_v31, 2102212464  ;;  %v2834_v52 = vsel %vm2826_vm2, %v2813_v16, %v2816_v50  ;;  %v2838_v35 = vsel %vm2826_vm2, %v2816_v50, %v2819_v31  ;;  %1661 = vmatpush.msrb.mxu2 %v5354_v46  ;;  %v597_v17 = vpop.f32.mrf.mxu3  ;;  %v5503_v34 = vand.u32 4294901760, %v164_v61  ;;  %1732 = vmatpush.msrb.mxu3 %v1731_v9  ;;  %v146_v9 = vld [vmem:[#allocation5 + $0x2b8] sm:$0xff] }
  0xdb   :  { %1587 = vmatpush.msrb.mxu0 %v7239_v43  ;;  %v2830_v25 = vsel %vm2826_vm2, %v2810_v40, %v2813_v16  ;;  %v2835_v1 = vsel %vm2829_vm3, %v2822_v23, 920167782  ;;  %v2839_v63 = vsel %vm2829_vm3, %v2825_v24, 1326507024  ;;  %1463 = vmatmul.f32.vlgmr.msra.gmra.mxu1 %v4595_v37  ;;  %v598_v10 = vadd.f32 %v597_v17, %v517_v18 }
  0xdc   :  { %v2832_v28 = vsel %vm2828_vm5, %v2816_v50, %v2831_v54  ;;  %v2836_v51 = vsel %vm2828_vm5, %v2819_v31, %v2835_v1  ;;  %v2840_v27 = vsel %vm2828_vm5, %v2822_v23, %v2839_v63  ;;  %v7240_v16 = vand.u32 4294901760, %v5244_v39  ;;  %1626 = vmatpush.msrb.mxu1 %v7241_v49  ;;  %1663 = vmatpush.msrb.mxu2 %v5356_v48 }
  0xdd   :  { %v5521_v40 = vand.u32 4294901760, %v155_v57  ;;  %v2837_v56 = vsel %vm2827_vm4, %v2834_v52, %v2836_v51  ;;  %v2841_v50 = vsel %vm2827_vm4, %v2838_v35, %v2840_v27  ;;  %v2843_v5 = vand.u32 65535, %v5473_v47  ;;  %v643_v23 = vpop.f32.mrf.mxu0  ;;  %v5535_v52 = vld [vmem:[#allocation5 + $0x270] sm:$0xff] }
  0xde   :  { %1591 = vmatpush.msrb.mxu0 %v7240_v16  ;;  %v2844_v31 = vshrl.u32 %v5473_v47, 16  ;;  %v7242_v39 = vand.u32 4294901760, %v5439_v29  ;;  %v2845_v24 = vand.u32 65535, %v2841_v50  ;;  %v2846_v43 = vshrl.u32 %v2841_v50, 16  ;;  %1628 = vmatpush.msrb.mxu1 %v5217_v2  ;;  %v7245_v27 = vld [vmem:[#allocation15_spill] sm:$0xff] }
  0xdf   :  { %v2867_v18 = vand.u32 65535, %v2837_v56  ;;  %v2868_v54 = vshrl.u32 %v2837_v56, 16  ;;  %v7243_v17 = vand.u32 4294901760, %v5249_v21  ;;  %v5539_v35 = vsel %vm2827_vm4, %v2830_v25, %v2832_v28  ;;  %1665 = vmatpush.msrb.mxu2 %v5358_v6 }
  0xe0   :  { %1738 = vmatpush.msrb.mxu3 %v7242_v39  ;;  %v7244_v29 = vand.u32 4294901760, %v5444_v7  ;;  %v644_v1 = vadd.f32 %v643_v23, %v598_v10  ;;  %v5544_v63 = vand.u32 4294901760, %v146_v9  ;;  %v5546_v51 = vmul.u32 %v2846_v43, %v2843_v5  ;;  %v678_v49 = vpop.f32.mrf.mxu1  ;;  %1671 = vmatmul.f32.vlgmr.msrb.gmra.mxu2 %v4679_v62 }
  0xe1   :  { %1595 = vmatpush.msrb.mxu0 %v7243_v17  ;;  %v5548_v21 = vmul.u32 %v2845_v24, %v2844_v31  ;;  %v7246_v2 = vand.u32 4294901760, %v7245_v27  ;;  %v5553_v16 = vsub.f32 %v164_v61, %v5503_v34  ;;  %v5556_v20 = vsub.f32 %v155_v57, %v5521_v40  ;;  %v7248_v17 = vld [vmem:[#allocation14_spill] sm:$0xff] }
  0xe2   :  { %1744 = vmatpush.msrb.mxu3 %v7244_v29  ;;  %v2847_v25 = vmul.u32 %v2845_v24, %v2843_v5  ;;  %v5558_v28 = vmul.u32 %v2868_v54, %v2843_v5  ;;  %v5560_v7 = vmul.u32 %v2867_v18, %v2844_v31  ;;  %v7247_v10 = vand.u32 4294901760, %v5273_v14  ;;  %1630 = vmatpush.msrb.mxu1 %v7248_v17 }
  0xe3   :  { %1844 = vmatpush.msra.mxu2 %v7246_v2  ;;  %v5565_v56 = vand.u32 4294901760, %v5535_v52  ;;  %v2850_v50 = vmul.u32 %v2846_v43, %v2844_v31  ;;  %v2851_v39 = vshll.u32 %v5546_v51, 16  ;;  %v2869_v61 = vmul.u32 %v2867_v18, %v2843_v5  ;;  %v7250_v43 = vld [vmem:[#allocation16_spill] sm:$0xff]  ;;  %v735_v5 = vpop.f32.mrf.mxu2 }
  0xe4   :  { %1599 = vmatpush.msrb.mxu0 %v7247_v10  ;;  %v2872_v23 = vmul.u32 %v2868_v54, %v2844_v31  ;;  %v7249_v57 = vand.u32 4294901760, %v5449_v19  ;;  %v2852_v24 = vshrl.u32 %v5546_v51, 16  ;;  %v2853_v29 = vshll.u32 %v5548_v21, 16  ;;  %1632 = vmatpush.msrb.mxu1 %v5251_v8 }
  0xe5   :  { %v2854_v14 = vshrl.u32 %v5548_v21, 16  ;;  %v2873_v2 = vshll.u32 %v5558_v28, 16  ;;  %1601 = vmatmul.f32.vlgmr.msrb.gmra.mxu0 %v4595_v37  ;;  %v7251_v10 = vand.u32 4294901760, %v7250_v43  ;;  %vm2855_vm6 = vc.u32 %v2847_v25, %v2851_v39  ;;  %1634 = vmatmul.f32.vlgmr.msrb.gmra.mxu1 %v4595_v37 }
  0xe6   :  { %1750 = vmatpush.msrb.mxu3 %v7249_v57  ;;  %v2857_v31 = vadd.s32 %v2851_v39, %v2847_v25  ;;  %v2875_v18 = vshll.u32 %v5560_v7, 16  ;;  %1762 = vmatpush.msra.mxu0 %v7245_v27  ;;  %v679_v19 = vadd.f32 %v678_v49, %v644_v1  ;;  %v7172_v54 = vmov 0   ;;  %v768_v57 = vpop.f32.mrf.mxu3 }
  0xe7   :  { %1848 = vmatpush.msra.mxu2 %v7251_v10  ;;  %v2856_v51 = vsel %vm2855_vm6, 1, %v7172_v54  ;;  %vm2877_vm7 = vc.u32 %v2869_v61, %v2873_v2  ;;  %v2879_v21 = vadd.s32 %v2873_v2, %v2869_v61  ;;  %v7252_v17 = vand.u32 4294901760, %v5309_v36  ;;  %1807 = vmatpush.msra.mxu1 %v5253_v45 }
  0xe8   :  { %1899 = vmatpush.msra.mxu3 %v5253_v45  ;;  %v5586_v25 = vsub.f32 %v146_v9, %v5544_v63  ;;  %v2858_v39 = vadd.s32 %v2856_v51, %v2850_v50  ;;  %vm2859_vm8 = vc.u32 %v2857_v31, %v2853_v29  ;;  %v2878_v27 = vsel %vm2877_vm7, 1, %v7172_v54  ;;  %1765 = vmatpush.msra.mxu0 %v7250_v43 }
  0xe9   :  { %1852 = vmatpush.msra.mxu2 %v7252_v17  ;;  %v736_v1 = vadd.f32 %v735_v5, %v679_v19  ;;  %v2860_v49 = vsel %vm2859_vm8, 1, %v7172_v54  ;;  %v2880_v61 = vadd.s32 %v2878_v27, %v2872_v23  ;;  %vm2881_vm9 = vc.u32 %v2879_v21, %v2875_v18  ;;  %v128_v23 = vld [vmem:[#allocation5 + $0x228] sm:$0xff]  ;;  %1809 = vmatpush.msra.mxu1 %v5257_v4 }
  0xea   :  { %1901 = vmatpush.msra.mxu3 %v5257_v4  ;;  %v7171_v8 = vand.u32 4294901760, %v5553_v16  ;;  %v2862_v9 = vadd.s32 %v2860_v49, %v2858_v39  ;;  %v2874_v50 = vshrl.u32 %v5558_v28, 16  ;;  %v2882_v29 = vsel %vm2881_vm9, 1, %v7172_v54  ;;  %1768 = vmatpush.msra.mxu0 %v5309_v36 }
  0xeb   :  { %v7253_v2 = vand.u32 4294901760, %v5315_v42  ;;  %v5600_v43 = vadd.f32 %v768_v57, %v736_v1  ;;  %v2876_v10 = vshrl.u32 %v5560_v7, 16  ;;  %v2884_v45 = vadd.s32 %v2882_v29, %v2880_v61  ;;  %1811 = vmatpush.msra.mxu1 %v5281_v60  ;;  %1752 = vmatmul.f32.vlgmr.msrb.gmra.mxu3 %v4595_v37 }
  0xec   :  { %1903 = vmatpush.msra.mxu3 %v5281_v60  ;;  %v7170_v5 = vand.u32 4294901760, %v5556_v20  ;;  %v5608_v28 = vsub.f32 %v5535_v52, %v5565_v56  ;;  %v2863_v36 = vadd.s32 %v2862_v9, %v2852_v24  ;;  %1771 = vmatpush.msra.mxu0 %v5315_v42  ;;  %v7254_v31 = vand.u32 4294901760, %v5340_v38 }
  0xed   :  { %1856 = vmatpush.msra.mxu2 %v7253_v2  ;;  %v7166_v19 = vand.u32 2147483647, %v5600_v43  ;;  %v2952_v7 = vand.u32 2139095040, %v5600_v43  ;;  %v7169_v4 = vand.u32 4294901760, %v5586_v25  ;;  %v2883_v51 = vadd.s32 %v2879_v21, %v2875_v18  ;;  %v119_v21 = vld [vmem:[#allocation5 + $0x1e0] sm:$0xff]  ;;  %1813 = vmatpush.msra.mxu1 %v5290_v58 }
  0xee   :  { %v2885_v17 = vadd.s32 %v2884_v45, %v2874_v50  ;;  %1905 = vmatpush.msra.mxu3 %v5290_v58  ;;  %v5621_v52 = vsub.f32 %v5553_v16, %v7171_v8  ;;  %v5623_v42 = vand.u32 4294901760, %v128_v23  ;;  %v2864_v24 = vadd.s32 %v2863_v36, %v2854_v14  ;;  %1774 = vmatpush.msra.mxu0 %v5340_v38  ;;  %v110_v45 = vld [vmem:[#allocation5 + $0x198] sm:$0xff] }
  0xef   :  { %1860 = vmatpush.msra.mxu2 %v7254_v31  ;;  %v7255_v57 = vand.u32 4294901760, %v5345_v12  ;;  %v2953_v39 = vshrl.u32 %v2952_v7, 23  ;;  %v2956_v18 = vand.u32 8388607, %v7166_v19  ;;  %v7168_v60 = vand.u32 4294901760, %v5608_v28  ;;  %1815 = vmatpush.msra.mxu1 %v5311_v41 }
  0xf0   :  { %v2886_v27 = vadd.s32 %v2885_v17, %v2876_v10  ;;  %1907 = vmatpush.msra.mxu3 %v5311_v41  ;;  %v5636_v14 = vsub.f32 %v5556_v20, %v7170_v5  ;;  %v5639_v38 = vsub.f32 %v128_v23, %v5623_v42  ;;  %vm2889_vm10 = vc.u32 %v2864_v24, %v2883_v51 }
  0xf1   :  { %1864 = vmatpush.msra.mxu2 %v7255_v57  ;;  %1777 = vmatpush.msra.mxu0 %v5345_v12  ;;  %v7256_v1 = vand.u32 4294901760, %v5348_v44  ;;  %v4219_v49 = vadd.s32 4294967169, %v2953_v39  ;;  %v2957_v61 = vor.u32 8388608, %v2956_v18  ;;  %v5647_v58 = vsub.f32 %v5586_v25, %v7169_v4 }
  0xf2   :  { %v2890_v9 = vadd.s32 1, %v2886_v27  ;;  %1909 = vmatpush.msra.mxu3 %v5317_v32  ;;  %v5651_v50 = vand.u32 4294901760, %v119_v21  ;;  %v7167_v29 = vand.u32 4294901760, %v5639_v38  ;;  %v2887_v12 = vmul.u32 %v5473_v47, %v5539_v35  ;;  %1817 = vmatpush.msra.mxu1 %v5317_v32 }
  0xf3   :  { %1868 = vmatpush.msra.mxu2 %v7256_v1  ;;  %1780 = vmatpush.msra.mxu0 %v5348_v44  ;;  %v7257_v2 = vand.u32 4294901760, %v5362_v33  ;;  %v2959_v23 = vadd.s32 1, %v4219_v49  ;;  %v5659_v10 = vshll.u32 %v2957_v61, 8  ;;  %v5664_v41 = vsub.f32 %v5608_v28, %v7168_v60 }
  0xf4   :  { %v2891_v36 = vsel %vm2889_vm10, %v2890_v9, %v2886_v27  ;;  %1911 = vmatpush.msra.mxu3 %v5319_v26  ;;  %v1972_v44 = vand.u32 4294901760, %v5621_v52  ;;  %v5674_v47 = vsub.f32 %v5639_v38, %v7167_v29  ;;  %v7258_v35 = vand.u32 2147483647, %v5375_v13  ;;  %1819 = vmatpush.msra.mxu1 %v5319_v26 }
  0xf5   :  { %1872 = vmatpush.msra.mxu2 %v7257_v2  ;;  %v2892_v7 = vadd.s32 %v2891_v36, %v2887_v12  ;;  %1783 = vmatpush.msra.mxu0 %v5362_v33  ;;  %vm2960_vm13 = vcmp.gt.s32.totalorder %v2959_v23, 0  ;;  %v5686_v57 = vadd.s32 %v2883_v51, %v2864_v24  ;;  %v7261_v39 = vand.u32 4294901760, %v5378_v11 }
  0xf6   :  { %vm5678_vm12 = vcmp.le.f32.partialorder %v7258_v35, 0.7853982  ;;  %v2961_v18 = vsel %vm2960_vm13, %v2959_v23, 0  ;;  %v5692_v27 = vsub.f32 %v119_v21, %v5651_v50  ;;  %v5694_v1 = vand.u32 4294901760, %v110_v45  ;;  %1913 = vmatpush.msra.mxu3 %v5331_v59  ;;  %1821 = vmatpush.msra.mxu1 %v5331_v59 }
  0xf7   :  { %1876 = vmatpush.msra.mxu2 %v7261_v39  ;;  %v2893_v49 = vadd.s32 536870912, %v2892_v7  ;;  %v2963_v33 = vand.u32 31, %v2961_v18  ;;  %v5698_v61 = vand.u32 65535, %v5659_v10  ;;  %1786 = vmatpush.msra.mxu0 %v5378_v11  ;;  %v5703_v51 = vshrl.u32 %v2961_v18, 5 }
  0xf8   :  { %v5706_v24 = vshrl.u32 %v5659_v10, 16  ;;  %v5711_v9 = vsub.f32 %v110_v45, %v5694_v1  ;;  %v7262_v23 = vmov 2475754826   ;;  %v7263_v35 = vand.u32 4294901760, %v5385_v15  ;;  %1915 = vmatpush.msra.mxu3 %v5350_v0  ;;  %1823 = vmatpush.msra.mxu1 %v5350_v0 }
  0xf9   :  { %v2894_v12 = vshrl.u32 %v2893_v49, 30  ;;  %v2964_v2 = vsub.s32 32, %v2963_v33  ;;  %v2966_v11 = vshll.u32 %v7174_v3, %v2963_v33  ;;  %v2969_v36 = vshll.u32 %v7262_v23, %v2963_v33  ;;  %1789 = vmatpush.msra.mxu0 %v5385_v15 }
  0xfa   :  { %1880 = vmatpush.msra.mxu2 %v7263_v35  ;;  %v7264_v39 = vmov 2131351028   ;;  %v7265_v19 = vmov 2102212464   ;;  %v5721_v29 = vshll.u32 %v7176_v55, %v2963_v33  ;;  %v7183_v45 = vand.u32 4294901760, %v5692_v27  ;;  %1917 = vmatpush.msra.mxu3 %v5354_v46 }
  0xfb   :  { %v2972_v18 = vshll.u32 %v7264_v39, %v2963_v33  ;;  %v2975_v59 = vshll.u32 %v7265_v19, %v2963_v33  ;;  %v2895_v49 = vshll.u32 %v2894_v12, 30  ;;  %v2918_v60 = vsub.s32 4, %v2894_v12  ;;  %1792 = vmatpush.msra.mxu0 %v5388_v53  ;;  %1825 = vmatpush.msra.mxu1 %v5354_v46  ;;  %v101_v46 = vld [vmem:[#allocation5 + $0x150] sm:$0xff] }
  0xfc   :  { %v2965_v4 = vshrl.u32 %v7174_v3, %v2964_v2  ;;  %v2967_v35 = vshrl.u32 %v7262_v23, %v2964_v2  ;;  %v7266_v5 = vand.u32 4294901760, %v5388_v53  ;;  %v2970_v33 = vshrl.u32 %v7264_v39, %v2964_v2  ;;  %1919 = vmatpush.msra.mxu3 %v5356_v48 }
  0xfd   :  { %v2973_v8 = vshrl.u32 %v7265_v19, %v2964_v2  ;;  %v2976_v15 = vshrl.u32 %v7176_v55, %v2964_v2  ;;  %v7267_v0 = vmov 1326507024   ;;  %v5736_v21 = vsub.s32 %v2892_v7, %v2895_v49  ;;  %1795 = vmatpush.msra.mxu0 %v5391_v22  ;;  %1827 = vmatpush.msra.mxu1 %v5356_v48  ;;  %v5762_v7 = vld [vmem:[#allocation5 + $0xc0] sm:$0xff] }
  0xfe   :  { %1884 = vmatpush.msra.mxu2 %v7266_v5  ;;  %v2979_v54 = vshrl.u32 %v7267_v0, %v2964_v2  ;;  %v2919_v3 = vsel %vm2796_vm11, %v2918_v60, %v2894_v12  ;;  %v2968_v26 = vor.u32 %v2967_v35, %v2966_v11  ;;  %vm2981_vm14 = vcmp.lt.s32.totalorder %v5703_v51, 1  ;;  %1921 = vmatpush.msra.mxu3 %v5358_v6 }
  0xff   :  { %v7268_v5 = vand.u32 4294901760, %v5391_v22  ;;  %v2921_v55 = vsel %vm5678_vm12, 0, %v2919_v3  ;;  %v2971_v17 = vor.u32 %v2970_v33, %v2969_v36  ;;  %v2974_v2 = vor.u32 %v2973_v8, %v2972_v18  ;;  %1923 = vmatmul.f32.vlgmr.msra.gmra.mxu3 %v4595_v37  ;;  %1932 = vmatpush.msrb.mxu0 %v5503_v34 }
 0x100   :  { %v2977_v32 = vor.u32 %v2976_v15, %v2975_v59  ;;  %vm2897_vm15 = vcmp.lt.s32.totalorder %v5736_v21, 0  ;;  %v2898_v53 = vsub.s32 0, %v5736_v21  ;;  %v2938_v60 = vadd.s32 3, %v2921_v55  ;;  %v5760_v55 = vld [vmem:[#allocation5 + $0x108] sm:$0xff]  ;;  %2096 = vmatpush.msrb.mxu3 %v5503_v34  ;;  %1829 = vmatpush.msra.mxu1 %v5358_v6 }
 0x101   :  { %1888 = vmatpush.msra.mxu2 %v7268_v5  ;;  %vm2982_vm0 = vcmp.lt.s32.totalorder %v5703_v51, 2  ;;  %v2980_v3 = vor.u32 %v2979_v54, %v5721_v29  ;;  %vm2983_vm1 = vcmp.lt.s32.totalorder %v5703_v51, 3  ;;  %vm2984_vm2 = vcmp.lt.s32.totalorder %v5703_v51, 4  ;;  %1833 = vmatmul.f32.vlgmr.msra.gmra.mxu1 %v4638_v30 }
 0x102   :  { %1890 = vmatmul.f32.vlgmr.msra.gmra.mxu2 %v4595_v37  ;;  %v2985_v8 = vsel %vm2981_vm14, %v2965_v4, %v2968_v26  ;;  %v2899_v22 = vsel %vm2897_vm15, %v2898_v53, %v5736_v21  ;;  %v2986_v54 = vsel %vm2984_vm2, %v2974_v2, 2102212464  ;;  %v2989_v29 = vsel %vm2981_vm14, %v2968_v26, %v2971_v17  ;;  %v7269_v4 = vld [vmem:[#allocation12_spill] sm:$0xff]  ;;  %1934 = vmatpush.msrb.mxu0 %v5521_v40 }
 0x103   :  { %2051 = vmatpush.msrb.mxu2 %v5553_v16  ;;  %v2990_v12 = vsel %vm2984_vm2, %v2977_v32, 920167782  ;;  %1798 = vmatmul.f32.vlgmr.msra.gmra.mxu0 %v7269_v4  ;;  %v2900_v48 = vclz %v2899_v22  ;;  %v2987_v11 = vsel %vm2983_vm1, %v2971_v17, %v2986_v54  ;;  %v5779_v18 = vand.u32 4294901760, %v101_v46 }
 0x104   :  { %v2991_v36 = vsel %vm2983_vm1, %v2974_v2, %v2990_v12  ;;  %v5781_v26 = vand.u32 3, %v2938_v60  ;;  %v2993_v59 = vsel %vm2981_vm14, %v2971_v17, %v2974_v2  ;;  %v5788_v49 = vand.u32 4294901760, %v5760_v55  ;;  %1973 = vmatpush.msrb.mxu1 %v1972_v44  ;;  %2098 = vmatpush.msrb.mxu3 %v5521_v40 }
 0x105   :  { %2054 = vmatpush.msrb.mxu2 %v5556_v20  ;;  %v5791_v35 = vand.u32 4294901760, %v5762_v7  ;;  %v4217_v33 = vadd.s32 4294967294, %v2900_v48  ;;  %v5795_v15 = vsel %vm2982_vm0, %v2985_v8, %v2987_v11  ;;  %v2992_v5 = vsel %vm2982_vm0, %v2989_v29, %v2991_v36  ;;  %1936 = vmatpush.msrb.mxu0 %v5544_v63 }
 0x106   :  { %v2994_v17 = vsel %vm2984_vm2, %v2980_v3, 1326507024  ;;  %v3022_v2 = vand.u32 65535, %v2992_v5  ;;  %v3023_v53 = vshrl.u32 %v2992_v5, 16  ;;  %v5811_v60 = vsub.f32 %v5692_v27, %v7183_v45  ;;  %2100 = vmatpush.msrb.mxu3 %v5544_v63 }
 0x107   :  { %v2995_v6 = vsel %vm2983_vm1, %v2977_v32, %v2994_v17  ;;  %2057 = vmatpush.msrb.mxu2 %v5586_v25  ;;  %vm4218_vm3 = vcmp.lt.s32.totalorder %v4217_v33, 0  ;;  %v5818_v32 = vsub.f32 %v101_v46, %v5779_v18  ;;  %v7181_v52 = vand.u32 4294901760, %v5711_v9  ;;  %1938 = vmatpush.msrb.mxu0 %v5565_v56 }
 0x108   :  { %v2996_v3 = vsel %vm2982_vm0, %v2993_v59, %v2995_v6  ;;  %v2903_v44 = vsel %vm4218_vm3, 0, %v4217_v33  ;;  %v3024_v54 = vmul.u32 %v3022_v2, %v5698_v61  ;;  %v7270_v29 = vand.u32 4294901760, %v5636_v14  ;;  %2102 = vmatpush.msrb.mxu3 %v5565_v56 }
 0x109   :  { %v3000_v8 = vand.u32 65535, %v2996_v3  ;;  %v3001_v22 = vshrl.u32 %v2996_v3, 16  ;;  %2060 = vmatpush.msrb.mxu2 %v5608_v28  ;;  %v2904_v51 = vsub.s32 32, %v2903_v44  ;;  %v2905_v12 = vshll.u32 %v5736_v21, %v2903_v44  ;;  %1940 = vmatpush.msrb.mxu0 %v5623_v42 }
 0x10a   :  { %1979 = vmatpush.msrb.mxu1 %v7270_v29  ;;  %v2908_v48 = vsub.s32 4294967266, %v2903_v44  ;;  %v5827_v11 = vmul.u32 %v3023_v53, %v5698_v61  ;;  %v7271_v33 = vand.u32 4294901760, %v5647_v58  ;;  %v5841_v17 = vmul.u32 %v3022_v2, %v5706_v24  ;;  %2104 = vmatpush.msrb.mxu3 %v5623_v42 }
 0x10b   :  { %v3002_v46 = vmul.u32 %v3000_v8, %v5698_v61  ;;  %v3003_v36 = vmul.u32 %v3001_v22, %v5698_v61  ;;  %v5834_v14 = vmul.u32 %v3000_v8, %v5706_v24  ;;  %v3005_v59 = vmul.u32 %v3001_v22, %v5706_v24  ;;  %2063 = vmatpush.msrb.mxu2 %v5639_v38 }
 0x10c   :  { %1985 = vmatpush.msrb.mxu1 %v7271_v33  ;;  %v2906_v21 = vshrl.u32 %v5686_v57, %v2904_v51  ;;  %v2909_v5 = vadd.s32 127, %v2908_v48  ;;  %v3027_v6 = vmul.u32 %v3023_v53, %v5706_v24  ;;  %v7272_v58 = vand.u32 4294901760, %v5664_v41  ;;  %1942 = vmatpush.msrb.mxu0 %v5651_v50 }
 0x10d   :  { %v3006_v61 = vshll.u32 %v3003_v36, 16  ;;  %v3007_v3 = vshrl.u32 %v3003_v36, 16  ;;  %v3008_v44 = vshll.u32 %v5834_v14, 16  ;;  %v3009_v8 = vshrl.u32 %v5834_v14, 16  ;;  %2066 = vmatpush.msrb.mxu2 %v5692_v27  ;;  %2106 = vmatpush.msrb.mxu3 %v5651_v50 }
 0x10e   :  { %1991 = vmatpush.msrb.mxu1 %v7272_v58  ;;  %v2907_v57 = vor.u32 %v2906_v21, %v2905_v12  ;;  %v2910_v2 = vshll.u32 %v2909_v5, 23  ;;  %v3028_v22 = vshll.u32 %v5827_v11, 16  ;;  %v3029_v24 = vshrl.u32 %v5827_v11, 16  ;;  %1944 = vmatpush.msrb.mxu0 %v5694_v1 }
 0x10f   :  { %vm3010_vm4 = vc.u32 %v3002_v46, %v3006_v61  ;;  %v3012_v53 = vadd.s32 %v3006_v61, %v3002_v46  ;;  %v3030_v29 = vshll.u32 %v5841_v17, 16  ;;  %v3031_v51 = vshrl.u32 %v5841_v17, 16  ;;  %2069 = vmatpush.msrb.mxu2 %v5711_v9  ;;  %2108 = vmatpush.msrb.mxu3 %v5694_v1 }
 0x110   :  { %v7273_v41 = vand.u32 4294901760, %v5674_v47  ;;  %v2911_v12 = vor.u32 4788187, %v2910_v2  ;;  %v2914_v48 = vcvt.s32.f32 %v2907_v57  ;;  %v7274_v36 = vmov 0   ;;  %1946 = vmatpush.msrb.mxu0 %v5779_v18  ;;  %v65_v2 = vld [vmem:[#allocation5 + $0x30] sm:$0xff] }
 0x111   :  { %v3011_v14 = vsel %vm3010_vm4, 1, %v7274_v36  ;;  %vm3032_vm5 = vc.u32 %v3024_v54, %v3028_v22  ;;  %vm3014_vm6 = vc.u32 %v3012_v53, %v3008_v44  ;;  %v3034_v33 = vadd.s32 %v3028_v22, %v3024_v54  ;;  %2072 = vmatpush.msrb.mxu2 %v5818_v32  ;;  %2110 = vmatpush.msrb.mxu3 %v5779_v18 }
 0x112   :  { %1997 = vmatpush.msrb.mxu1 %v7273_v41  ;;  %v3013_v11 = vadd.s32 %v3011_v14, %v3005_v59  ;;  %v3033_v46 = vsel %vm3032_vm5, 1, %v7274_v36  ;;  %v2912_v21 = vand.u32 2147483647, %v2911_v12  ;;  %v3015_v47 = vsel %vm3014_vm6, 1, %v7274_v36  ;;  %v74_v59 = vld [vmem:[#allocation5 + $0x78] sm:$0xff]  ;;  %1948 = vmatpush.msrb.mxu0 %v5788_v49 }
 0x113   :  { %v3035_v5 = vadd.s32 %v3033_v46, %v3027_v6  ;;  %v2002_v17 = vand.u32 4294901760, %v5811_v60  ;;  %vm3036_vm7 = vc.u32 %v3034_v33, %v3030_v29  ;;  %v5869_v58 = vadd.s32 %v3034_v33, %v3030_v29  ;;  %2112 = vmatpush.msrb.mxu3 %v5788_v49 }
 0x114   :  { %v3017_v61 = vadd.s32 %v3015_v47, %v3013_v11  ;;  %v2007_v54 = vsub.f32 %v5711_v9, %v7181_v52  ;;  %v2915_v44 = vmul.f32 %v2914_v48, %v2912_v21  ;;  %v3037_v6 = vsel %vm3036_vm7, 1, %v7274_v36  ;;  %1950 = vmatpush.msrb.mxu0 %v5791_v35  ;;  %v138_v52 = vld [vmem:[#allocation5 + $0x278] sm:$0xff] }
 0x115   :  { %2003 = vmatpush.msrb.mxu1 %v2002_v17  ;;  %v5878_v60 = vsub.f32 %v5760_v55, %v5788_v49  ;;  %v7180_v57 = vand.u32 4294901760, %v5818_v32  ;;  %v3039_v53 = vadd.s32 %v3037_v6, %v3035_v5  ;;  %v5885_v41 = vsub.f32 %v5762_v7, %v5791_v35  ;;  %2114 = vmatpush.msrb.mxu3 %v5791_v35  ;;  %v156_v5 = vld [vmem:[#allocation5 + $0x308] sm:$0xff] }
 0x116   :  { %v3018_v22 = vadd.s32 %v3017_v61, %v3007_v3  ;;  %v2008_v29 = vand.u32 4294901760, %v2007_v54  ;;  %v2916_v12 = vxor.u32 2147483648, %v2915_v44  ;;  %v5893_v3 = vand.u32 4294901760, %v74_v59 }
 0x117   :  { %2075 = vmatpush.msrb.mxu2 %v5878_v60  ;;  %v2013_v55 = vsub.f32 %v5818_v32, %v7180_v57  ;;  %v7179_v48 = vand.u32 4294901760, %v5878_v60  ;;  %v3040_v11 = vadd.s32 %v3039_v53, %v3029_v24  ;;  %v7178_v7 = vand.u32 4294901760, %v5885_v41  ;;  %v165_v24 = vld [vmem:[#allocation5 + $0x350] sm:$0xff]  ;;  %v147_v53 = vld [vmem:[#allocation5 + $0x2c0] sm:$0xff] }
 0x118   :  { %v5895_v14 = vadd.s32 %v3018_v22, %v3009_v8  ;;  %2009 = vmatpush.msrb.mxu1 %v2008_v29  ;;  %v5899_v46 = vand.u32 4294901760, %v65_v2  ;;  %v2917_v33 = vsel %vm2796_vm11, %v2916_v12, %v2915_v44  ;;  %v5908_v8 = vsub.f32 %v74_v59, %v5893_v3  ;;  %1952 = vmatpush.msrb.mxu0 %v5893_v3 }
 0x119   :  { %v2014_v21 = vand.u32 4294901760, %v2013_v55  ;;  %2078 = vmatpush.msrb.mxu2 %v5885_v41  ;;  %v2019_v47 = vsub.f32 %v5878_v60, %v7179_v48  ;;  %v5914_v17 = vsel %vm5678_vm12, %v5375_v13, %v2917_v33  ;;  %v3041_v61 = vadd.s32 %v3040_v11, %v3031_v51  ;;  %2116 = vmatpush.msrb.mxu3 %v5893_v3  ;;  %v805_v11 = vpop.f32.mrf.mxu0 }
 0x11a   :  { %v3042_v54 = vmul.u32 %v5659_v10, %v5795_v15  ;;  %vm3044_vm8 = vc.u32 %v5895_v14, %v5869_v58  ;;  %v5923_v59 = vmul.f32 %v5914_v17, %v5914_v17  ;;  %v2025_v31 = vsub.f32 %v5885_v41, %v7178_v7  ;;  %1954 = vmatpush.msrb.mxu0 %v5899_v46 }
 0x11b   :  { %2015 = vmatpush.msrb.mxu1 %v2014_v21  ;;  %v2020_v44 = vand.u32 4294901760, %v2019_v47  ;;  %2081 = vmatpush.msrb.mxu2 %v5908_v8  ;;  %v5930_v51 = vsub.f32 %v65_v2, %v5899_v46  ;;  %v3045_v10 = vadd.s32 1, %v3041_v61  ;;  %v5933_v15 = vand.u32 4294901760, %v165_v24 }
 0x11c   :  { %v7182_v6 = vand.u32 4294901760, %v5908_v8  ;;  %v5937_v22 = vand.u32 4294901760, %v156_v5  ;;  %v2923_v29 = vmul.f32 -0.001358992, %v5923_v59  ;;  %v2930_v12 = vmul.f32 -0.00019511016, %v5923_v59  ;;  %2118 = vmatpush.msrb.mxu3 %v5899_v46  ;;  %1960 = vmatmul.f32.vlgmr.msrb.gmra.mxu0 %v4679_v62 }
 0x11d   :  { %2021 = vmatpush.msrb.mxu1 %v2020_v44  ;;  %v2026_v55 = vand.u32 4294901760, %v2025_v31  ;;  %2084 = vmatpush.msrb.mxu2 %v5930_v51  ;;  %v2036_v2 = vand.u32 4294901760, %v5930_v51  ;;  %v3046_v33 = vsel %vm3044_vm8, %v3045_v10, %v3041_v61  ;;  %v5948_v21 = vsub.f32 %v165_v24, %v5933_v15  ;;  %v5954_v44 = vld [vmem:[#allocation7] sm:$0xff]  ;;  %v886_v10 = vpop.f32.mrf.mxu1 }
 0x11e   :  { %v2031_v47 = vsub.f32 %v5908_v8, %v7182_v6  ;;  %7275 = vst [vmem:[#allocation13_spill] sm:$0xff] %v5954_v44  ;;  %v173_v31 = vperm.slane %v5954_v44, 2  ;;  %v2924_v7 = vadd.f32 0.041655596, %v2923_v29  ;;  %v2931_v48 = vadd.f32 0.008332121, %v2930_v12  ;;  %2087 = vmatmul.f32.vlgmr.msrb.gmra.mxu2 %v7269_v4  ;;  %2122 = vmatmul.f32.vlgmr.msrb.gmra.mxu3 %v4638_v30 }
 0x11f   :  { %2221 = vmatpush.msra.mxu2 %v5933_v15  ;;  %v3047_v57 = vadd.s32 %v3046_v33, %v3042_v54  ;;  %2027 = vmatpush.msrb.mxu1 %v2026_v55  ;;  %v7276_v61 = vand.u32 4294901760, %v5553_v16  ;;  %v2037_v24 = vsub.f32 %v5930_v51, %v2036_v2  ;;  %v7186_v45 = vand.u32 4294901760, %v5948_v21  ;;  %v932_v33 = vpop.f32.mrf.mxu2 }
 0x120   :  { %v2032_v6 = vand.u32 4294901760, %v2031_v47  ;;  %v806_v36 = vadd.f32 %v805_v11, %v173_v31  ;;  %v5964_v44 = vand.u32 4294901760, %v147_v53  ;;  %v2925_v54 = vmul.f32 %v2924_v7, %v5923_v59  ;;  %v129_v47 = vld [vmem:[#allocation5 + $0x230] sm:$0xff] }
 0x121   :  { %2133 = vmatpush.msra.mxu0 %v7276_v61  ;;  %2223 = vmatpush.msra.mxu2 %v5937_v22  ;;  %v2932_v16 = vmul.f32 %v2931_v48, %v5923_v59  ;;  %v3048_v29 = vadd.s32 536870912, %v3047_v57  ;;  %v2038_v12 = vand.u32 4294901760, %v2037_v24  ;;  %v7277_v55 = vand.u32 4294901760, %v5556_v20 }
 0x122   :  { %2033 = vmatpush.msrb.mxu1 %v2032_v6  ;;  %v2260_v11 = vsub.f32 %v5948_v21, %v7186_v45  ;;  %v5977_v7 = vsub.f32 %v156_v5, %v5937_v22  ;;  %v887_v48 = vadd.f32 %v886_v10, %v806_v36  ;;  %v5979_v31 = vand.u32 4294901760, %v138_v52 }
 0x123   :  { %2137 = vmatpush.msra.mxu0 %v7277_v55  ;;  %2225 = vmatpush.msra.mxu2 %v5964_v44  ;;  %v2926_v61 = vadd.f32 -0.4999988, %v2925_v54  ;;  %v2933_v20 = vadd.f32 -0.16666654, %v2932_v16  ;;  %v5981_v24 = vshrl.u32 %v3048_v29, 30  ;;  %v7278_v55 = vand.u32 4294901760, %v5586_v25  ;;  %v967_v29 = vpop.f32.mrf.mxu3 }
 0x124   :  { %v5986_v6 = vsub.f32 %v147_v53, %v5964_v44  ;;  %v2261_v45 = vand.u32 4294901760, %v2260_v11  ;;  %2039 = vmatpush.msrb.mxu1 %v2038_v12  ;;  %v2265_v5 = vand.u32 4294901760, %v5977_v7  ;;  %v933_v36 = vadd.f32 %v932_v33, %v887_v48  ;;  %v120_v48 = vld [vmem:[#allocation5 + $0x1e8] sm:$0xff] }
 0x125   :  { %2141 = vmatpush.msra.mxu0 %v7278_v55  ;;  %2227 = vmatpush.msra.mxu2 %v5979_v31  ;;  %v5991_v10 = vand.u32 4294901760, %v129_v47  ;;  %v2927_v54 = vmul.f32 %v2926_v61, %v5923_v59  ;;  %v2934_v16 = vmul.f32 %v2933_v20, %v5923_v59  ;;  %v3050_v25 = vshll.u32 %v5981_v24, 30 }
 0x126   :  { %2188 = vmatpush.msra.mxu1 %v5503_v34  ;;  %v7279_v53 = vand.u32 4294901760, %v5608_v28  ;;  %vm2937_vm9 = vweird.f32 %v5375_v13  ;;  %vm2940_vm10 = vcmp.lt.s32.totalorder %v5781_v26, 2  ;;  %2262 = vmatpush.msra.mxu3 %v2261_v45  ;;  %v2266_v12 = vsub.f32 %v5977_v7, %v2265_v5 }
 0x127   :  { %v2271_v33 = vand.u32 4294901760, %v5986_v6  ;;  %2229 = vmatpush.msra.mxu2 %v5991_v10  ;;  %v6007_v59 = vsub.f32 %v138_v52, %v5979_v31  ;;  %v2928_v34 = vadd.f32 1.0, %v2927_v54  ;;  %v2935_v28 = vadd.f32 1.0, %v2934_v16  ;;  %2041 = vmatmul.f32.vlgmr.msrb.gmra.mxu1 %v4595_v37 }
 0x128   :  { %2145 = vmatpush.msra.mxu0 %v7279_v53  ;;  %vm2941_vm11 = vcmp.eq.s32.totalorder %v5781_v26, 0  ;;  %v6010_v11 = vsub.s32 %v3047_v57, %v3050_v25  ;;  %2190 = vmatpush.msra.mxu1 %v5521_v40  ;;  %v7280_v45 = vand.u32 4294901760, %v5639_v38  ;;  %v2267_v61 = vand.u32 4294901760, %v2266_v12  ;;  %v1024_v38 = vpop.f32.mrf.mxu0  ;;  %v111_v53 = vld [vmem:[#allocation5 + $0x1a0] sm:$0xff] }
 0x129   :  { %v2272_v20 = vsub.f32 %v5986_v6, %v2271_v33  ;;  %v7187_v52 = vand.u32 4294901760, %v6007_v59  ;;  %v968_v55 = vadd.f32 %v967_v29, %v933_v36  ;;  %v2936_v54 = vmul.f32 %v2935_v28, %v5914_v17 }
 0x12a   :  { %2149 = vmatpush.msra.mxu0 %v7280_v45  ;;  %v2945_v57 = vxor.u32 2147483648, %v2928_v34  ;;  %vm3052_vm12 = vcmp.lt.s32.totalorder %v6010_v11, 0  ;;  %v3053_v40 = vsub.s32 0, %v6010_v11  ;;  %2192 = vmatpush.msra.mxu1 %v5544_v63  ;;  %v7281_v16 = vand.u32 4294901760, %v5692_v27 }
 0x12b   :  { %vm2944_vm13 = vcmp.eq.s32.totalorder %v5781_v26, 2  ;;  %2268 = vmatpush.msra.mxu3 %v2267_v61  ;;  %v2273_v25 = vand.u32 4294901760, %v2272_v20  ;;  %v2278_v36 = vsub.f32 %v6007_v59, %v7187_v52  ;;  %v6030_v17 = vand.u32 4294901760, %v120_v48 }
 0x12c   :  { %2153 = vmatpush.msra.mxu0 %v7281_v16  ;;  %v2942_v29 = vxor.u32 2147483648, %v2936_v54  ;;  %v3054_v12 = vsel %vm3052_vm12, %v3053_v40, %v6010_v11  ;;  %v3073_v63 = vsub.s32 4, %v5981_v24  ;;  %2194 = vmatpush.msra.mxu1 %v5565_v56  ;;  %v6036_v27 = vsub.f32 %v129_v47, %v5991_v10 }
 0x12d   :  { %v7282_v28 = vand.u32 4294901760, %v5711_v9  ;;  %v2946_v45 = vsel %vm2944_vm13, %v2945_v57, %v2936_v54  ;;  %v3055_v61 = vclz %v3054_v12  ;;  %2274 = vmatpush.msra.mxu3 %v2273_v25  ;;  %v2279_v20 = vand.u32 4294901760, %v2278_v36  ;;  %2231 = vmatpush.msra.mxu2 %v6030_v17  ;;  %v1057_v9 = vpop.f32.mrf.mxu1  ;;  %v102_v54 = vld [vmem:[#allocation5 + $0x158] sm:$0xff]  ;;  %v93_v36 = vld [vmem:[#allocation5 + $0x110] sm:$0xff] }
 0x12e   :  { %v1025_v16 = vadd.f32 %v1024_v38, %v968_v55  ;;  %v2943_v40 = vsel %vm2941_vm11, %v2928_v34, %v2942_v29  ;;  %v2283_v52 = vand.u32 4294901760, %v6036_v27  ;;  %2196 = vmatpush.msra.mxu1 %v5623_v42  ;;  %v6045_v56 = vand.u32 4294901760, %v111_v53 }
 0x12f   :  { %2157 = vmatpush.msra.mxu0 %v7282_v28  ;;  %v6048_v47 = vsub.f32 %v120_v48, %v6030_v17  ;;  %v7283_v57 = vand.u32 4294901760, %v5818_v32  ;;  %v2947_v55 = vsel %vm2940_vm10, %v2943_v40, %v2946_v45  ;;  %v7284_v38 = vand.u32 2147483647, %v5600_v43  ;;  %2280 = vmatpush.msra.mxu3 %v2279_v20 }
 0x130   :  { %vm2951_vm15 = vcmp.lt.s32.totalorder %v5600_v43, 0  ;;  %v4220_v42 = vadd.s32 4294967294, %v3055_v61  ;;  %v2948_v48 = vsel %vm2937_vm9, nan, %v2947_v55  ;;  %v3043_v32 = vadd.s32 %v5869_v58, %v5895_v14  ;;  %2233 = vmatpush.msra.mxu2 %v6045_v56  ;;  %2198 = vmatpush.msra.mxu1 %v5651_v50 }
 0x131   :  { %2161 = vmatpush.msra.mxu0 %v7283_v57  ;;  %vm6056_vm14 = vcmp.le.f32.partialorder %v7284_v38, 0.7853982  ;;  %v2284_v26 = vsub.f32 %v6036_v27, %v2283_v52  ;;  %v2289_v25 = vand.u32 4294901760, %v6048_v47  ;;  %4189 = vst [vmem:[#allocation8] sm:$0xff] %v2948_v48  ;;  %v3074_v13 = vsel %vm2951_vm15, %v3073_v63, %v5981_v24 }
 0x132   :  { %vm4221_vm0 = vcmp.lt.s32.totalorder %v4220_v42, 0  ;;  %v6074_v29 = vadd.f32 %v1057_v9, %v1025_v16  ;;  %v6076_v58 = vand.u32 4294901760, %v102_v54  ;;  %v7287_v14 = vand.u32 4294901760, %v5878_v60  ;;  %2200 = vmatpush.msra.mxu1 %v5694_v1  ;;  %v84_v60 = vld [vmem:[#allocation5 + $0xc8] sm:$0xff] }
 0x133   :  { %v3058_v12 = vsel %vm4221_vm0, 0, %v4220_v42  ;;  %v2285_v28 = vand.u32 4294901760, %v2284_v26  ;;  %v2290_v50 = vsub.f32 %v6048_v47, %v2289_v25  ;;  %v6084_v45 = vsub.f32 %v111_v53, %v6045_v56 }
 0x134   :  { %2165 = vmatpush.msra.mxu0 %v7287_v14  ;;  %v3059_v61 = vsub.s32 32, %v3058_v12  ;;  %v3063_v24 = vsub.s32 4294967266, %v3058_v12  ;;  %v7188_v63 = vand.u32 2147483647, %v6074_v29  ;;  %2235 = vmatpush.msra.mxu2 %v6076_v58  ;;  %v6089_v20 = vand.u32 4294901760, %v93_v36 }
 0x135   :  { %v7288_v16 = vand.u32 4294901760, %v5885_v41  ;;  %v3076_v40 = vsel %vm6056_vm14, 0, %v3074_v13  ;;  %2286 = vmatpush.msra.mxu3 %v2285_v28  ;;  %v2291_v53 = vand.u32 4294901760, %v2290_v50  ;;  %v3107_v9 = vand.u32 2139095040, %v6074_v29  ;;  %2202 = vmatpush.msra.mxu1 %v5779_v18  ;;  %v75_v41 = vld [vmem:[#allocation5 + $0x80] sm:$0xff] }
 0x136   :  { %v3060_v1 = vshll.u32 %v6010_v11, %v3058_v12  ;;  %v3061_v57 = vshrl.u32 %v3043_v32, %v3059_v61  ;;  %v3064_v55 = vadd.s32 127, %v3063_v24  ;;  %v3111_v38 = vand.u32 8388607, %v7188_v63  ;;  %2237 = vmatpush.msra.mxu2 %v6089_v20 }
 0x137   :  { %2169 = vmatpush.msra.mxu0 %v7288_v16  ;;  %v7289_v42 = vand.u32 4294901760, %v5908_v8  ;;  %2292 = vmatpush.msra.mxu3 %v2291_v53  ;;  %v3108_v48 = vshrl.u32 %v3107_v9, 23  ;;  %v7192_v26 = vand.u32 4294901760, %v6084_v45  ;;  %v6105_v13 = vsub.f32 %v102_v54, %v6076_v58 }
 0x138   :  { %v6107_v18 = vand.u32 4294901760, %v84_v60  ;;  %2204 = vmatpush.msra.mxu1 %v5788_v49  ;;  %v3062_v11 = vor.u32 %v3061_v57, %v3060_v1  ;;  %v3065_v32 = vshll.u32 %v3064_v55, 23  ;;  %v3112_v14 = vor.u32 8388608, %v3111_v38 }
 0x139   :  { %2173 = vmatpush.msra.mxu0 %v7289_v42  ;;  %v6111_v12 = vsub.f32 %v93_v36, %v6089_v20  ;;  %v4222_v8 = vadd.s32 4294967169, %v3108_v48  ;;  %v2296_v28 = vsub.f32 %v6084_v45, %v7192_v26  ;;  %v7191_v54 = vand.u32 4294901760, %v6105_v13 }
 0x13a   :  { %2239 = vmatpush.msra.mxu2 %v6107_v18  ;;  %v6120_v50 = vand.u32 4294901760, %v75_v41  ;;  %2206 = vmatpush.msra.mxu1 %v5791_v35  ;;  %v3066_v49 = vor.u32 4788187, %v3065_v32  ;;  %v3093_v61 = vadd.s32 3, %v3076_v40  ;;  %v6123_v36 = vshll.u32 %v3112_v14, 8 }
 0x13b   :  { %2177 = vmatpush.msra.mxu0 %v2036_v2  ;;  %v7190_v51 = vand.u32 4294901760, %v6111_v12  ;;  %v6126_v2 = vld [vmem:[#allocation5 + $0x38] sm:$0xff]  ;;  %v3114_v24 = vadd.s32 1, %v4222_v8  ;;  %v2297_v16 = vand.u32 4294901760, %v2296_v28  ;;  %v2302_v53 = vsub.f32 %v6105_v13, %v7191_v54 }
 0x13c   :  { %2179 = vmatmul.f32.vlgmr.msra.gmra.mxu0 %v4595_v37  ;;  %2241 = vmatpush.msra.mxu2 %v6120_v50  ;;  %v6134_v35 = vsub.f32 %v84_v60, %v6107_v18  ;;  %v3067_v40 = vand.u32 2147483647, %v3066_v49  ;;  %v3069_v9 = vcvt.s32.f32 %v3062_v11  ;;  %v6143_v38 = vand.u32 4294901760, %v6126_v2 }
 0x13d   :  { %2208 = vmatpush.msra.mxu1 %v5893_v3  ;;  %v2308_v1 = vsub.f32 %v6111_v12, %v7190_v51  ;;  %2340 = vmatpush.msrb.mxu0 %v5948_v21  ;;  %vm3115_vm1 = vcmp.gt.s32.totalorder %v3114_v24, 0  ;;  %v2303_v57 = vand.u32 4294901760, %v2302_v53  ;;  %v6147_v48 = vsub.f32 %v75_v41, %v6120_v50 }
 0x13e   :  { %2298 = vmatpush.msra.mxu3 %v2297_v16  ;;  %v7189_v55 = vand.u32 4294901760, %v6134_v35  ;;  %v3070_v60 = vmul.f32 %v3069_v9, %v3067_v40  ;;  %v3116_v3 = vsel %vm3115_vm1, %v3114_v24, 0  ;;  %v6151_v11 = vand.u32 3, %v3093_v61  ;;  %2243 = vmatpush.msra.mxu2 %v6143_v38 }
 0x13f   :  { %2210 = vmatpush.msra.mxu1 %v5899_v46  ;;  %v2309_v42 = vand.u32 4294901760, %v2308_v1  ;;  %2343 = vmatpush.msrb.mxu0 %v5977_v7  ;;  %v6153_v32 = vshrl.u32 %v3116_v3, 5  ;;  %v3118_v14 = vand.u32 31, %v3116_v3  ;;  %v6156_v8 = vand.u32 65535, %v6123_v36 }
 0x140   :  { %2212 = vmatmul.f32.vlgmr.msra.gmra.mxu1 %v4595_v37  ;;  %2304 = vmatpush.msra.mxu3 %v2303_v57  ;;  %v3071_v46 = vxor.u32 2147483648, %v3070_v60  ;;  %v6160_v28 = vshrl.u32 %v6123_v36, 16  ;;  %v6165_v41 = vsub.f32 %v6134_v35, %v7189_v55  ;;  %v7290_v61 = vand.u32 4294901760, %v5948_v21 }
 0x141   :  { %2385 = vmatpush.msrb.mxu1 %v5933_v15  ;;  %v3119_v24 = vsub.s32 32, %v3118_v14  ;;  %v7291_v16 = vmov 683565275   ;;  %v3124_v40 = vshll.u32 %v7262_v23, %v3118_v14  ;;  %v3127_v9 = vshll.u32 %v7264_v39, %v3118_v14  ;;  %2346 = vmatpush.msrb.mxu0 %v5986_v6 }
 0x142   :  { %2422 = vmatpush.msrb.mxu2 %v7290_v61  ;;  %v3121_v53 = vshll.u32 %v7291_v16, %v3118_v14  ;;  %2310 = vmatpush.msra.mxu3 %v2309_v42  ;;  %v3072_v1 = vsel %vm2951_vm15, %v3071_v46, %v3070_v60  ;;  %v3130_v57 = vshll.u32 %v7265_v19, %v3118_v14  ;;  %v7292_v3 = vmov 920167782  }
 0x143   :  { %v3133_v21 = vshll.u32 %v7292_v3, %v3118_v14  ;;  %vm3136_vm2 = vcmp.lt.s32.totalorder %v6153_v32, 1  ;;  %2387 = vmatpush.msrb.mxu1 %v5937_v22  ;;  %v6186_v42 = vsel %vm6056_vm14, %v5600_v43, %v3072_v1  ;;  %v3120_v61 = vshrl.u32 %v7291_v16, %v3119_v24  ;;  %2349 = vmatpush.msrb.mxu0 %v6007_v59 }
 0x144   :  { %2426 = vmatpush.msrb.mxu2 %v2265_v5  ;;  %v3122_v60 = vshrl.u32 %v7262_v23, %v3119_v24  ;;  %v3125_v46 = vshrl.u32 %v7264_v39, %v3119_v24  ;;  %v3077_v14 = vmul.f32 %v6186_v42, %v6186_v42  ;;  %v3128_v7 = vshrl.u32 %v7265_v19, %v3119_v24 }
 0x145   :  { %v3131_v5 = vshrl.u32 %v7292_v3, %v3119_v24  ;;  %v3134_v63 = vshrl.u32 %v7267_v0, %v3119_v24  ;;  %vm3137_vm3 = vcmp.lt.s32.totalorder %v6153_v32, 2  ;;  %vm3138_vm4 = vcmp.lt.s32.totalorder %v6153_v32, 3  ;;  %2389 = vmatpush.msrb.mxu1 %v5964_v44  ;;  %2352 = vmatpush.msrb.mxu0 %v6036_v27 }
 0x146   :  { %2430 = vmatpush.msrb.mxu2 %v2271_v33  ;;  %v3123_v34 = vor.u32 %v3122_v60, %v3121_v53  ;;  %v3126_v1 = vor.u32 %v3125_v46, %v3124_v40  ;;  %v3078_v55 = vmul.f32 -0.001358992, %v3077_v14  ;;  %v3085_v51 = vmul.f32 -0.00019511016, %v3077_v14 }
 0x147   :  { %v3129_v54 = vor.u32 %v3128_v7, %v3127_v9  ;;  %v3132_v26 = vor.u32 %v3131_v5, %v3130_v57  ;;  %v7293_v49 = vand.u32 4294901760, %v6007_v59  ;;  %v3135_v24 = vor.u32 %v3134_v63, %v3133_v21  ;;  %2391 = vmatpush.msrb.mxu1 %v5979_v31  ;;  %2355 = vmatpush.msrb.mxu0 %v6048_v47 }
 0x148   :  { %vm3139_vm5 = vcmp.lt.s32.totalorder %v6153_v32, 4  ;;  %v3140_v6 = vsel %vm3136_vm2, %v3120_v61, %v3123_v34  ;;  %v3144_v33 = vsel %vm3136_vm2, %v3123_v34, %v3126_v1  ;;  %v3079_v53 = vadd.f32 0.041655596, %v3078_v55  ;;  %2249 = vmatmul.f32.vlgmr.msra.gmra.mxu2 %v4679_v62 }
 0x149   :  { %2434 = vmatpush.msrb.mxu2 %v7293_v49  ;;  %v3086_v40 = vadd.f32 0.008332121, %v3085_v51  ;;  %v3141_v9 = vsel %vm3139_vm5, %v3129_v54, 2102212464  ;;  %v3148_v59 = vsel %vm3136_vm2, %v3126_v1, %v3129_v54  ;;  %v3145_v49 = vsel %vm3139_vm5, %v3132_v26, 920167782  ;;  %2393 = vmatpush.msrb.mxu1 %v5991_v10 }
 0x14a   :  { %v3142_v63 = vsel %vm3138_vm4, %v3126_v1, %v3141_v9  ;;  %v3149_v57 = vsel %vm3139_vm5, %v3135_v24, 1326507024  ;;  %v2315_v21 = vand.u32 4294901760, %v6165_v41  ;;  %2358 = vmatpush.msrb.mxu0 %v6084_v45  ;;  %v3080_v55 = vmul.f32 %v3079_v53, %v3077_v14 }
 0x14b   :  { %2438 = vmatpush.msrb.mxu2 %v2283_v52  ;;  %v3087_v51 = vmul.f32 %v3086_v40, %v3077_v14  ;;  %v3146_v61 = vsel %vm3138_vm4, %v3129_v54, %v3145_v49  ;;  %v6225_v27 = vsub.f32 %v6126_v2, %v6143_v38  ;;  %vm3099_vm6 = vcmp.eq.s32.totalorder %v6151_v11, 2  ;;  %2395 = vmatpush.msrb.mxu1 %v6030_v17 }
 0x14c   :  { %v6232_v52 = vsel %vm3137_vm3, %v3140_v6, %v3142_v63  ;;  %v3147_v41 = vsel %vm3137_vm3, %v3144_v33, %v3146_v61  ;;  %v3150_v60 = vsel %vm3138_vm4, %v3132_v26, %v3149_v57  ;;  %2316 = vmatpush.msra.mxu3 %v2315_v21  ;;  %v7294_v54 = vand.u32 4294901760, %v6147_v48  ;;  %2361 = vmatpush.msrb.mxu0 %v6105_v13 }
 0x14d   :  { %2442 = vmatpush.msrb.mxu2 %v2289_v25  ;;  %v3081_v46 = vadd.f32 -0.4999988, %v3080_v55  ;;  %v3088_v47 = vadd.f32 -0.16666654, %v3087_v51  ;;  %v3151_v25 = vsel %vm3137_vm3, %v3148_v59, %v3150_v60  ;;  %v3177_v7 = vand.u32 65535, %v3147_v41  ;;  %2397 = vmatpush.msrb.mxu1 %v6045_v56 }
 0x14e   :  { %v2320_v2 = vsub.f32 %v6147_v48, %v7294_v54  ;;  %v7295_v5 = vand.u32 4294901760, %v6084_v45  ;;  %vm3096_vm7 = vcmp.eq.s32.totalorder %v6151_v11, 0  ;;  %v3155_v34 = vand.u32 65535, %v3151_v25  ;;  %2364 = vmatpush.msrb.mxu0 %v6111_v12 }
 0x14f   :  { %v3156_v26 = vshrl.u32 %v3151_v25, 16  ;;  %v3178_v1 = vshrl.u32 %v3147_v41, 16  ;;  %v3082_v6 = vmul.f32 %v3081_v46, %v3077_v14  ;;  %v3089_v33 = vmul.f32 %v3088_v47, %v3077_v14  ;;  %2399 = vmatpush.msrb.mxu1 %v6076_v58 }
 0x150   :  { %2446 = vmatpush.msrb.mxu2 %v7295_v5  ;;  %v2321_v24 = vand.u32 4294901760, %v2320_v2  ;;  %vm3095_vm8 = vcmp.lt.s32.totalorder %v6151_v11, 2  ;;  %v3179_v32 = vmul.u32 %v3177_v7, %v6156_v8  ;;  %v6252_v45 = vmul.u32 %v3177_v7, %v6160_v28  ;;  %2367 = vmatpush.msrb.mxu0 %v6134_v35  ;;  %v130_v11 = vld [vmem:[#allocation5 + $0x238] sm:$0xff] }
 0x151   :  { %v7296_v53 = vand.u32 4294901760, %v6105_v13  ;;  %vm3092_vm9 = vweird.f32 %v5600_v43  ;;  %v3157_v40 = vmul.u32 %v3155_v34, %v6156_v8  ;;  %v3158_v9 = vmul.u32 %v3156_v26, %v6156_v8  ;;  %2401 = vmatpush.msrb.mxu1 %v6089_v20 }
 0x152   :  { %v6260_v59 = vmul.u32 %v3155_v34, %v6160_v28  ;;  %v3160_v14 = vmul.u32 %v3156_v26, %v6160_v28  ;;  %2322 = vmatpush.msra.mxu3 %v2321_v24  ;;  %v3083_v63 = vadd.f32 1.0, %v3082_v6  ;;  %v3090_v49 = vadd.f32 1.0, %v3089_v33  ;;  %v1094_v6 = vpop.f32.mrf.mxu2  ;;  %2370 = vmatpush.msrb.mxu0 %v6147_v48 }
 0x153   :  { %2450 = vmatpush.msrb.mxu2 %v7296_v53  ;;  %v6264_v57 = vmul.u32 %v3178_v1, %v6156_v8  ;;  %v3182_v13 = vmul.u32 %v3178_v1, %v6160_v28  ;;  %v7297_v21 = vand.u32 4294901760, %v6111_v12  ;;  %v3161_v55 = vshll.u32 %v3158_v9, 16  ;;  %2403 = vmatpush.msrb.mxu1 %v6107_v18 }
 0x154   :  { %v3162_v51 = vshrl.u32 %v3158_v9, 16  ;;  %v3163_v61 = vshll.u32 %v6260_v59, 16  ;;  %v3164_v41 = vshrl.u32 %v6260_v59, 16  ;;  %v3091_v60 = vmul.f32 %v3090_v49, %v6186_v42  ;;  %v157_v9 = vld [vmem:[#allocation5 + $0x310] sm:$0xff]  ;;  %2373 = vmatpush.msrb.mxu0 %v6225_v27  ;;  %v139_v49 = vld [vmem:[#allocation5 + $0x280] sm:$0xff] }
 0x155   :  { %2454 = vmatpush.msrb.mxu2 %v7297_v21  ;;  %v3100_v54 = vxor.u32 2147483648, %v3083_v63  ;;  %v3183_v8 = vshll.u32 %v6264_v57, 16  ;;  %v3184_v28 = vshrl.u32 %v6264_v57, 16  ;;  %v7298_v2 = vand.u32 4294901760, %v6134_v35  ;;  %2405 = vmatpush.msrb.mxu1 %v6120_v50 }
 0x156   :  { %vm3165_vm10 = vc.u32 %v3157_v40, %v3161_v55  ;;  %v3167_v46 = vadd.s32 %v3161_v55, %v3157_v40  ;;  %v3185_v47 = vshll.u32 %v6252_v45, 16  ;;  %v3186_v25 = vshrl.u32 %v6252_v45, 16  ;;  %v166_v40 = vld [vmem:[#allocation5 + $0x358] sm:$0xff]  ;;  %2376 = vmatmul.f32.vlgmr.msrb.gmra.mxu0 %v7269_v4 }
 0x157   :  { %2458 = vmatpush.msrb.mxu2 %v7298_v2  ;;  %v3097_v12 = vxor.u32 2147483648, %v3091_v60  ;;  %v3101_v42 = vsel %vm3099_vm6, %v3100_v54, %v3091_v60  ;;  %v7299_v7 = vmov 0   ;;  %vm3187_vm11 = vc.u32 %v3179_v32, %v3183_v8  ;;  %v7301_v55 = vld [vmem:[#allocation13_spill] sm:$0xff]  ;;  %2407 = vmatpush.msrb.mxu1 %v6143_v38 }
 0x158   :  { %v3166_v5 = vsel %vm3165_vm10, 1, %v7299_v7  ;;  %v7300_v34 = vand.u32 4294901760, %v6147_v48  ;;  %vm3169_vm12 = vc.u32 %v3167_v46, %v3163_v61  ;;  %v3188_v1 = vsel %vm3187_vm11, 1, %v7299_v7  ;;  %v1175_v48 = vpop.f32.mrf.mxu3  ;;  %2411 = vmatmul.f32.vlgmr.msrb.gmra.mxu1 %v4638_v30 }
 0x159   :  { %v3168_v26 = vadd.s32 %v3166_v5, %v3160_v14  ;;  %v3189_v24 = vadd.s32 %v3183_v8, %v3179_v32  ;;  %v3098_v35 = vsel %vm3096_vm7, %v3083_v63, %v3097_v12  ;;  %v3170_v33 = vsel %vm3169_vm12, 1, %v7299_v7  ;;  %v148_v63 = vld [vmem:[#allocation5 + $0x2c8] sm:$0xff] }
 0x15a   :  { %2462 = vmatpush.msrb.mxu2 %v7300_v34  ;;  %v3190_v45 = vadd.s32 %v3188_v1, %v3182_v13  ;;  %v2325_v53 = vand.u32 4294901760, %v6225_v27  ;;  %v3102_v59 = vsel %vm3095_vm8, %v3098_v35, %v3101_v42  ;;  %v174_v61 = vperm.slane %v7301_v55, 3  ;;  %v1221_v42 = vpop.f32.mrf.mxu0 }
 0x15b   :  { %v3172_v14 = vadd.s32 %v3170_v33, %v3168_v26  ;;  %vm3191_vm13 = vc.u32 %v3189_v24, %v3185_v47  ;;  %v6297_v32 = vadd.s32 %v3189_v24, %v3185_v47  ;;  %v3103_v57 = vsel %vm3092_vm9, nan, %v3102_v59  ;;  %v1256_v33 = vpop.f32.mrf.mxu1 }
 0x15c   :  { %v3192_v13 = vsel %vm3191_vm13, 1, %v7299_v7  ;;  %v2326_v21 = vsub.f32 %v6225_v27, %v2325_v53  ;;  %2466 = vmatpush.msrb.mxu2 %v2325_v53  ;;  %4190 = vst [vmem:[#allocation8 + $0x8] sm:$0xff] %v3103_v57  ;;  %v6308_v8 = vand.u32 4294901760, %v166_v40  ;;  %v6310_v43 = vand.u32 4294901760, %v157_v9 }
 0x15d   :  { %v3173_v60 = vadd.s32 %v3172_v14, %v3162_v51  ;;  %v3194_v54 = vadd.s32 %v3192_v13, %v3190_v45  ;;  %2468 = vmatmul.f32.vlgmr.msrb.gmra.mxu2 %v4595_v37  ;;  %v1095_v46 = vadd.f32 %v1094_v6, %v174_v61  ;;  %v6313_v27 = vand.u32 4294901760, %v148_v63  ;;  %v103_v13 = vld [vmem:[#allocation5 + $0x160] sm:$0xff] }
 0x15e   :  { %v2327_v2 = vand.u32 4294901760, %v2326_v21  ;;  %v6315_v47 = vand.u32 4294901760, %v139_v49  ;;  %2510 = vmatpush.msra.mxu0 %v6308_v8  ;;  %v6321_v5 = vsub.f32 %v166_v40, %v6308_v8  ;;  %v6324_v34 = vand.u32 4294901760, %v130_v11 }
 0x15f   :  { %v6317_v12 = vadd.s32 %v3173_v60, %v3164_v41  ;;  %v3195_v51 = vadd.s32 %v3194_v54, %v3184_v28  ;;  %v1176_v26 = vadd.f32 %v1175_v48, %v1095_v46  ;;  %v6327_v1 = vsub.f32 %v157_v9, %v6310_v43  ;;  %v121_v28 = vld [vmem:[#allocation5 + $0x1f0] sm:$0xff] }
 0x160   :  { %2328 = vmatpush.msra.mxu3 %v2327_v2  ;;  %v6330_v24 = vsub.f32 %v148_v63, %v6313_v27  ;;  %v6333_v41 = vsub.f32 %v139_v49, %v6315_v47  ;;  %v3197_v35 = vmul.u32 %v6123_v36, %v6232_v52  ;;  %2512 = vmatpush.msra.mxu0 %v6310_v43  ;;  %v2548_v45 = vand.u32 4294901760, %v6321_v5  ;;  %v112_v36 = vld [vmem:[#allocation5 + $0x1a8] sm:$0xff]  ;;  %v1346_v55 = vpop.f32.mrf.mxu3 }
 0x161   :  { %v3196_v6 = vadd.s32 %v3195_v51, %v3186_v25  ;;  %vm3199_vm14 = vc.u32 %v6317_v12, %v6297_v32  ;;  %v1222_v53 = vadd.f32 %v1221_v42, %v1176_v26  ;;  %2330 = vmatmul.f32.vlgmr.msra.gmra.mxu3 %v4595_v37  ;;  %v2554_v40 = vand.u32 4294901760, %v6327_v1  ;;  %2629 = vmatpush.msra.mxu2 %v6321_v5 }
 0x162   :  { %2477 = vmatpush.msrb.mxu3 %v5933_v15  ;;  %v2560_v25 = vand.u32 4294901760, %v6330_v24  ;;  %v7199_v9 = vand.u32 4294901760, %v6333_v41  ;;  %v1313_v15 = vpop.f32.mrf.mxu2  ;;  %v2549_v59 = vsub.f32 %v6321_v5, %v2548_v45  ;;  %2514 = vmatpush.msra.mxu0 %v6313_v27  ;;  %v6352_v14 = vand.u32 4294901760, %v121_v28 }
 0x163   :  { %v3200_v52 = vadd.s32 1, %v3196_v6  ;;  %v6355_v48 = vsub.f32 %v130_v11, %v6324_v34  ;;  %v1257_v63 = vadd.f32 %v1256_v33, %v1222_v53  ;;  %v2555_v49 = vsub.f32 %v6327_v1, %v2554_v40  ;;  %2632 = vmatpush.msra.mxu2 %v6327_v1 }
 0x164   :  { %2479 = vmatpush.msrb.mxu3 %v5937_v22  ;;  %v2561_v22 = vsub.f32 %v6330_v24, %v2560_v25  ;;  %v2567_v57 = vsub.f32 %v6333_v41, %v7199_v9  ;;  %v2550_v61 = vand.u32 4294901760, %v2549_v59  ;;  %2516 = vmatpush.msra.mxu0 %v6315_v47  ;;  %v6373_v60 = vand.u32 4294901760, %v112_v36 }
 0x165   :  { %v3201_v21 = vsel %vm3199_vm14, %v3200_v52, %v3196_v6  ;;  %v7198_v11 = vand.u32 4294901760, %v6355_v48  ;;  %v1314_v2 = vadd.f32 %v1313_v15, %v1257_v63  ;;  %v2556_v46 = vand.u32 4294901760, %v2555_v49  ;;  %2635 = vmatpush.msra.mxu2 %v6330_v24 }
 0x166   :  { %2481 = vmatpush.msrb.mxu3 %v5964_v44  ;;  %v3202_v54 = vadd.s32 %v3201_v21, %v3197_v35  ;;  %2551 = vmatpush.msra.mxu1 %v2550_v61  ;;  %v2562_v51 = vand.u32 4294901760, %v2561_v22  ;;  %v6381_v42 = vsub.f32 %v121_v28, %v6352_v14  ;;  %v6383_v26 = vand.u32 4294901760, %v103_v13 }
 0x167   :  { %v2573_v44 = vsub.f32 %v6355_v48, %v7198_v11  ;;  %v6385_v33 = vadd.f32 %v1346_v55, %v1314_v2  ;;  %2518 = vmatpush.msra.mxu0 %v6324_v34  ;;  %v6389_v35 = vsub.f32 %v112_v36, %v6373_v60  ;;  %2638 = vmatpush.msra.mxu2 %v6333_v41  ;;  %v2568_v53 = vand.u32 4294901760, %v2567_v57 }
 0x168   :  { %2483 = vmatpush.msrb.mxu3 %v5979_v31  ;;  %v3203_v6 = vadd.s32 536870912, %v3202_v54  ;;  %v94_v31 = vld [vmem:[#allocation5 + $0x118] sm:$0xff]  ;;  %2557 = vmatpush.msra.mxu1 %v2556_v46  ;;  %v7197_v28 = vand.u32 4294901760, %v6381_v42  ;;  %v6395_v52 = vsub.f32 %v103_v13, %v6383_v26  ;;  %v85_v13 = vld [vmem:[#allocation5 + $0xd0] sm:$0xff]  ;;  %vm3106_vm1 = vcmp.lt.s32.totalorder %v6074_v29, 0 }
 0x169   :  { %v7193_v59 = vand.u32 2147483647, %v6385_v33  ;;  %v3262_v63 = vand.u32 2139095040, %v6385_v33  ;;  %2520 = vmatpush.msra.mxu0 %v6352_v14  ;;  %v7196_v36 = vand.u32 4294901760, %v6389_v35  ;;  %2641 = vmatpush.msra.mxu2 %v6355_v48  ;;  %v6408_v22 = vand.u32 4294901760, %v94_v31 }
 0x16a   :  { %2485 = vmatpush.msrb.mxu3 %v5991_v10  ;;  %v6397_v15 = vshrl.u32 %v3203_v6, 30  ;;  %2563 = vmatpush.msra.mxu1 %v2562_v51  ;;  %v2574_v10 = vand.u32 4294901760, %v2573_v44  ;;  %v2579_v49 = vsub.f32 %v6381_v42, %v7197_v28  ;;  %v7195_v57 = vand.u32 4294901760, %v6395_v52 }
 0x16b   :  { %v3263_v55 = vshrl.u32 %v3262_v63, 23  ;;  %v3266_v61 = vand.u32 8388607, %v7193_v59  ;;  %2522 = vmatpush.msra.mxu0 %v6373_v60  ;;  %2644 = vmatpush.msra.mxu2 %v6381_v42  ;;  %v2585_v2 = vsub.f32 %v6389_v35, %v7196_v36  ;;  %v6426_v63 = vand.u32 4294901760, %v85_v13 }
 0x16c   :  { %2487 = vmatpush.msrb.mxu3 %v6030_v17  ;;  %v3205_v21 = vshll.u32 %v6397_v15, 30  ;;  %2569 = vmatpush.msra.mxu1 %v2568_v53  ;;  %v2580_v17 = vand.u32 4294901760, %v2579_v49  ;;  %v2591_v46 = vsub.f32 %v6395_v52, %v7195_v57  ;;  %v6431_v53 = vsub.f32 %v94_v31, %v6408_v22  ;;  %v6433_v49 = vld [vmem:[#allocation5 + $0x88] sm:$0xff] }
 0x16d   :  { %v4225_v44 = vadd.s32 4294967169, %v3263_v55  ;;  %v3267_v6 = vor.u32 8388608, %v3266_v61  ;;  %2524 = vmatpush.msra.mxu0 %v6383_v26  ;;  %2647 = vmatpush.msra.mxu2 %v6389_v35  ;;  %v3228_v55 = vsub.s32 4, %v6397_v15  ;;  %v6452_v59 = vsub.f32 %v85_v13, %v6426_v63 }
 0x16e   :  { %2489 = vmatpush.msrb.mxu3 %v6045_v56  ;;  %v6423_v51 = vsub.s32 %v3202_v54, %v3205_v21  ;;  %2575 = vmatpush.msra.mxu1 %v2574_v10  ;;  %v2586_v56 = vand.u32 4294901760, %v2585_v2  ;;  %v7194_v31 = vand.u32 4294901760, %v6431_v53  ;;  %v6444_v10 = vld [vmem:[#allocation5 + $0x40] sm:$0xff] }
 0x16f   :  { %v3269_v21 = vadd.s32 1, %v4225_v44  ;;  %2526 = vmatpush.msra.mxu0 %v6408_v22  ;;  %2650 = vmatpush.msra.mxu2 %v6395_v52  ;;  %v6440_v61 = vshll.u32 %v3267_v6, 8  ;;  %v6449_v44 = vand.u32 4294901760, %v6433_v49 }
 0x170   :  { %2491 = vmatpush.msrb.mxu3 %v6076_v58  ;;  %vm3207_vm15 = vcmp.lt.s32.totalorder %v6423_v51, 0  ;;  %v3208_v54 = vsub.s32 0, %v6423_v51  ;;  %2581 = vmatpush.msra.mxu1 %v2580_v17  ;;  %v2592_v58 = vand.u32 4294901760, %v2591_v46  ;;  %v3198_v46 = vadd.s32 %v6297_v32, %v6317_v12 }
 0x171   :  { %vm3270_vm0 = vcmp.gt.s32.totalorder %v3269_v21, 0  ;;  %2528 = vmatpush.msra.mxu0 %v6426_v63  ;;  %2653 = vmatpush.msra.mxu2 %v6431_v53  ;;  %v2597_v32 = vsub.f32 %v6431_v53, %v7194_v31 }
 0x172   :  { %2493 = vmatpush.msrb.mxu3 %v6089_v20  ;;  %v3209_v2 = vsel %vm3207_vm15, %v3208_v54, %v6423_v51  ;;  %v3271_v17 = vsel %vm3270_vm0, %v3269_v21, 0  ;;  %2587 = vmatpush.msra.mxu1 %v2586_v56  ;;  %v6463_v54 = vand.u32 4294901760, %v6444_v10  ;;  %v6472_v21 = vand.u32 65535, %v6440_v61 }
 0x173   :  { %v3210_v20 = vclz %v3209_v2  ;;  %v6459_v6 = vshrl.u32 %v3271_v17, 5  ;;  %2530 = vmatpush.msra.mxu0 %v6449_v44  ;;  %2656 = vmatpush.msra.mxu2 %v6452_v59  ;;  %v3273_v56 = vand.u32 31, %v3271_v17  ;;  %v2598_v1 = vand.u32 4294901760, %v2597_v32 }
 0x174   :  { %2495 = vmatpush.msrb.mxu3 %v6107_v18  ;;  %v6469_v18 = vsel %vm3106_vm1, %v3228_v55, %v6397_v15  ;;  %2593 = vmatpush.msra.mxu1 %v2592_v58  ;;  %vm3247_vm0 = vweird.f32 %v6074_v29 }
 0x175   :  { %v4223_v13 = vadd.s32 4294967294, %v3210_v20  ;;  %vm3291_vm2 = vcmp.lt.s32.totalorder %v6459_v6, 1  ;;  %vm3293_vm3 = vcmp.lt.s32.totalorder %v6459_v6, 3  ;;  %2532 = vmatpush.msra.mxu0 %v6463_v54  ;;  %v3274_v15 = vsub.s32 32, %v3273_v56 }
 0x176   :  { %2497 = vmatpush.msrb.mxu3 %v6120_v50  ;;  %v3276_v55 = vshll.u32 %v7291_v16, %v3273_v56  ;;  %vm3294_vm5 = vcmp.lt.s32.totalorder %v6459_v6, 4  ;;  %v3279_v58 = vshll.u32 %v7262_v23, %v3273_v56  ;;  %v3282_v2 = vshll.u32 %v7264_v39, %v3273_v56  ;;  %2538 = vmatmul.f32.vlgmr.msra.gmra.mxu0 %v4679_v62 }
 0x177   :  { %vm4224_vm4 = vcmp.lt.s32.totalorder %v4223_v13, 0  ;;  %2711 = vmatpush.msrb.mxu0 %v2548_v45  ;;  %v3285_v20 = vshll.u32 %v7265_v19, %v3273_v56  ;;  %v3277_v5 = vshrl.u32 %v7262_v23, %v3274_v15  ;;  %v3280_v45 = vshrl.u32 %v7264_v39, %v3274_v15  ;;  %2599 = vmatpush.msra.mxu1 %v2598_v1 }
 0x178   :  { %2499 = vmatpush.msrb.mxu3 %v6143_v38  ;;  %v3213_v50 = vsel %vm4224_vm4, 0, %v4223_v13  ;;  %v3288_v38 = vshll.u32 %v7292_v3, %v3273_v56  ;;  %v3283_v13 = vshrl.u32 %v7265_v19, %v3274_v15  ;;  %v3286_v36 = vshrl.u32 %v7292_v3, %v3274_v15 }
 0x179   :  { %2501 = vmatmul.f32.vlgmr.msrb.gmra.mxu3 %v4595_v37  ;;  %v3214_v17 = vsub.s32 32, %v3213_v50  ;;  %v3215_v31 = vshll.u32 %v6423_v51, %v3213_v50  ;;  %v3218_v57 = vsub.s32 4294967266, %v3213_v50  ;;  %2715 = vmatpush.msrb.mxu0 %v2554_v40  ;;  %v7302_v62 = vand.u32 2147483647, %v6074_v29 }
 0x17a   :  { %2674 = vmatpush.msra.mxu3 %v6308_v8  ;;  %v3289_v28 = vshrl.u32 %v7267_v0, %v3274_v15  ;;  %v3278_v40 = vor.u32 %v3277_v5, %v3276_v55  ;;  %v3281_v11 = vor.u32 %v3280_v45, %v3279_v58  ;;  %v3284_v9 = vor.u32 %v3283_v13, %v3282_v2 }
 0x17b   :  { %vm6503_vm6 = vcmp.le.f32.partialorder %v7302_v62, 0.7853982  ;;  %v3216_v56 = vshrl.u32 %v3198_v46, %v3214_v17  ;;  %v3219_v50 = vadd.s32 127, %v3218_v57  ;;  %2719 = vmatpush.msrb.mxu0 %v2560_v25  ;;  %v3287_v12 = vor.u32 %v3286_v36, %v3285_v20 }
 0x17c   :  { %2676 = vmatpush.msra.mxu3 %v6310_v43  ;;  %v3290_v62 = vor.u32 %v3289_v28, %v3288_v38  ;;  %vm3292_vm7 = vcmp.lt.s32.totalorder %v6459_v6, 2  ;;  %v3275_v57 = vshrl.u32 %v7291_v16, %v3274_v15  ;;  %v3299_v46 = vsel %vm3291_vm2, %v3278_v40, %v3281_v11 }
 0x17d   :  { %v3217_v3 = vor.u32 %v3216_v56, %v3215_v31  ;;  %v3220_v19 = vshll.u32 %v3219_v50, 23  ;;  %v3300_v24 = vsel %vm3294_vm5, %v3287_v12, 920167782  ;;  %v7305_v25 = vand.u32 4294901760, %v6452_v59 }
 0x17e   :  { %2678 = vmatpush.msra.mxu3 %v6313_v27  ;;  %v7306_v31 = vand.u32 4294901760, %v6333_v41  ;;  %v3296_v32 = vsel %vm3294_vm5, %v3284_v9, 2102212464  ;;  %v3301_v15 = vsel %vm3293_vm3, %v3284_v9, %v3300_v24  ;;  %v3309_v55 = vshrl.u32 %v6440_v61, 16 }
 0x17f   :  { %v2603_v36 = vsub.f32 %v6452_v59, %v7305_v25  ;;  %v3221_v28 = vor.u32 4788187, %v3220_v19  ;;  %v3224_v58 = vcvt.s32.f32 %v3217_v3  ;;  %v3302_v2 = vsel %vm3292_vm7, %v3299_v46, %v3301_v15 }
 0x180   :  { %2723 = vmatpush.msrb.mxu0 %v7306_v31  ;;  %2680 = vmatpush.msra.mxu3 %v6315_v47  ;;  %v3303_v20 = vsel %vm3291_vm2, %v3281_v11, %v3284_v9  ;;  %v3304_v19 = vsel %vm3294_vm5, %v3290_v62, 1326507024  ;;  %v7307_v41 = vand.u32 4294901760, %v6355_v48  ;;  %v3332_v5 = vand.u32 65535, %v3302_v2 }
 0x181   :  { %v3222_v17 = vand.u32 2147483647, %v3221_v28  ;;  %v3305_v38 = vsel %vm3293_vm3, %v3287_v12, %v3304_v19  ;;  %v3333_v45 = vshrl.u32 %v3302_v2, 16  ;;  %v6542_v3 = vsel %vm3291_vm2, %v3275_v57, %v3278_v40 }
 0x182   :  { %2727 = vmatpush.msrb.mxu0 %v7307_v41  ;;  %2682 = vmatpush.msra.mxu3 %v6324_v34  ;;  %v3306_v9 = vsel %vm3292_vm7, %v3303_v20, %v3305_v38  ;;  %v2604_v13 = vand.u32 4294901760, %v2603_v36  ;;  %v2607_v48 = vsub.f32 %v6433_v49, %v6449_v44  ;;  %v7308_v56 = vand.u32 4294901760, %v6381_v42 }
 0x183   :  { %v3225_v50 = vmul.f32 %v3224_v58, %v3222_v17  ;;  %v6552_v12 = vsel %vm3293_vm3, %v3281_v11, %v3296_v32  ;;  %v3310_v1 = vand.u32 65535, %v3306_v9  ;;  %v3311_v62 = vshrl.u32 %v3306_v9, 16  ;;  %v1383_v58 = vpop.f32.mrf.mxu0 }
 0x184   :  { %2731 = vmatpush.msrb.mxu0 %v7308_v56  ;;  %2684 = vmatpush.msra.mxu3 %v6352_v14  ;;  %v3231_v40 = vsel %vm6503_vm6, 0, %v6469_v18  ;;  %v3334_v57 = vmul.u32 %v3332_v5, %v6472_v21  ;;  %v6560_v49 = vmul.u32 %v3333_v45, %v6472_v21  ;;  %v6562_v42 = vmul.u32 %v3332_v5, %v3309_v55 }
 0x185   :  { %2605 = vmatpush.msra.mxu1 %v2604_v13  ;;  %2659 = vmatpush.msra.mxu2 %v2607_v48  ;;  %v3226_v46 = vxor.u32 2147483648, %v3225_v50  ;;  %v3312_v11 = vmul.u32 %v3310_v1, %v6472_v21  ;;  %v3313_v24 = vmul.u32 %v3311_v62, %v6472_v21  ;;  %v6566_v25 = vmul.u32 %v3310_v1, %v3309_v55  ;;  %v1464_v1 = vpop.f32.mrf.mxu1 }
 0x186   :  { %2686 = vmatpush.msra.mxu3 %v6373_v60  ;;  %v7309_v36 = vand.u32 4294901760, %v6389_v35  ;;  %v3315_v31 = vmul.u32 %v3311_v62, %v3309_v55  ;;  %v3337_v28 = vmul.u32 %v3333_v45, %v3309_v55  ;;  %v3338_v32 = vshll.u32 %v6560_v49, 16  ;;  %v1510_v62 = vpop.f32.mrf.mxu2 }
 0x187   :  { %v2608_v15 = vand.u32 4294901760, %v2607_v48  ;;  %v3227_v2 = vsel %vm3106_vm1, %v3226_v46, %v3225_v50  ;;  %v3316_v20 = vshll.u32 %v3313_v24, 16  ;;  %v3318_v19 = vshll.u32 %v6566_v25, 16 }
 0x188   :  { %2735 = vmatpush.msrb.mxu0 %v7309_v36  ;;  %v3339_v21 = vshrl.u32 %v6560_v49, 16  ;;  %2688 = vmatpush.msra.mxu3 %v6383_v26  ;;  %v7310_v41 = vand.u32 4294901760, %v6395_v52  ;;  %v6582_v35 = vsel %vm6503_vm6, %v6074_v29, %v3227_v2  ;;  %v3317_v55 = vshrl.u32 %v3313_v24, 16 }
 0x189   :  { %v3340_v17 = vshll.u32 %v6562_v42, 16  ;;  %vm3342_vm8 = vc.u32 %v3334_v57, %v3338_v32  ;;  %v3232_v38 = vmul.f32 %v6582_v35, %v6582_v35  ;;  %vm3320_vm9 = vc.u32 %v3312_v11, %v3316_v20 }
 0x18a   :  { %2739 = vmatpush.msrb.mxu0 %v7310_v41  ;;  %v3322_v5 = vadd.s32 %v3316_v20, %v3312_v11  ;;  %v3343_v45 = vsel %vm3342_vm8, 1, %v7299_v7  ;;  %2690 = vmatpush.msra.mxu3 %v6408_v22  ;;  %v7311_v52 = vand.u32 4294901760, %v6431_v53  ;;  %v3321_v9 = vsel %vm3320_vm9, 1, %v7299_v7 }
 0x18b   :  { %v3344_v13 = vadd.s32 %v3338_v32, %v3334_v57  ;;  %v3345_v56 = vadd.s32 %v3343_v45, %v3337_v28  ;;  %v2609_v50 = vsub.f32 %v2607_v48, %v2608_v15  ;;  %v3233_v49 = vmul.f32 -0.001358992, %v3232_v38  ;;  %v1545_v57 = vpop.f32.mrf.mxu3 }
 0x18c   :  { %2743 = vmatpush.msrb.mxu0 %v7311_v52  ;;  %v3240_v46 = vmul.f32 -0.00019511016, %v3232_v38  ;;  %v3323_v24 = vadd.s32 %v3321_v9, %v3315_v31  ;;  %vm3324_vm10 = vc.u32 %v3322_v5, %v3318_v19  ;;  %2692 = vmatpush.msra.mxu3 %v6426_v63  ;;  %v7312_v11 = vand.u32 4294901760, %v6452_v59 }
 0x18d   :  { %v3319_v36 = vshrl.u32 %v6566_v25, 16  ;;  %v3325_v53 = vsel %vm3324_vm10, 1, %v7299_v7  ;;  %vm3346_vm11 = vc.u32 %v3344_v13, %v3340_v17  ;;  %v2610_v2 = vand.u32 4294901760, %v2609_v50  ;;  %v6602_v25 = vld [vmem:[#allocation7] sm:$0xff] }
 0x18e   :  { %2747 = vmatpush.msrb.mxu0 %v7312_v11  ;;  %v3234_v28 = vadd.f32 0.041655596, %v3233_v49  ;;  %v3241_v48 = vadd.f32 0.008332121, %v3240_v46  ;;  %v3327_v32 = vadd.s32 %v3325_v53, %v3323_v24  ;;  %v3347_v20 = vsel %vm3346_vm11, 1, %v7299_v7  ;;  %2694 = vmatpush.msra.mxu3 %v6449_v44 }
 0x18f   :  { %v3341_v31 = vshrl.u32 %v6562_v42, 16  ;;  %v3349_v19 = vadd.s32 %v3347_v20, %v3345_v56  ;;  %2611 = vmatpush.msra.mxu1 %v2610_v2  ;;  %v2613_v59 = vsub.f32 %v6444_v10, %v6463_v54  ;;  %v175_v41 = vperm.slane %v6602_v25, 4  ;;  %v1602_v10 = vpop.f32.mrf.mxu0 }
 0x190   :  { %2751 = vmatpush.msrb.mxu0 %v2608_v15  ;;  %v3235_v5 = vmul.f32 %v3234_v28, %v3232_v38  ;;  %v3242_v45 = vmul.f32 %v3241_v48, %v3232_v38  ;;  %v3328_v52 = vadd.s32 %v3327_v32, %v3317_v55  ;;  %v6605_v9 = vadd.s32 %v3344_v13, %v3340_v17 }
 0x191   :  { %2696 = vmatpush.msra.mxu3 %v6463_v54  ;;  %v3248_v42 = vadd.s32 3, %v3231_v40  ;;  %v3350_v15 = vadd.s32 %v3349_v19, %v3339_v21  ;;  %v2614_v56 = vand.u32 4294901760, %v2613_v59  ;;  %v1384_v50 = vadd.f32 %v1383_v58, %v175_v41  ;;  %2662 = vmatpush.msra.mxu2 %v2613_v59  ;;  %v1672_v21 = vpop.f32.mrf.mxu2 }
 0x192   :  { %2700 = vmatmul.f32.vlgmr.msra.gmra.mxu3 %v4638_v30  ;;  %v3236_v49 = vadd.f32 -0.4999988, %v3235_v5  ;;  %v3243_v46 = vadd.f32 -0.16666654, %v3242_v45  ;;  %v6613_v24 = vadd.s32 %v3328_v52, %v3319_v36  ;;  %2665 = vmatmul.f32.vlgmr.msra.gmra.mxu2 %v7269_v4  ;;  %v176_v55 = vperm.slane %v6602_v25, 5  ;;  %v1635_v36 = vpop.f32.mrf.mxu1 }
 0x193   :  { %v3298_v18 = vsel %vm3292_vm7, %v6542_v3, %v6552_v12  ;;  %v3351_v51 = vadd.s32 %v3350_v15, %v3341_v31  ;;  %v2615_v40 = vsub.f32 %v2613_v59, %v2614_v56  ;;  %v1465_v58 = vadd.f32 %v1464_v1, %v1384_v50  ;;  %2755 = vmatpush.msrb.mxu0 %v2614_v56  ;;  %v1753_v2 = vpop.f32.mrf.mxu3 }
 0x194   :  { %v3237_v17 = vmul.f32 %v3236_v49, %v3232_v38  ;;  %v3244_v30 = vmul.f32 %v3243_v46, %v3232_v38  ;;  %vm3354_vm12 = vc.u32 %v6613_v24, %v6605_v9  ;;  %2757 = vmatmul.f32.vlgmr.msrb.gmra.mxu0 %v4595_v37  ;;  %v1673_v53 = vadd.f32 %v1672_v21, %v176_v55 }
 0x195   :  { %v3355_v4 = vadd.s32 1, %v3351_v51  ;;  %v2616_v13 = vand.u32 4294901760, %v2615_v40  ;;  %v1511_v11 = vadd.f32 %v1510_v62, %v1465_v58  ;;  %v3352_v12 = vmul.u32 %v6440_v61, %v3298_v18 }
 0x196   :  { %v3238_v6 = vadd.f32 1.0, %v3237_v17  ;;  %v3245_v3 = vadd.f32 1.0, %v3244_v30  ;;  %v3249_v1 = vand.u32 3, %v3248_v42  ;;  %v1754_v31 = vadd.f32 %v1753_v2, %v1673_v53 }
 0x197   :  { %v3356_v28 = vsel %vm3354_vm12, %v3355_v4, %v3351_v51  ;;  %2617 = vmatpush.msra.mxu1 %v2616_v13  ;;  %v1546_v48 = vadd.f32 %v1545_v57, %v1511_v11  ;;  %v1799_v62 = vpop.f32.mrf.mxu0  ;;  %vm3261_vm3 = vcmp.lt.s32.totalorder %v6385_v33, 0 }
 0x198   :  { %v3246_v38 = vmul.f32 %v3245_v3, %v6582_v35  ;;  %v3255_v32 = vxor.u32 2147483648, %v3238_v6  ;;  %v3357_v20 = vadd.s32 %v3356_v28, %v3352_v12  ;;  %2619 = vmatmul.f32.vlgmr.msra.gmra.mxu1 %v4595_v37  ;;  %vm3250_vm13 = vcmp.lt.s32.totalorder %v3249_v1, 2 }
 0x199   :  { %2766 = vmatpush.msrb.mxu1 %v6308_v8  ;;  %v1603_v19 = vadd.f32 %v1602_v10, %v1546_v48  ;;  %vm3251_vm14 = vcmp.eq.s32.totalorder %v3249_v1, 0  ;;  %vm3254_vm15 = vcmp.eq.s32.totalorder %v3249_v1, 2  ;;  %v1800_v8 = vadd.f32 %v1799_v62, %v1754_v31  ;;  %v1891_v46 = vpop.f32.mrf.mxu2 }
 0x19a   :  { %v3252_v59 = vxor.u32 2147483648, %v3246_v38  ;;  %v3358_v41 = vadd.s32 536870912, %v3357_v20  ;;  %v3256_v35 = vsel %vm3254_vm15, %v3255_v32, %v3246_v38  ;;  %v1834_v42 = vpop.f32.mrf.mxu1  ;;  %v7317_v48 = vmov 920167782  }
 0x19b   :  { %2768 = vmatpush.msrb.mxu1 %v6310_v43  ;;  %v6629_v61 = vadd.f32 %v1635_v36, %v1603_v19  ;;  %v1835_v49 = vadd.f32 %v1834_v42, %v1800_v8 }
 0x19c   :  { %v3253_v57 = vsel %vm3251_vm14, %v3238_v6, %v3252_v59  ;;  %v3359_v5 = vshrl.u32 %v3358_v41, 30 }
 0x19d   :  { %2770 = vmatpush.msrb.mxu1 %v6313_v27  ;;  %v3257_v45 = vsel %vm3250_vm13, %v3253_v57, %v3256_v35  ;;  %v3417_v52 = vand.u32 2139095040, %v6629_v61  ;;  %v3414_v10 = vand.u32 2147483647, %v6629_v61  ;;  %v1892_v40 = vadd.f32 %v1891_v46, %v1835_v49 }
 0x19e   :  { %v3258_v15 = vsel %vm3247_vm0, nan, %v3257_v45  ;;  %v3360_v56 = vshll.u32 %v3359_v5, 30  ;;  %v3383_v51 = vsub.s32 4, %v3359_v5 }
 0x19f   :  { %2772 = vmatpush.msrb.mxu1 %v6315_v47  ;;  %4191 = vst [vmem:[#allocation8 + $0x10] sm:$0xff] %v3258_v15  ;;  %v3418_v43 = vshrl.u32 %v3417_v52, 23  ;;  %v3421_v47 = vand.u32 8388607, %v3414_v10 }
 0x1a0   :  { %v3361_v50 = vsub.s32 %v3357_v20, %v3360_v56  ;;  %v3384_v13 = vsel %vm3261_vm3, %v3383_v51, %v3359_v5 }
 0x1a1   :  { %2774 = vmatpush.msrb.mxu1 %v6324_v34  ;;  %v4228_v27 = vadd.s32 4294967169, %v3418_v43  ;;  %v1924_v34 = vpop.f32.mrf.mxu3  ;;  %v3422_v11 = vor.u32 8388608, %v3421_v47 }
 0x1a2   :  { %vm3362_vm1 = vcmp.lt.s32.totalorder %v3361_v50, 0  ;;  %v3363_v29 = vsub.s32 0, %v3361_v50 }
 0x1a3   :  { %2776 = vmatpush.msrb.mxu1 %v6352_v14  ;;  %v3424_v55 = vadd.s32 1, %v4228_v27  ;;  %v7313_v14 = vand.u32 2147483647, %v6385_v33  ;;  %v6674_v42 = vshll.u32 %v3422_v11, 8 }
 0x1a4   :  { %v3364_v18 = vsel %vm3362_vm1, %v3363_v29, %v3361_v50 }
 0x1a5   :  { %2778 = vmatpush.msrb.mxu1 %v6373_v60  ;;  %v3365_v58 = vclz %v3364_v18  ;;  %vm3425_vm2 = vcmp.gt.s32.totalorder %v3424_v55, 0  ;;  %vm6645_vm4 = vcmp.le.f32.partialorder %v7313_v14, 0.7853982  ;;  %v3353_v60 = vadd.s32 %v6605_v9, %v6613_v24 }
 0x1a6   :  { %v3426_v21 = vsel %vm3425_vm2, %v3424_v55, 0  ;;  %v7316_v9 = vmov 2102212464   ;;  %v3463_v47 = vand.u32 65535, %v6674_v42 }
 0x1a7   :  { %2780 = vmatpush.msrb.mxu1 %v6383_v26  ;;  %v4226_v17 = vadd.s32 4294967294, %v3365_v58  ;;  %v3428_v30 = vand.u32 31, %v3426_v21  ;;  %v6654_v26 = vadd.f32 %v1924_v34, %v1892_v40  ;;  %v6656_v36 = vshrl.u32 %v3426_v21, 5 }
 0x1a8   :  { %v3464_v21 = vshrl.u32 %v6674_v42, 16 }
 0x1a9   :  { %2782 = vmatpush.msrb.mxu1 %v6408_v22  ;;  %vm4227_vm5 = vcmp.lt.s32.totalorder %v4226_v17, 0  ;;  %v3429_v53 = vsub.s32 32, %v3428_v30  ;;  %v3431_v2 = vshll.u32 %v7291_v16, %v3428_v30  ;;  %v3434_v3 = vshll.u32 %v7262_v23, %v3428_v30 }
 0x1aa   :  { %v3368_v6 = vsel %vm4227_vm5, 0, %v4226_v17  ;;  %v3437_v12 = vshll.u32 %v7264_v39, %v3428_v30  ;;  %v3440_v24 = vshll.u32 %v7316_v9, %v3428_v30  ;;  %v3443_v38 = vshll.u32 %v7317_v48, %v3428_v30 }
 0x1ab   :  { %2784 = vmatpush.msrb.mxu1 %v6426_v63  ;;  %v3369_v1 = vsub.s32 32, %v3368_v6  ;;  %v3370_v28 = vshll.u32 %v3361_v50, %v3368_v6  ;;  %v3373_v22 = vsub.s32 4294967266, %v3368_v6  ;;  %v3432_v32 = vshrl.u32 %v7262_v23, %v3429_v53 }
 0x1ac   :  { %v3435_v20 = vshrl.u32 %v7264_v39, %v3429_v53  ;;  %v3438_v31 = vshrl.u32 %v7316_v9, %v3429_v53  ;;  %v3441_v19 = vshrl.u32 %v7317_v48, %v3429_v53  ;;  %v3444_v41 = vshrl.u32 %v7267_v0, %v3429_v53 }
 0x1ad   :  { %2786 = vmatpush.msrb.mxu1 %v6449_v44  ;;  %v3371_v62 = vshrl.u32 %v3353_v60, %v3369_v1  ;;  %v3374_v59 = vadd.s32 127, %v3373_v22  ;;  %vm3446_vm6 = vcmp.lt.s32.totalorder %v6656_v36, 1  ;;  %v3433_v63 = vor.u32 %v3432_v32, %v3431_v2 }
 0x1ae   :  { %v6671_v57 = vor.u32 %v3435_v20, %v3434_v3  ;;  %v3439_v35 = vor.u32 %v3438_v31, %v3437_v12  ;;  %v3442_v5 = vor.u32 %v3441_v19, %v3440_v24  ;;  %v3445_v52 = vor.u32 %v3444_v41, %v3443_v38 }
 0x1af   :  { %2788 = vmatpush.msrb.mxu1 %v6463_v54  ;;  %v3372_v8 = vor.u32 %v3371_v62, %v3370_v28  ;;  %v3375_v45 = vshll.u32 %v3374_v59, 23  ;;  %vm3447_vm7 = vcmp.lt.s32.totalorder %v6656_v36, 2  ;;  %vm3448_vm8 = vcmp.lt.s32.totalorder %v6656_v36, 3 }
 0x1b0   :  { %2790 = vmatmul.f32.vlgmr.msrb.gmra.mxu1 %v4595_v37  ;;  %vm3449_vm9 = vcmp.lt.s32.totalorder %v6656_v36, 4  ;;  %v3454_v44 = vsel %vm3446_vm6, %v3433_v63, %v6671_v57  ;;  %v3386_v54 = vsel %vm6645_vm4, 0, %v3384_v13  ;;  %v3572_v43 = vand.u32 2139095040, %v6654_v26 }
 0x1b1   :  { %v3376_v15 = vor.u32 4788187, %v3375_v45  ;;  %v3455_v56 = vsel %vm3449_vm9, %v3442_v5, 920167782  ;;  %v3430_v37 = vshrl.u32 %v7291_v16, %v3429_v53  ;;  %v3458_v49 = vsel %vm3446_vm6, %v6671_v57, %v3439_v35 }
 0x1b2   :  { %v3456_v50 = vsel %vm3448_vm8, %v3439_v35, %v3455_v56  ;;  %v3459_v27 = vsel %vm3449_vm9, %v3445_v52, 1326507024  ;;  %v3379_v29 = vcvt.s32.f32 %v3372_v8  ;;  %v3403_v14 = vadd.s32 3, %v3386_v54 }
 0x1b3   :  { %v3377_v46 = vand.u32 2147483647, %v3376_v15  ;;  %v3457_v55 = vsel %vm3447_vm7, %v3454_v44, %v3456_v50  ;;  %v3460_v18 = vsel %vm3448_vm8, %v3442_v5, %v3459_v27  ;;  %v3573_v13 = vshrl.u32 %v3572_v43, 23 }
 0x1b4   :  { %v3461_v51 = vsel %vm3447_vm7, %v3458_v49, %v3460_v18  ;;  %v3487_v40 = vand.u32 65535, %v3457_v55  ;;  %v3488_v58 = vshrl.u32 %v3457_v55, 16  ;;  %v3450_v53 = vsel %vm3446_vm6, %v3430_v37, %v3433_v63 }
 0x1b5   :  { %v3380_v34 = vmul.f32 %v3379_v29, %v3377_v46  ;;  %v3465_v17 = vand.u32 65535, %v3461_v51  ;;  %v3466_v30 = vshrl.u32 %v3461_v51, 16  ;;  %v3451_v3 = vsel %vm3449_vm9, %v3439_v35, 2102212464 }
 0x1b6   :  { %v3490_v60 = vmul.u32 %v3488_v58, %v3463_v47  ;;  %v3489_v12 = vmul.u32 %v3487_v40, %v3463_v47  ;;  %v3491_v24 = vmul.u32 %v3487_v40, %v3464_v21  ;;  %v3492_v32 = vmul.u32 %v3488_v58, %v3464_v21 }
 0x1b7   :  { %v3381_v11 = vxor.u32 2147483648, %v3380_v34  ;;  %v3468_v2 = vmul.u32 %v3466_v30, %v3463_v47  ;;  %v3469_v6 = vmul.u32 %v3465_v17, %v3464_v21  ;;  %v3467_v22 = vmul.u32 %v3465_v17, %v3463_v47 }
 0x1b8   :  { %v3493_v1 = vshll.u32 %v3490_v60, 16  ;;  %v3470_v31 = vmul.u32 %v3466_v30, %v3464_v21  ;;  %v3495_v35 = vshll.u32 %v3491_v24, 16  ;;  %v3452_v4 = vsel %vm3448_vm8, %v6671_v57, %v3451_v3 }
 0x1b9   :  { %v3382_v28 = vsel %vm3261_vm3, %v3381_v11, %v3380_v34  ;;  %v3471_v38 = vshll.u32 %v3468_v2, 16  ;;  %v3473_v19 = vshll.u32 %v3469_v6, 16  ;;  %v3472_v15 = vshrl.u32 %v3468_v2, 16 }
 0x1ba   :  { %v3385_v20 = vsel %vm6645_vm4, %v6385_v33, %v3382_v28  ;;  %vm3497_vm10 = vc.u32 %v3489_v12, %v3493_v1  ;;  %v3499_v5 = vadd.s32 %v3493_v1, %v3489_v12  ;;  %v3494_v49 = vshrl.u32 %v3490_v60, 16 }
 0x1bb   :  { %v3387_v62 = vmul.f32 %v3385_v20, %v3385_v20  ;;  %vm3475_vm11 = vc.u32 %v3467_v22, %v3471_v38  ;;  %v3477_v59 = vadd.s32 %v3471_v38, %v3467_v22  ;;  %v3498_v41 = vsel %vm3497_vm10, 1, %v7299_v7 }
 0x1bc   :  { %v3476_v63 = vsel %vm3475_vm11, 1, %v7299_v7  ;;  %v3500_v8 = vadd.s32 %v3498_v41, %v3492_v32  ;;  %vm3501_vm13 = vc.u32 %v3499_v5, %v3495_v35  ;;  %v3569_v46 = vand.u32 2147483647, %v6654_v26 }
 0x1bd   :  { %v3388_v45 = vmul.f32 -0.001358992, %v3387_v62  ;;  %v3395_v52 = vmul.f32 -0.00019511016, %v3387_v62  ;;  %v3478_v44 = vadd.s32 %v3476_v63, %v3470_v31  ;;  %vm3479_vm12 = vc.u32 %v3477_v59, %v3473_v19 }
 0x1be   :  { %v3480_v54 = vsel %vm3479_vm12, 1, %v7299_v7  ;;  %v3502_v50 = vsel %vm3501_vm13, 1, %v7299_v7  ;;  %v4231_v29 = vadd.s32 4294967169, %v3573_v13  ;;  %v3474_v51 = vshrl.u32 %v3469_v6, 16 }
 0x1bf   :  { %v3389_v56 = vadd.f32 0.041655596, %v3388_v45  ;;  %v3396_v43 = vadd.f32 0.008332121, %v3395_v52  ;;  %v3482_v37 = vadd.s32 %v3480_v54, %v3478_v44  ;;  %v3504_v27 = vadd.s32 %v3502_v50, %v3500_v8 }
 0x1c0   :  { %v3404_v40 = vand.u32 3, %v3403_v14  ;;  %v3496_v57 = vshrl.u32 %v3491_v24, 16  ;;  %v3579_v34 = vadd.s32 1, %v4231_v29  ;;  %v6723_v11 = vadd.s32 %v3499_v5, %v3495_v35 }
 0x1c1   :  { %v3390_v55 = vmul.f32 %v3389_v56, %v3387_v62  ;;  %v3397_v18 = vmul.f32 %v3396_v43, %v3387_v62  ;;  %v3483_v47 = vadd.s32 %v3482_v37, %v3472_v15  ;;  %v3505_v58 = vadd.s32 %v3504_v27, %v3494_v49 }
 0x1c2   :  { %v3453_v60 = vsel %vm3447_vm7, %v3450_v53, %v3452_v4  ;;  %v3576_v13 = vand.u32 8388607, %v3569_v46  ;;  %vm3580_vm14 = vcmp.gt.s32.totalorder %v3579_v34, 0  ;;  %vm3405_vm0 = vcmp.lt.s32.totalorder %v3404_v40, 2 }
 0x1c3   :  { %v3391_v21 = vadd.f32 -0.4999988, %v3390_v55  ;;  %v3398_v17 = vadd.f32 -0.16666654, %v3397_v18  ;;  %v6721_v30 = vadd.s32 %v3483_v47, %v3474_v51  ;;  %v3506_v2 = vadd.s32 %v3505_v58, %v3496_v57  ;;  %v1961_v57 = vpop.f32.mrf.mxu0 }
 0x1c4   :  { %v3581_v12 = vsel %vm3580_vm14, %v3579_v34, 0  ;;  %v3507_v28 = vmul.u32 %v6674_v42, %v3453_v60  ;;  %vm3406_vm1 = vcmp.eq.s32.totalorder %v3404_v40, 0  ;;  %vm3409_vm2 = vcmp.eq.s32.totalorder %v3404_v40, 2 }
 0x1c5   :  { %v3392_v6 = vmul.f32 %v3391_v21, %v3387_v62  ;;  %v3399_v3 = vmul.f32 %v3398_v17, %v3387_v62  ;;  %vm3509_vm15 = vc.u32 %v6721_v30, %v6723_v11  ;;  %v3510_v14 = vadd.s32 1, %v3506_v2 }
 0x1c6   :  { %v3583_v22 = vand.u32 31, %v3581_v12  ;;  %v3577_v53 = vor.u32 8388608, %v3576_v13  ;;  %v6732_v62 = vshrl.u32 %v3581_v12, 5  ;;  %vm3402_vm3 = vweird.f32 %v6385_v33 }
 0x1c7   :  { %v3393_v24 = vadd.f32 1.0, %v3392_v6  ;;  %v3400_v1 = vadd.f32 1.0, %v3399_v3  ;;  %v3511_v36 = vsel %vm3509_vm15, %v3510_v14, %v3506_v2  ;;  %v177_v55 = vperm.slane %v6602_v25, 6 }
 0x1c8   :  { %v3512_v31 = vadd.s32 %v3511_v36, %v3507_v28  ;;  %v3584_v19 = vsub.s32 32, %v3583_v22  ;;  %v3586_v59 = vshll.u32 %v7291_v16, %v3583_v22  ;;  %v3589_v41 = vshll.u32 %v7262_v23, %v3583_v22  ;;  %v2042_v36 = vpop.f32.mrf.mxu1 }
 0x1c9   :  { %v3401_v38 = vmul.f32 %v3400_v1, %v3385_v20  ;;  %v3410_v32 = vxor.u32 2147483648, %v3393_v24  ;;  %v3592_v63 = vshll.u32 %v7264_v39, %v3583_v22  ;;  %v3595_v8 = vshll.u32 %v7316_v9, %v3583_v22 }
 0x1ca   :  { %v3513_v42 = vadd.s32 536870912, %v3512_v31  ;;  %v3587_v45 = vshrl.u32 %v7262_v23, %v3584_v19  ;;  %v3590_v20 = vshrl.u32 %v7264_v39, %v3584_v19  ;;  %v3593_v52 = vshrl.u32 %v7316_v9, %v3584_v19 }
 0x1cb   :  { %v3407_v35 = vxor.u32 2147483648, %v3401_v38  ;;  %v3411_v5 = vsel %vm3409_vm2, %v3410_v32, %v3401_v38  ;;  %v3596_v44 = vshrl.u32 %v7317_v48, %v3584_v19  ;;  %v3598_v54 = vshll.u32 %v7317_v48, %v3583_v22 }
 0x1cc   :  { %v6743_v15 = vshrl.u32 %v3513_v42, 30  ;;  %v3599_v56 = vshrl.u32 %v7267_v0, %v3584_v19  ;;  %v3588_v37 = vor.u32 %v3587_v45, %v3586_v59  ;;  %v6749_v50 = vor.u32 %v3590_v20, %v3589_v41 }
 0x1cd   :  { %v3408_v4 = vsel %vm3406_vm1, %v3393_v24, %v3407_v35  ;;  %v3597_v29 = vor.u32 %v3596_v44, %v3595_v8  ;;  %v3594_v18 = vor.u32 %v3593_v52, %v3592_v63  ;;  %vm3601_vm4 = vcmp.lt.s32.totalorder %v6732_v62, 1 }
 0x1ce   :  { %v3412_v43 = vsel %vm3405_vm0, %v3408_v4, %v3411_v5  ;;  %v3515_v27 = vshll.u32 %v6743_v15, 30  ;;  %v3600_v51 = vor.u32 %v3599_v56, %v3598_v54  ;;  %v6754_v47 = vshll.u32 %v3577_v53, 8 }
 0x1cf   :  { %v3413_v49 = vsel %vm3402_vm3, nan, %v3412_v43  ;;  %vm3603_vm5 = vcmp.lt.s32.totalorder %v6732_v62, 3  ;;  %vm3604_vm6 = vcmp.lt.s32.totalorder %v6732_v62, 4  ;;  %vm3602_vm7 = vcmp.lt.s32.totalorder %v6732_v62, 2 }
 0x1d0   :  { %4192 = vst [vmem:[#allocation8 + $0x18] sm:$0xff] %v3413_v49  ;;  %v3516_v33 = vsub.s32 %v3512_v31, %v3515_v27  ;;  %v3609_v40 = vsel %vm3601_vm4, %v3588_v37, %v6749_v50  ;;  %v3610_v58 = vsel %vm3604_vm6, %v3597_v29, 920167782  ;;  %v1962_v21 = vadd.f32 %v1961_v57, %v177_v55 }
 0x1d1   :  { %v3611_v17 = vsel %vm3603_vm5, %v3594_v18, %v3610_v58  ;;  %v3613_v60 = vsel %vm3601_vm4, %v6749_v50, %v3594_v18  ;;  %v3614_v2 = vsel %vm3604_vm6, %v3600_v51, 1326507024  ;;  %v3618_v13 = vand.u32 65535, %v6754_v47 }
 0x1d2   :  { %vm3517_vm8 = vcmp.lt.s32.totalorder %v3516_v33, 0  ;;  %v3518_v34 = vsub.s32 0, %v3516_v33  ;;  %v3612_v3 = vsel %vm3602_vm7, %v3609_v40, %v3611_v17  ;;  %v3615_v14 = vsel %vm3603_vm5, %v3597_v29, %v3614_v2  ;;  %v2088_v17 = vpop.f32.mrf.mxu2 }
 0x1d3   :  { %v3619_v12 = vshrl.u32 %v6754_v47, 16  ;;  %v3616_v1 = vsel %vm3602_vm7, %v3613_v60, %v3615_v14  ;;  %v3642_v28 = vand.u32 65535, %v3612_v3  ;;  %v3643_v22 = vshrl.u32 %v3612_v3, 16 }
 0x1d4   :  { %v3519_v6 = vsel %vm3517_vm8, %v3518_v34, %v3516_v33  ;;  %v3585_v53 = vshrl.u32 %v7291_v16, %v3584_v19  ;;  %v3620_v38 = vand.u32 65535, %v3616_v1  ;;  %v3508_v32 = vadd.s32 %v6723_v11, %v6721_v30 }
 0x1d5   :  { %v3520_v24 = vclz %v3519_v6  ;;  %v3621_v59 = vshrl.u32 %v3616_v1, 16  ;;  %v3645_v41 = vmul.u32 %v3643_v22, %v3618_v13  ;;  %v3644_v35 = vmul.u32 %v3642_v28, %v3618_v13 }
 0x1d6   :  { %v3624_v63 = vmul.u32 %v3620_v38, %v3619_v12  ;;  %v3646_v5 = vmul.u32 %v3642_v28, %v3619_v12  ;;  %v2043_v42 = vadd.f32 %v2042_v36, %v1962_v21  ;;  %v3622_v8 = vmul.u32 %v3620_v38, %v3618_v13 }
 0x1d7   :  { %v4229_v31 = vadd.s32 4294967294, %v3520_v24  ;;  %v3623_v45 = vmul.u32 %v3621_v59, %v3618_v13  ;;  %v3648_v20 = vshll.u32 %v3645_v41, 16  ;;  %v3605_v44 = vsel %vm3601_vm4, %v3585_v53, %v3588_v37 }
 0x1d8   :  { %v3606_v19 = vsel %vm3604_vm6, %v3594_v18, 2102212464  ;;  %v3625_v4 = vmul.u32 %v3621_v59, %v3619_v12  ;;  %v3628_v56 = vshll.u32 %v3624_v63, 16  ;;  %v3647_v49 = vmul.u32 %v3643_v22, %v3619_v12  ;;  %v2123_v12 = vpop.f32.mrf.mxu3 }
 0x1d9   :  { %vm4230_vm9 = vcmp.lt.s32.totalorder %v4229_v31, 0  ;;  %v3626_v54 = vshll.u32 %v3623_v45, 16  ;;  %v3650_v27 = vshll.u32 %v3646_v5, 16  ;;  %vm3652_vm10 = vc.u32 %v3644_v35, %v3648_v20 }
 0x1da   :  { %v3523_v52 = vsel %vm4230_vm9, 0, %v4229_v31  ;;  %v3627_v57 = vshrl.u32 %v3623_v45, 16  ;;  %v3653_v37 = vsel %vm3652_vm10, 1, %v7299_v7  ;;  %v3654_v58 = vadd.s32 %v3648_v20, %v3644_v35  ;;  %v2180_v31 = vpop.f32.mrf.mxu0  ;;  %v2213_v45 = vpop.f32.mrf.mxu1 }
 0x1db   :  { %v3524_v30 = vsub.s32 32, %v3523_v52  ;;  %v3528_v11 = vsub.s32 4294967266, %v3523_v52  ;;  %v3525_v43 = vshll.u32 %v3516_v33, %v3523_v52  ;;  %vm3630_vm11 = vc.u32 %v3622_v8, %v3626_v54 }
 0x1dc   :  { %v3632_v51 = vadd.s32 %v3626_v54, %v3622_v8  ;;  %v3631_v40 = vsel %vm3630_vm11, 1, %v7299_v7  ;;  %v3649_v60 = vshrl.u32 %v3645_v41, 16  ;;  %v3655_v2 = vadd.s32 %v3653_v37, %v3647_v49 }
 0x1dd   :  { %v3526_v29 = vshrl.u32 %v3508_v32, %v3524_v30  ;;  %v3529_v55 = vadd.s32 127, %v3528_v11  ;;  %v3633_v21 = vadd.s32 %v3631_v40, %v3625_v4  ;;  %vm3656_vm13 = vc.u32 %v3654_v58, %v3650_v27 }
 0x1de   :  { %vm3634_vm12 = vc.u32 %v3632_v51, %v3628_v56  ;;  %v3629_v6 = vshrl.u32 %v3624_v63, 16  ;;  %v3657_v14 = vsel %vm3656_vm13, 1, %v7299_v7  ;;  %v3607_v24 = vsel %vm3603_vm5, %v6749_v50, %v3606_v19 }
 0x1df   :  { %v3527_v18 = vor.u32 %v3526_v29, %v3525_v43  ;;  %v3530_v34 = vshll.u32 %v3529_v55, 23  ;;  %v3635_v33 = vsel %vm3634_vm12, 1, %v7299_v7  ;;  %v3651_v1 = vshrl.u32 %v3646_v5, 16 }
 0x1e0   :  { %v3637_v3 = vadd.s32 %v3635_v33, %v3633_v21  ;;  %v3659_v28 = vadd.s32 %v3657_v14, %v3655_v2  ;;  %v2089_v22 = vadd.f32 %v2088_v17, %v2043_v42  ;;  %v6793_v32 = vadd.s32 %v3654_v58, %v3650_v27 }
 0x1e1   :  { %v3531_v13 = vor.u32 4788187, %v3530_v34  ;;  %v3534_v53 = vcvt.s32.f32 %v3527_v18  ;;  %v3538_v35 = vsub.s32 4, %v6743_v15  ;;  %v3608_v50 = vsel %vm3602_vm7, %v3605_v44, %v3607_v24 }
 0x1e2   :  { %v3638_v38 = vadd.s32 %v3637_v3, %v3627_v57  ;;  %v3660_v59 = vadd.s32 %v3659_v28, %v3649_v60  ;;  %v2124_v41 = vadd.f32 %v2123_v12, %v2089_v22  ;;  %vm3416_vm15 = vcmp.lt.s32.totalorder %v6629_v61, 0  ;;  %v2377_v12 = vpop.f32.mrf.mxu0 }
 0x1e3   :  { %v3532_v36 = vand.u32 2147483647, %v3531_v13  ;;  %vm6807_vm0 = vcmp.le.f32.partialorder %v3414_v10, 0.7853982  ;;  %v3539_v62 = vsel %vm3416_vm15, %v3538_v35, %v6743_v15  ;;  %v3662_v44 = vmul.u32 %v6754_v47, %v3608_v50  ;;  %v2250_v10 = vpop.f32.mrf.mxu2 }
 0x1e4   :  { %v6796_v8 = vadd.s32 %v3638_v38, %v3629_v6  ;;  %v3661_v5 = vadd.s32 %v3660_v59, %v3651_v1  ;;  %v2181_v20 = vadd.f32 %v2180_v31, %v2124_v41  ;;  %v178_v56 = vperm.slane %v6602_v25, 7  ;;  %v2331_v34 = vpop.f32.mrf.mxu3 }
 0x1e5   :  { %v3535_v63 = vmul.f32 %v3534_v53, %v3532_v36  ;;  %v3541_v29 = vsel %vm6807_vm0, 0, %v3539_v62  ;;  %vm3571_vm1 = vcmp.lt.s32.totalorder %v6654_v26, 0  ;;  %vm3557_vm4 = vweird.f32 %v6629_v61 }
 0x1e6   :  { %vm3664_vm14 = vc.u32 %v6796_v8, %v6793_v32  ;;  %v3665_v52 = vadd.s32 1, %v3661_v5  ;;  %v6803_v19 = vadd.f32 %v2213_v45, %v2181_v20  ;;  %v2251_v47 = vadd.f32 %v2250_v10, %v178_v56  ;;  %v2412_v45 = vpop.f32.mrf.mxu1 }
 0x1e7   :  { %v3536_v42 = vxor.u32 2147483648, %v3535_v63  ;;  %v3558_v21 = vadd.s32 3, %v3541_v29  ;;  %vm6861_vm13 = vcmp.le.f32.partialorder %v3569_v46, 0.7853982 }
 0x1e8   :  { %v3666_v54 = vsel %vm3664_vm14, %v3665_v52, %v3661_v5  ;;  %v3727_v27 = vand.u32 2139095040, %v6803_v19  ;;  %v3724_v60 = vand.u32 2147483647, %v6803_v19  ;;  %v2332_v13 = vadd.f32 %v2331_v34, %v2251_v47 }
 0x1e9   :  { %v3537_v30 = vsel %vm3416_vm15, %v3536_v42, %v3535_v63  ;;  %v3667_v49 = vadd.s32 %v3666_v54, %v3662_v44  ;;  %v3559_v24 = vand.u32 3, %v3558_v21  ;;  %v3663_v52 = vadd.s32 %v6793_v32, %v6796_v8 }
 0x1ea   :  { %v3540_v11 = vsel %vm6807_vm0, %v6629_v61, %v3537_v30  ;;  %v3728_v57 = vshrl.u32 %v3727_v27, 23  ;;  %v3731_v53 = vand.u32 8388607, %v3724_v60  ;;  %v2378_v31 = vadd.f32 %v2377_v12, %v2332_v13 }
 0x1eb   :  { %v3542_v43 = vmul.f32 %v3540_v11, %v3540_v11  ;;  %v3668_v15 = vadd.s32 536870912, %v3667_v49  ;;  %vm3560_vm5 = vcmp.lt.s32.totalorder %v3559_v24, 2  ;;  %vm3561_vm6 = vcmp.eq.s32.totalorder %v3559_v24, 0  ;;  %v2469_v61 = vpop.f32.mrf.mxu2 }
 0x1ec   :  { %v4234_v18 = vadd.s32 4294967169, %v3728_v57  ;;  %vm3564_vm7 = vcmp.eq.s32.totalorder %v3559_v24, 2  ;;  %v3732_v62 = vor.u32 8388608, %v3731_v53  ;;  %v2413_v44 = vadd.f32 %v2412_v45, %v2378_v31 }
 0x1ed   :  { %v3543_v55 = vmul.f32 -0.001358992, %v3542_v43  ;;  %v3550_v51 = vmul.f32 -0.00019511016, %v3542_v43  ;;  %v3669_v58 = vshrl.u32 %v3668_v15, 30 }
 0x1ee   :  { %v3734_v2 = vadd.s32 1, %v4234_v18  ;;  %v6857_v24 = vshll.u32 %v3732_v62, 8 }
 0x1ef   :  { %v3544_v40 = vadd.f32 0.041655596, %v3543_v55  ;;  %v3551_v37 = vadd.f32 0.008332121, %v3550_v51  ;;  %v3670_v33 = vshll.u32 %v3669_v58, 30  ;;  %v3693_v36 = vsub.s32 4, %v3669_v58 }
 0x1f0   :  { %vm3735_vm2 = vcmp.gt.s32.totalorder %v3734_v2, 0 }
 0x1f1   :  { %v3545_v25 = vmul.f32 %v3544_v40, %v3542_v43  ;;  %v3552_v17 = vmul.f32 %v3551_v37, %v3542_v43  ;;  %v3671_v14 = vsub.s32 %v3667_v49, %v3670_v33  ;;  %v3736_v38 = vsel %vm3735_vm2, %v3734_v2, 0 }
 0x1f2   :  { %v6825_v35 = vshrl.u32 %v3736_v38, 5  ;;  %v3738_v5 = vand.u32 31, %v3736_v38  ;;  %v3694_v30 = vsel %vm3571_vm1, %v3693_v36, %v3669_v58  ;;  %v2470_v36 = vadd.f32 %v2469_v61, %v2413_v44 }
 0x1f3   :  { %v3546_v6 = vadd.f32 -0.4999988, %v3545_v25  ;;  %v3553_v3 = vadd.f32 -0.16666654, %v3552_v17  ;;  %vm3672_vm3 = vcmp.lt.s32.totalorder %v3671_v14, 0  ;;  %v3673_v22 = vsub.s32 0, %v3671_v14 }
 0x1f4   :  { %v3739_v56 = vsub.s32 32, %v3738_v5  ;;  %vm3756_vm8 = vcmp.lt.s32.totalorder %v6825_v35, 1  ;;  %v3747_v27 = vshll.u32 %v7264_v39, %v3738_v5  ;;  %v3750_v29 = vshll.u32 %v7316_v9, %v3738_v5 }
 0x1f5   :  { %v3547_v1 = vmul.f32 %v3546_v6, %v3542_v43  ;;  %v3554_v28 = vmul.f32 %v3553_v3, %v3542_v43  ;;  %v3674_v63 = vsel %vm3672_vm3, %v3673_v22, %v3671_v14  ;;  %v3741_v43 = vshll.u32 %v7291_v16, %v3738_v5 }
 0x1f6   :  { %v3675_v50 = vclz %v3674_v63  ;;  %v3742_v10 = vshrl.u32 %v7262_v23, %v3739_v56  ;;  %v3745_v37 = vshrl.u32 %v7264_v39, %v3739_v56  ;;  %v3748_v58 = vshrl.u32 %v7316_v9, %v3739_v56 }
 0x1f7   :  { %v3548_v59 = vadd.f32 1.0, %v3547_v1  ;;  %v3555_v41 = vadd.f32 1.0, %v3554_v28  ;;  %v3751_v21 = vshrl.u32 %v7317_v48, %v3739_v56  ;;  %v3753_v25 = vshll.u32 %v7317_v48, %v3738_v5 }
 0x1f8   :  { %v4232_v4 = vadd.s32 4294967294, %v3675_v50  ;;  %v6841_v40 = vor.u32 %v3742_v10, %v3741_v43  ;;  %v3749_v33 = vor.u32 %v3748_v58, %v3747_v27  ;;  %v3754_v2 = vshrl.u32 %v7267_v0, %v3739_v56 }
 0x1f9   :  { %v3556_v20 = vmul.f32 %v3555_v41, %v3540_v11  ;;  %v3565_v42 = vxor.u32 2147483648, %v3548_v59  ;;  %v3744_v11 = vshll.u32 %v7262_v23, %v3738_v5  ;;  %vm3758_vm10 = vcmp.lt.s32.totalorder %v6825_v35, 3 }
 0x1fa   :  { %vm4233_vm9 = vcmp.lt.s32.totalorder %v4232_v4, 0  ;;  %v3752_v3 = vor.u32 %v3751_v21, %v3750_v29  ;;  %vm3759_vm11 = vcmp.lt.s32.totalorder %v6825_v35, 4  ;;  %vm3757_vm12 = vcmp.lt.s32.totalorder %v6825_v35, 2 }
 0x1fb   :  { %v3562_v54 = vxor.u32 2147483648, %v3556_v20  ;;  %v3566_v49 = vsel %vm3564_vm7, %v3565_v42, %v3556_v20  ;;  %v3678_v8 = vsel %vm4233_vm9, 0, %v4232_v4  ;;  %v6847_v17 = vor.u32 %v3745_v37, %v3744_v11 }
 0x1fc   :  { %v3679_v51 = vsub.s32 32, %v3678_v8  ;;  %v3680_v15 = vshll.u32 %v3671_v14, %v3678_v8  ;;  %v3683_v57 = vsub.s32 4294967266, %v3678_v8  ;;  %v3755_v14 = vor.u32 %v3754_v2, %v3753_v25  ;;  %v2502_v44 = vpop.f32.mrf.mxu3 }
 0x1fd   :  { %v3563_v32 = vsel %vm3561_vm6, %v3548_v59, %v3562_v54  ;;  %v3764_v12 = vsel %vm3756_vm8, %v6841_v40, %v6847_v17  ;;  %v3765_v22 = vsel %vm3759_vm11, %v3752_v3, 920167782  ;;  %v3696_v53 = vsel %vm6861_vm13, 0, %v3694_v30 }
 0x1fe   :  { %v3567_v55 = vsel %vm3560_vm5, %v3563_v32, %v3566_v49  ;;  %v3681_v18 = vshrl.u32 %v3663_v52, %v3679_v51  ;;  %v3684_v34 = vadd.s32 127, %v3683_v57  ;;  %v3766_v38 = vsel %vm3758_vm10, %v3749_v33, %v3765_v22 }
 0x1ff   :  { %v3568_v47 = vsel %vm3557_vm4, nan, %v3567_v55  ;;  %v3768_v31 = vsel %vm3756_vm8, %v6847_v17, %v3749_v33  ;;  %v3769_v46 = vsel %vm3759_vm11, %v3755_v14, 1326507024  ;;  %v3767_v63 = vsel %vm3757_vm12, %v3764_v12, %v3766_v38 }
 0x200   :  { %4193 = vst [vmem:[#allocation8 + $0x20] sm:$0xff] %v3568_v47  ;;  %v3682_v13 = vor.u32 %v3681_v18, %v3680_v15  ;;  %v3685_v6 = vshll.u32 %v3684_v34, 23  ;;  %v3770_v45 = vsel %vm3758_vm10, %v3752_v3, %v3769_v46  ;;  %v3773_v5 = vand.u32 65535, %v6857_v24 }
 0x201   :  { %v3771_v50 = vsel %vm3757_vm12, %v3768_v31, %v3770_v45  ;;  %v3797_v20 = vand.u32 65535, %v3767_v63  ;;  %v3798_v42 = vshrl.u32 %v3767_v63, 16  ;;  %v3774_v4 = vshrl.u32 %v6857_v24, 16 }
 0x202   :  { %v3686_v28 = vor.u32 4788187, %v3685_v6  ;;  %v3689_v41 = vcvt.s32.f32 %v3682_v13  ;;  %v3775_v30 = vand.u32 65535, %v3771_v50  ;;  %v3776_v62 = vshrl.u32 %v3771_v50, 16 }
 0x203   :  { %v3713_v54 = vadd.s32 3, %v3696_v53  ;;  %v3740_v43 = vshrl.u32 %v7291_v16, %v3739_v56  ;;  %v3800_v49 = vmul.u32 %v3798_v42, %v3773_v5  ;;  %v3761_v27 = vsel %vm3759_vm11, %v3749_v33, 2102212464 }
 0x204   :  { %v3687_v59 = vand.u32 2147483647, %v3686_v28  ;;  %v3778_v32 = vmul.u32 %v3776_v62, %v3773_v5  ;;  %v3779_v8 = vmul.u32 %v3775_v30, %v3774_v4  ;;  %v3799_v10 = vmul.u32 %v3797_v20, %v3773_v5 }
 0x205   :  { %v3801_v29 = vmul.u32 %v3797_v20, %v3774_v4  ;;  %v3803_v55 = vshll.u32 %v3800_v49, 16  ;;  %v6887_v51 = vadd.f32 %v2502_v44, %v2470_v36  ;;  %v3777_v57 = vmul.u32 %v3775_v30, %v3773_v5 }
 0x206   :  { %v3690_v52 = vmul.f32 %v3689_v41, %v3687_v59  ;;  %v3781_v47 = vshll.u32 %v3778_v32, 16  ;;  %v3802_v37 = vmul.u32 %v3798_v42, %v3774_v4  ;;  %v3780_v58 = vmul.u32 %v3776_v62, %v3774_v4 }
 0x207   :  { %v3783_v18 = vshll.u32 %v3779_v8, 16  ;;  %vm3807_vm14 = vc.u32 %v3799_v10, %v3803_v55  ;;  %v3805_v2 = vshll.u32 %v3801_v29, 16  ;;  %v3809_v61 = vadd.s32 %v3803_v55, %v3799_v10 }
 0x208   :  { %v3691_v11 = vxor.u32 2147483648, %v3690_v52  ;;  %vm3785_vm15 = vc.u32 %v3777_v57, %v3781_v47  ;;  %v3787_v21 = vadd.s32 %v3781_v47, %v3777_v57  ;;  %v3808_v25 = vsel %vm3807_vm14, 1, %v7299_v7 }
 0x209   :  { %v3786_v33 = vsel %vm3785_vm15, 1, %v7299_v7  ;;  %v3810_v13 = vadd.s32 %v3808_v25, %v3802_v37  ;;  %v3760_v12 = vsel %vm3756_vm8, %v3740_v43, %v6841_v40  ;;  %v3782_v1 = vshrl.u32 %v3778_v32, 16 }
 0x20a   :  { %v3692_v15 = vsel %vm3571_vm1, %v3691_v11, %v3690_v52  ;;  %v3788_v14 = vadd.s32 %v3786_v33, %v3780_v58  ;;  %vm3789_vm0 = vc.u32 %v3787_v21, %v3783_v18  ;;  %vm3811_vm1 = vc.u32 %v3809_v61, %v3805_v2 }
 0x20b   :  { %v3695_v56 = vsel %vm6861_vm13, %v6654_v26, %v3692_v15  ;;  %v3790_v28 = vsel %vm3789_vm0, 1, %v7299_v7  ;;  %v3812_v38 = vsel %vm3811_vm1, 1, %v7299_v7  ;;  %v3762_v31 = vsel %vm3758_vm10, %v6847_v17, %v3761_v27 }
 0x20c   :  { %v3697_v34 = vmul.f32 %v3695_v56, %v3695_v56  ;;  %v3792_v53 = vadd.s32 %v3790_v28, %v3788_v14  ;;  %v3804_v46 = vshrl.u32 %v3800_v49, 16  ;;  %v3814_v59 = vadd.s32 %v3812_v38, %v3810_v13 }
 0x20d   :  { %v3882_v41 = vand.u32 2139095040, %v6887_v51  ;;  %v3784_v40 = vshrl.u32 %v3779_v8, 16  ;;  %v3806_v5 = vshrl.u32 %v3801_v29, 16  ;;  %v3879_v42 = vand.u32 2147483647, %v6887_v51 }
 0x20e   :  { %v3698_v6 = vmul.f32 -0.001358992, %v3697_v34  ;;  %v3705_v3 = vmul.f32 -0.00019511016, %v3697_v34  ;;  %v3793_v50 = vadd.s32 %v3792_v53, %v3782_v1  ;;  %v3815_v20 = vadd.s32 %v3814_v59, %v3804_v46 }
 0x20f   :  { %v3883_v52 = vshrl.u32 %v3882_v41, 23  ;;  %v6908_v44 = vadd.s32 %v3809_v61, %v3805_v2  ;;  %v3763_v17 = vsel %vm3757_vm12, %v3760_v12, %v3762_v31  ;;  %v3714_v32 = vand.u32 3, %v3713_v54  ;;  %v4256_v31 = vld [vmem:[#allocation7 + $0x8] ss:$0 sm:$0xff]  ;;  %v2539_v41 = vpop.f32.mrf.mxu0 }
 0x210   :  { %v3699_v22 = vadd.f32 0.041655596, %v3698_v6  ;;  %v3706_v36 = vadd.f32 0.008332121, %v3705_v3  ;;  %v6906_v62 = vadd.s32 %v3793_v50, %v3784_v40  ;;  %v3816_v43 = vadd.s32 %v3815_v20, %v3806_v5 }
 0x211   :  { %v4237_v49 = vadd.s32 4294967169, %v3883_v52  ;;  %v3817_v15 = vmul.u32 %v6857_v24, %v3763_v17  ;;  %v3886_v57 = vand.u32 8388607, %v3879_v42  ;;  %vm3712_vm3 = vweird.f32 %v6654_v26 }
 0x212   :  { %v3700_v63 = vmul.f32 %v3699_v22, %v3697_v34  ;;  %v3707_v45 = vmul.f32 %v3706_v36, %v3697_v34  ;;  %vm3819_vm2 = vc.u32 %v6906_v62, %v6908_v44  ;;  %v3820_v8 = vadd.s32 1, %v3816_v43 }
 0x213   :  { %v3889_v10 = vadd.s32 1, %v4237_v49  ;;  %vm3715_vm5 = vcmp.lt.s32.totalorder %v3714_v32, 2  ;;  %vm3716_vm6 = vcmp.eq.s32.totalorder %v3714_v32, 0  ;;  %vm3719_vm7 = vcmp.eq.s32.totalorder %v3714_v32, 2 }
 0x214   :  { %v3701_v4 = vadd.f32 -0.4999988, %v3700_v63  ;;  %v3708_v30 = vadd.f32 -0.16666654, %v3707_v45  ;;  %v3821_v35 = vsel %vm3819_vm2, %v3820_v8, %v3816_v43  ;;  %v3887_v25 = vor.u32 8388608, %v3886_v57 }
 0x215   :  { %vm3890_vm4 = vcmp.gt.s32.totalorder %v3889_v10, 0  ;;  %v3822_v58 = vadd.s32 %v3821_v35, %v3817_v15  ;;  %vm3726_vm2 = vcmp.lt.s32.totalorder %v6803_v19, 0 }
 0x216   :  { %v3702_v11 = vmul.f32 %v3701_v4, %v3697_v34  ;;  %v3709_v27 = vmul.f32 %v3708_v30, %v3697_v34  ;;  %v3891_v18 = vsel %vm3890_vm4, %v3889_v10, 0  ;;  %v6940_v50 = vshll.u32 %v3887_v25, 8  ;;  %v2620_v30 = vpop.f32.mrf.mxu1 }
 0x217   :  { %v3893_v54 = vand.u32 31, %v3891_v18  ;;  %v3823_v21 = vadd.s32 536870912, %v3822_v58  ;;  %v6918_v33 = vshrl.u32 %v3891_v18, 5  ;;  %v2540_v4 = vadd.f32 %v4256_v31, %v2539_v41 }
 0x218   :  { %v3703_v29 = vadd.f32 1.0, %v3702_v11  ;;  %v3710_v55 = vadd.f32 1.0, %v3709_v27  ;;  %v3928_v10 = vand.u32 65535, %v6940_v50  ;;  %v3929_v35 = vshrl.u32 %v6940_v50, 16 }
 0x219   :  { %v3894_v2 = vsub.s32 32, %v3893_v54  ;;  %v3896_v61 = vshll.u32 %v7291_v16, %v3893_v54  ;;  %v3899_v13 = vshll.u32 %v7262_v23, %v3893_v54  ;;  %v3902_v3 = vshll.u32 %v7264_v39, %v3893_v54 }
 0x21a   :  { %v3711_v47 = vmul.f32 %v3710_v55, %v3695_v56  ;;  %v3720_v37 = vxor.u32 2147483648, %v3703_v29  ;;  %v6922_v56 = vshrl.u32 %v3823_v21, 30  ;;  %v3905_v14 = vshll.u32 %v7316_v9, %v3893_v54 }
 0x21b   :  { %v3897_v1 = vshrl.u32 %v7262_v23, %v3894_v2  ;;  %v3900_v28 = vshrl.u32 %v7264_v39, %v3894_v2  ;;  %v3908_v22 = vshll.u32 %v7317_v48, %v3893_v54  ;;  %v3903_v38 = vshrl.u32 %v7316_v9, %v3894_v2 }
 0x21c   :  { %v3717_v34 = vxor.u32 2147483648, %v3711_v47  ;;  %v3721_v24 = vsel %vm3719_vm7, %v3720_v37, %v3711_v47  ;;  %v3825_v53 = vshll.u32 %v6922_v56, 30  ;;  %v3906_v46 = vshrl.u32 %v7317_v48, %v3894_v2  ;;  %v2666_v47 = vpop.f32.mrf.mxu2 }
 0x21d   :  { %v3909_v59 = vshrl.u32 %v7267_v0, %v3894_v2  ;;  %v6936_v45 = vor.u32 %v3897_v1, %v3896_v61  ;;  %v6938_v40 = vor.u32 %v3900_v28, %v3899_v13  ;;  %v3904_v26 = vor.u32 %v3903_v38, %v3902_v3 }
 0x21e   :  { %v3718_v6 = vsel %vm3716_vm6, %v3703_v29, %v3717_v34  ;;  %v3826_v63 = vsub.s32 %v3822_v58, %v3825_v53  ;;  %v3907_v5 = vor.u32 %v3906_v46, %v3905_v14  ;;  %vm3911_vm8 = vcmp.lt.s32.totalorder %v6918_v33, 1 }
 0x21f   :  { %v3722_v12 = vsel %vm3715_vm5, %v3718_v6, %v3721_v24  ;;  %v3910_v20 = vor.u32 %v3909_v59, %v3908_v22  ;;  %vm3913_vm10 = vcmp.lt.s32.totalorder %v6918_v33, 3  ;;  %vm3914_vm11 = vcmp.lt.s32.totalorder %v6918_v33, 4 }
 0x220   :  { %v3723_v36 = vsel %vm3712_vm3, nan, %v3722_v12  ;;  %vm3827_vm9 = vcmp.lt.s32.totalorder %v3826_v63, 0  ;;  %v3828_v52 = vsub.s32 0, %v3826_v63  ;;  %vm3912_vm12 = vcmp.lt.s32.totalorder %v6918_v33, 2 }
 0x221   :  { %4194 = vst [vmem:[#allocation8 + $0x28] sm:$0xff] %v3723_v36  ;;  %v3919_v43 = vsel %vm3911_vm8, %v6936_v45, %v6938_v40  ;;  %v3920_v49 = vsel %vm3914_vm11, %v3907_v5, 920167782  ;;  %v3923_v32 = vsel %vm3911_vm8, %v6938_v40, %v3904_v26  ;;  %v3924_v8 = vsel %vm3914_vm11, %v3910_v20, 1326507024 }
 0x222   :  { %v3829_v17 = vsel %vm3827_vm9, %v3828_v52, %v3826_v63  ;;  %v3921_v27 = vsel %vm3913_vm10, %v3904_v26, %v3920_v49  ;;  %v2621_v29 = vadd.f32 %v2620_v30, %v2540_v4  ;;  %v3925_v57 = vsel %vm3913_vm10, %v3907_v5, %v3924_v8 }
 0x223   :  { %v3830_v11 = vclz %v3829_v17  ;;  %v3922_v15 = vsel %vm3912_vm12, %v3919_v43, %v3921_v27  ;;  %v3818_v37 = vadd.s32 %v6908_v44, %v6906_v62  ;;  %v3926_v58 = vsel %vm3912_vm12, %v3923_v32, %v3925_v57 }
 0x224   :  { %v3952_v18 = vand.u32 65535, %v3922_v15  ;;  %v3953_v54 = vshrl.u32 %v3922_v15, 16  ;;  %v3895_v34 = vshrl.u32 %v7291_v16, %v3894_v2  ;;  %v3930_v21 = vand.u32 65535, %v3926_v58  ;;  %v2758_v15 = vpop.f32.mrf.mxu0 }
 0x225   :  { %v4235_v55 = vadd.s32 4294967294, %v3830_v11  ;;  %v3931_v25 = vshrl.u32 %v3926_v58, 16  ;;  %v3916_v61 = vsel %vm3914_vm11, %v3904_v26, 2102212464  ;;  %v2667_v6 = vadd.f32 %v2666_v47, %v2621_v29  ;;  %v2701_v11 = vpop.f32.mrf.mxu3 }
 0x226   :  { %v3955_v13 = vmul.u32 %v3953_v54, %v3928_v10  ;;  %v3954_v12 = vmul.u32 %v3952_v18, %v3928_v10  ;;  %v3956_v62 = vmul.u32 %v3952_v18, %v3929_v35  ;;  %v3932_v1 = vmul.u32 %v3930_v21, %v3928_v10 }
 0x227   :  { %vm4236_vm13 = vcmp.lt.s32.totalorder %v4235_v55, 0  ;;  %v3933_v28 = vmul.u32 %v3931_v25, %v3928_v10  ;;  %v3934_v22 = vmul.u32 %v3930_v21, %v3929_v35  ;;  %v3935_v38 = vmul.u32 %v3931_v25, %v3929_v35 }
 0x228   :  { %v3833_v24 = vsel %vm4236_vm13, 0, %v4235_v55  ;;  %v3958_v2 = vshll.u32 %v3955_v13, 16  ;;  %v3957_v59 = vmul.u32 %v3953_v54, %v3929_v35  ;;  %v3959_v41 = vshrl.u32 %v3955_v13, 16 }
 0x229   :  { %v3834_v3 = vsub.s32 32, %v3833_v24  ;;  %v3838_v14 = vsub.s32 4294967266, %v3833_v24  ;;  %v3835_v44 = vshll.u32 %v3826_v63, %v3833_v24  ;;  %v3936_v31 = vshll.u32 %v3933_v28, 16 }
 0x22a   :  { %v3938_v46 = vshll.u32 %v3934_v22, 16  ;;  %v3937_v20 = vshrl.u32 %v3933_v28, 16  ;;  %v3960_v52 = vshll.u32 %v3956_v62, 16  ;;  %vm3962_vm15 = vc.u32 %v3954_v12, %v3958_v2 }
 0x22b   :  { %v3836_v36 = vshrl.u32 %v3818_v37, %v3834_v3  ;;  %v3839_v53 = vadd.s32 127, %v3838_v14  ;;  %vm3940_vm14 = vc.u32 %v3932_v1, %v3936_v31  ;;  %v3942_v4 = vadd.s32 %v3936_v31, %v3932_v1 }
 0x22c   :  { %v3964_v30 = vadd.s32 %v3958_v2, %v3954_v12  ;;  %v3939_v17 = vshrl.u32 %v3934_v22, 16  ;;  %v3941_v43 = vsel %vm3940_vm14, 1, %v7299_v7  ;;  %v3963_v49 = vsel %vm3962_vm15, 1, %v7299_v7 }
 0x22d   :  { %v3837_v5 = vor.u32 %v3836_v36, %v3835_v44  ;;  %v3840_v26 = vshll.u32 %v3839_v53, 23  ;;  %v3943_v27 = vadd.s32 %v3941_v43, %v3935_v38  ;;  %vm3944_vm0 = vc.u32 %v3942_v4, %v3938_v46  ;;  %v2791_v21 = vpop.f32.mrf.mxu1 }
 0x22e   :  { %v3965_v32 = vadd.s32 %v3963_v49, %v3957_v59  ;;  %vm3966_vm1 = vc.u32 %v3964_v30, %v3960_v52  ;;  %v3945_v29 = vsel %vm3944_vm0, 1, %v7299_v7  ;;  %v3961_v35 = vshrl.u32 %v3956_v62, 16 }
 0x22f   :  { %v3841_v63 = vor.u32 4788187, %v3840_v26  ;;  %v3844_v10 = vcvt.s32.f32 %v3837_v5  ;;  %v3967_v55 = vsel %vm3966_vm1, 1, %v7299_v7  ;;  %v3947_v57 = vadd.s32 %v3945_v29, %v3943_v27 }
 0x230   :  { %v3969_v47 = vadd.s32 %v3967_v55, %v3965_v32  ;;  %v2702_v37 = vadd.f32 %v2701_v11, %v2667_v6  ;;  %v3915_v18 = vsel %vm3911_vm8, %v3895_v34, %v6936_v45  ;;  %v3917_v54 = vsel %vm3913_vm10, %v6938_v40, %v3916_v61 }
 0x231   :  { %v3842_v8 = vand.u32 2147483647, %v3841_v63  ;;  %v3948_v25 = vadd.s32 %v3947_v57, %v3937_v20  ;;  %v3968_v24 = vadd.s32 %v3964_v30, %v3960_v52  ;;  %v3848_v12 = vsub.s32 4, %v6922_v56 }
 0x232   :  { %v3970_v13 = vadd.s32 %v3969_v47, %v3959_v41  ;;  %v2759_v3 = vadd.f32 %v2758_v15, %v2702_v37  ;;  %v3918_v6 = vsel %vm3912_vm12, %v3915_v18, %v3917_v54  ;;  %vm6990_vm3 = vcmp.le.f32.partialorder %v3724_v60, 0.7853982 }
 0x233   :  { %v3845_v58 = vmul.f32 %v3844_v10, %v3842_v8  ;;  %v3949_v62 = vadd.s32 %v3948_v25, %v3939_v17  ;;  %v3972_v33 = vmul.u32 %v6940_v50, %v3918_v6  ;;  %v3849_v36 = vsel %vm3726_vm2, %v3848_v12, %v6922_v56 }
 0x234   :  { %v3971_v44 = vadd.s32 %v3970_v13, %v3961_v35  ;;  %v6986_v45 = vadd.f32 %v2791_v21, %v2759_v3  ;;  %v3851_v46 = vsel %vm6990_vm3, 0, %v3849_v36  ;;  %vm3867_vm7 = vweird.f32 %v6803_v19 }
 0x235   :  { %v3846_v14 = vxor.u32 2147483648, %v3845_v58  ;;  %vm3974_vm4 = vc.u32 %v3949_v62, %v3968_v24  ;;  %v3868_v50 = vadd.s32 3, %v3851_v46  ;;  %v3973_v21 = vadd.s32 %v3968_v24, %v3949_v62 }
 0x236   :  { %v3975_v1 = vadd.s32 1, %v3971_v44  ;;  %v4037_v22 = vand.u32 2139095040, %v6986_v45  ;;  %v4034_v43 = vand.u32 2147483647, %v6986_v45  ;;  %vm7064_vm0 = vcmp.le.f32.partialorder %v3879_v42, 0.7853982 }
 0x237   :  { %v3847_v34 = vsel %vm3726_vm2, %v3846_v14, %v3845_v58  ;;  %v3869_v32 = vand.u32 3, %v3868_v50  ;;  %vm3881_vm1 = vcmp.lt.s32.totalorder %v6887_v51, 0 }
 0x238   :  { %v3850_v61 = vsel %vm6990_vm3, %v6803_v19, %v3847_v34  ;;  %v3976_v53 = vsel %vm3974_vm4, %v3975_v1, %v3971_v44  ;;  %v4038_v31 = vshrl.u32 %v4037_v22, 23  ;;  %v4041_v15 = vand.u32 8388607, %v4034_v43 }
 0x239   :  { %v3852_v28 = vmul.f32 %v3850_v61, %v3850_v61  ;;  %v3977_v2 = vadd.s32 %v3976_v53, %v3972_v33  ;;  %vm3870_vm8 = vcmp.lt.s32.totalorder %v3869_v32, 2  ;;  %vm3871_vm9 = vcmp.eq.s32.totalorder %v3869_v32, 0 }
 0x23a   :  { %v4240_v26 = vadd.s32 4294967169, %v4038_v31  ;;  %vm3874_vm10 = vcmp.eq.s32.totalorder %v3869_v32, 2  ;;  %v4042_v13 = vor.u32 8388608, %v4041_v15 }
 0x23b   :  { %v3853_v38 = vmul.f32 -0.001358992, %v3852_v28  ;;  %v3860_v60 = vmul.f32 -0.00019511016, %v3852_v28  ;;  %v3978_v5 = vadd.s32 536870912, %v3977_v2 }
 0x23c   :  { %v4044_v30 = vadd.s32 1, %v4240_v26 }
 0x23d   :  { %v3854_v59 = vadd.f32 0.041655596, %v3853_v38  ;;  %v3861_v41 = vadd.f32 0.008332121, %v3860_v60  ;;  %v7002_v4 = vshrl.u32 %v3978_v5, 30 }
 0x23e   :  { %vm4045_vm5 = vcmp.gt.s32.totalorder %v4044_v30, 0 }
 0x23f   :  { %v3855_v20 = vmul.f32 %v3854_v59, %v3852_v28  ;;  %v3862_v52 = vmul.f32 %v3861_v41, %v3852_v28  ;;  %v3980_v17 = vshll.u32 %v7002_v4, 30  ;;  %v4046_v8 = vsel %vm4045_vm5, %v4044_v30, 0 }
 0x240   :  { %v4048_v57 = vand.u32 31, %v4046_v8  ;;  %v7011_v3 = vshrl.u32 %v4046_v8, 5  ;;  %v4003_v59 = vsub.s32 4, %v7002_v4 }
 0x241   :  { %v3856_v63 = vadd.f32 -0.4999988, %v3855_v20  ;;  %v3863_v56 = vadd.f32 -0.16666654, %v3862_v52  ;;  %v3981_v27 = vsub.s32 %v3977_v2, %v3980_v17 }
 0x242   :  { %v7009_v18 = vsub.s32 32, %v4048_v57  ;;  %v4051_v14 = vshll.u32 %v7291_v16, %v4048_v57  ;;  %v4060_v33 = vshll.u32 %v7316_v9, %v4048_v57  ;;  %v4063_v2 = vshll.u32 %v7317_v48, %v4048_v57 }
 0x243   :  { %v3857_v49 = vmul.f32 %v3856_v63, %v3852_v28  ;;  %v3864_v11 = vmul.f32 %v3863_v56, %v3852_v28  ;;  %vm3982_vm6 = vcmp.lt.s32.totalorder %v3981_v27, 0  ;;  %v3983_v55 = vsub.s32 0, %v3981_v27 }
 0x244   :  { %v4052_v44 = vshrl.u32 %v7262_v23, %v7009_v18  ;;  %v4055_v40 = vshrl.u32 %v7264_v39, %v7009_v18  ;;  %v4058_v24 = vshrl.u32 %v7316_v9, %v7009_v18  ;;  %v4057_v28 = vshll.u32 %v7264_v39, %v4048_v57 }
 0x245   :  { %v3858_v10 = vadd.f32 1.0, %v3857_v49  ;;  %v3865_v29 = vadd.f32 1.0, %v3864_v11  ;;  %v3984_v37 = vsel %vm3982_vm6, %v3983_v55, %v3981_v27  ;;  %v4064_v19 = vshrl.u32 %v7267_v0, %v7009_v18 }
 0x246   :  { %v3985_v58 = vclz %v3984_v37  ;;  %v7025_v53 = vor.u32 %v4052_v44, %v4051_v14  ;;  %v4059_v60 = vor.u32 %v4058_v24, %v4057_v28  ;;  %v7034_v9 = vshll.u32 %v4042_v13, 8 }
 0x247   :  { %v3866_v35 = vmul.f32 %v3865_v29, %v3850_v61  ;;  %v3875_v47 = vxor.u32 2147483648, %v3858_v10  ;;  %v4054_v61 = vshll.u32 %v7262_v23, %v4048_v57  ;;  %v4061_v23 = vshrl.u32 %v7317_v48, %v7009_v18 }
 0x248   :  { %v4238_v25 = vadd.s32 4294967294, %v3985_v58  ;;  %v4065_v5 = vor.u32 %v4064_v19, %v4063_v2  ;;  %vm4066_vm12 = vcmp.lt.s32.totalorder %v7011_v3, 1  ;;  %vm4069_vm13 = vcmp.lt.s32.totalorder %v7011_v3, 4 }
 0x249   :  { %v3872_v54 = vxor.u32 2147483648, %v3866_v35  ;;  %v3876_v6 = vsel %vm3874_vm10, %v3875_v47, %v3866_v35  ;;  %v7027_v38 = vor.u32 %v4055_v40, %v4054_v61  ;;  %v4062_v41 = vor.u32 %v4061_v23, %v4060_v33 }
 0x24a   :  { %vm4239_vm11 = vcmp.lt.s32.totalorder %v4238_v25, 0  ;;  %vm4068_vm14 = vcmp.lt.s32.totalorder %v7011_v3, 3  ;;  %v4079_v50 = vsel %vm4069_vm13, %v4065_v5, 1326507024  ;;  %vm4067_vm15 = vcmp.lt.s32.totalorder %v7011_v3, 2 }
 0x24b   :  { %v3873_v12 = vsel %vm3871_vm9, %v3858_v10, %v3872_v54  ;;  %v3988_v1 = vsel %vm4239_vm11, 0, %v4238_v25  ;;  %v4074_v0 = vsel %vm4066_vm12, %v7025_v53, %v7027_v38  ;;  %v4075_v48 = vsel %vm4069_vm13, %v4062_v41, 920167782 }
 0x24c   :  { %v3877_v34 = vsel %vm3870_vm8, %v3873_v12, %v3876_v6  ;;  %v3989_v22 = vsub.s32 32, %v3988_v1  ;;  %v3993_v36 = vsub.s32 4294967266, %v3988_v1  ;;  %v3990_v31 = vshll.u32 %v3981_v27, %v3988_v1 }
 0x24d   :  { %v3878_v62 = vsel %vm3867_vm7, nan, %v3877_v34  ;;  %v4078_v52 = vsel %vm4066_vm12, %v7027_v38, %v4059_v60  ;;  %v4076_v63 = vsel %vm4068_vm14, %v4059_v60, %v4075_v48  ;;  %v4083_v56 = vand.u32 65535, %v7034_v9 }
 0x24e   :  { %4195 = vst [vmem:[#allocation8 + $0x30] sm:$0xff] %v3878_v62  ;;  %v3991_v39 = vshrl.u32 %v3973_v21, %v3989_v22  ;;  %v3994_v46 = vadd.s32 127, %v3993_v36  ;;  %v4077_v49 = vsel %vm4067_vm15, %v4074_v0, %v4076_v63  ;;  %v4080_v11 = vsel %vm4068_vm14, %v4062_v41, %v4079_v50 }
 0x24f   :  { %v4084_v27 = vshrl.u32 %v7034_v9, 16  ;;  %v4081_v8 = vsel %vm4067_vm15, %v4078_v52, %v4080_v11  ;;  %v4107_v10 = vand.u32 65535, %v4077_v49  ;;  %v4108_v29 = vshrl.u32 %v4077_v49, 16 }
 0x250   :  { %v3992_v26 = vor.u32 %v3991_v39, %v3990_v31  ;;  %v3995_v20 = vshll.u32 %v3994_v46, 23  ;;  %v4085_v55 = vand.u32 65535, %v4081_v8  ;;  %v4086_v15 = vshrl.u32 %v4081_v8, 16 }
 0x251   :  { %v4110_v35 = vmul.u32 %v4108_v29, %v4083_v56  ;;  %v4111_v47 = vmul.u32 %v4107_v10, %v4084_v27  ;;  %v4004_v25 = vsel %vm3881_vm1, %v4003_v59, %v7002_v4  ;;  %v4109_v13 = vmul.u32 %v4107_v10, %v4083_v56 }
 0x252   :  { %v3996_v30 = vor.u32 4788187, %v3995_v20  ;;  %v3999_v17 = vcvt.s32.f32 %v3992_v26  ;;  %v4088_v58 = vmul.u32 %v4086_v15, %v4083_v56  ;;  %v4089_v54 = vmul.u32 %v4085_v55, %v4084_v27 }
 0x253   :  { %v4113_v14 = vshll.u32 %v4110_v35, 16  ;;  %v4087_v12 = vmul.u32 %v4085_v55, %v4083_v56  ;;  %v4090_v6 = vmul.u32 %v4086_v15, %v4084_v27  ;;  %v4112_v40 = vmul.u32 %v4108_v29, %v4084_v27 }
 0x254   :  { %v3997_v32 = vand.u32 2147483647, %v3996_v30  ;;  %v4091_v44 = vshll.u32 %v4088_v58, 16  ;;  %v4093_v61 = vshll.u32 %v4089_v54, 16  ;;  %v4115_v24 = vshll.u32 %v4111_v47, 16 }
 0x255   :  { %vm4117_vm2 = vc.u32 %v4109_v13, %v4113_v14  ;;  %v4119_v33 = vadd.s32 %v4113_v14, %v4109_v13  ;;  %v4006_v36 = vsel %vm7064_vm0, 0, %v4004_v25  ;;  %v4071_v23 = vsel %vm4069_vm13, %v4059_v60, 2102212464 }
 0x256   :  { %v4000_v57 = vmul.f32 %v3999_v17, %v3997_v32  ;;  %vm4095_vm3 = vc.u32 %v4087_v12, %v4091_v44  ;;  %v4097_v62 = vadd.s32 %v4091_v44, %v4087_v12  ;;  %v4118_v1 = vsel %vm4117_vm2, 1, %v7299_v7 }
 0x257   :  { %v4096_v4 = vsel %vm4095_vm3, 1, %v7299_v7  ;;  %v4120_v22 = vadd.s32 %v4118_v1, %v4112_v40  ;;  %vm4121_vm5 = vc.u32 %v4119_v33, %v4115_v24  ;;  %v4050_v46 = vshrl.u32 %v7291_v16, %v7009_v18 }
 0x258   :  { %v4001_v21 = vxor.u32 2147483648, %v4000_v57  ;;  %v4098_v2 = vadd.s32 %v4096_v4, %v4090_v6  ;;  %vm4099_vm4 = vc.u32 %v4097_v62, %v4093_v61  ;;  %v4092_v59 = vshrl.u32 %v4088_v58, 16 }
 0x259   :  { %v4100_v39 = vsel %vm4099_vm4, 1, %v7299_v7  ;;  %v4122_v5 = vsel %vm4121_vm5, 1, %v7299_v7  ;;  %v4114_v0 = vshrl.u32 %v4110_v35, 16  ;;  %v4070_v60 = vsel %vm4066_vm12, %v4050_v46, %v7025_v53 }
 0x25a   :  { %v4002_v34 = vsel %vm3881_vm1, %v4001_v21, %v4000_v57  ;;  %v4102_v41 = vadd.s32 %v4100_v39, %v4098_v2  ;;  %v4124_v48 = vadd.s32 %v4122_v5, %v4120_v22  ;;  %v4072_v52 = vsel %vm4068_vm14, %v7027_v38, %v4071_v23 }
 0x25b   :  { %v4005_v42 = vsel %vm7064_vm0, %v6887_v51, %v4002_v34  ;;  %v4094_v50 = vshrl.u32 %v4089_v54, 16  ;;  %v4116_v18 = vshrl.u32 %v4111_v47, 16  ;;  %v4123_v7 = vadd.s32 %v4119_v33, %v4115_v24 }
 0x25c   :  { %v4007_v28 = vmul.f32 %v4005_v42, %v4005_v42  ;;  %v4103_v30 = vadd.s32 %v4102_v41, %v4092_v59  ;;  %v4125_v56 = vadd.s32 %v4124_v48, %v4114_v0  ;;  %v4073_v27 = vsel %vm4067_vm15, %v4070_v60, %v4072_v52 }
 0x25d   :  { %v4023_v8 = vadd.s32 3, %v4006_v36  ;;  %v4127_v38 = vmul.u32 %v7034_v9, %v4073_v27  ;;  %vm4022_vm10 = vweird.f32 %v6887_v51  ;;  %vm4036_vm13 = vcmp.lt.s32.totalorder %v6986_v45, 0 }
 0x25e   :  { %v4008_v19 = vmul.f32 -0.001358992, %v4007_v28  ;;  %v4015_v31 = vmul.f32 -0.00019511016, %v4007_v28  ;;  %v4104_v17 = vadd.s32 %v4103_v30, %v4094_v50  ;;  %v4126_v32 = vadd.s32 %v4125_v56, %v4116_v18 }
 0x25f   :  { %v4024_v35 = vand.u32 3, %v4023_v8  ;;  %vm4035_vm14 = vcmp.le.f32.partialorder %v4034_v43, 0.7853982  ;;  %vm4177_vm2 = vweird.f32 %v6986_v45 }
 0x260   :  { %v4009_v26 = vadd.f32 0.041655596, %v4008_v19  ;;  %v4016_v20 = vadd.f32 0.008332121, %v4015_v31  ;;  %vm4129_vm6 = vc.u32 %v4104_v17, %v4123_v7  ;;  %v4130_v29 = vadd.s32 1, %v4126_v32 }
 0x261   :  { %vm4026_vm7 = vcmp.eq.s32.totalorder %v4024_v35, 0  ;;  %vm4029_vm8 = vcmp.eq.s32.totalorder %v4024_v35, 2  ;;  %vm4025_vm9 = vcmp.lt.s32.totalorder %v4024_v35, 2 }
 0x262   :  { %v4010_v63 = vmul.f32 %v4009_v26, %v4007_v28  ;;  %v4017_v16 = vmul.f32 %v4016_v20, %v4007_v28  ;;  %v4131_v57 = vsel %vm4129_vm6, %v4130_v29, %v4126_v32 }
 0x263   :  { %v4132_v47 = vadd.s32 %v4131_v57, %v4127_v38 }
 0x264   :  { %v4011_v49 = vadd.f32 -0.4999988, %v4010_v63  ;;  %v4018_v11 = vadd.f32 -0.16666654, %v4017_v16 }
 0x265   :  { %v4133_v54 = vadd.s32 536870912, %v4132_v47 }
 0x266   :  { %v4012_v53 = vmul.f32 %v4011_v49, %v4007_v28  ;;  %v4019_v10 = vmul.f32 %v4018_v11, %v4007_v28 }
 0x267   :  { %v4134_v3 = vshrl.u32 %v4133_v54, 30 }
 0x268   :  { %v4013_v55 = vadd.f32 1.0, %v4012_v53  ;;  %v4020_v15 = vadd.f32 1.0, %v4019_v10 }
 0x269   :  { %v4135_v12 = vshll.u32 %v4134_v3, 30  ;;  %v4158_v46 = vsub.s32 4, %v4134_v3 }
 0x26a   :  { %v4021_v37 = vmul.f32 %v4020_v15, %v4005_v42  ;;  %v4030_v58 = vxor.u32 2147483648, %v4013_v55  ;;  %v4128_v42 = vadd.s32 %v4123_v7, %v4104_v17 }
 0x26b   :  { %v4136_v6 = vsub.s32 %v4132_v47, %v4135_v12  ;;  %v4159_v20 = vsel %vm4036_vm13, %v4158_v46, %v4134_v3 }
 0x26c   :  { %v4027_v21 = vxor.u32 2147483648, %v4021_v37  ;;  %v4031_v13 = vsel %vm4029_vm8, %v4030_v58, %v4021_v37  ;;  %v4161_v60 = vsel %vm4035_vm14, 0, %v4159_v20 }
 0x26d   :  { %vm4137_vm11 = vcmp.lt.s32.totalorder %v4136_v6, 0  ;;  %v4138_v44 = vsub.s32 0, %v4136_v6  ;;  %v4178_v16 = vadd.s32 3, %v4161_v60 }
 0x26e   :  { %v4028_v25 = vsel %vm4026_vm7, %v4013_v55, %v4027_v21 }
 0x26f   :  { %v4032_v14 = vsel %vm4025_vm9, %v4028_v25, %v4031_v13  ;;  %v4139_v40 = vsel %vm4137_vm11, %v4138_v44, %v4136_v6  ;;  %v4179_v7 = vand.u32 3, %v4178_v16 }
 0x270   :  { %v4033_v9 = vsel %vm4022_vm10, nan, %v4032_v14  ;;  %v4140_v34 = vclz %v4139_v40 }
 0x271   :  { %4196 = vst [vmem:[#allocation8 + $0x38] sm:$0xff] %v4033_v9  ;;  %vm4181_vm15 = vcmp.eq.s32.totalorder %v4179_v7, 0  ;;  %vm4184_vm0 = vcmp.eq.s32.totalorder %v4179_v7, 2  ;;  %vm4180_vm1 = vcmp.lt.s32.totalorder %v4179_v7, 2 }
 0x272   :  { %v4241_v61 = vadd.s32 4294967294, %v4140_v34 }
 0x274   :  { %vm4242_vm12 = vcmp.lt.s32.totalorder %v4241_v61, 0 }
 0x275   :  { %v4143_v24 = vsel %vm4242_vm12, 0, %v4241_v61 }
 0x276   :  { %v4144_v62 = vsub.s32 32, %v4143_v24  ;;  %v4148_v1 = vsub.s32 4294967266, %v4143_v24  ;;  %v4145_v28 = vshll.u32 %v4136_v6, %v4143_v24 }
 0x278   :  { %v4146_v4 = vshrl.u32 %v4128_v42, %v4144_v62  ;;  %v4149_v33 = vadd.s32 127, %v4148_v1 }
 0x27a   :  { %v4147_v22 = vor.u32 %v4146_v4, %v4145_v28  ;;  %v4150_v51 = vshll.u32 %v4149_v33, 23 }
 0x27c   :  { %v4151_v36 = vor.u32 4788187, %v4150_v51  ;;  %v4154_v2 = vcvt.s32.f32 %v4147_v22 }
 0x27e   :  { %v4152_v23 = vand.u32 2147483647, %v4151_v36 }
 0x280   :  { %v4155_v19 = vmul.f32 %v4154_v2, %v4152_v23 }
 0x282   :  { %v4156_v31 = vxor.u32 2147483648, %v4155_v19 }
 0x284   :  { %v4157_v39 = vsel %vm4036_vm13, %v4156_v31, %v4155_v19 }
 0x285   :  { %v4160_v59 = vsel %vm4035_vm14, %v6986_v45, %v4157_v39 }
 0x286   :  { %v4162_v41 = vmul.f32 %v4160_v59, %v4160_v59 }
 0x288   :  { %v4163_v5 = vmul.f32 -0.001358992, %v4162_v41  ;;  %v4170_v26 = vmul.f32 -0.00019511016, %v4162_v41 }
 0x28a   :  { %v4164_v0 = vadd.f32 0.041655596, %v4163_v5  ;;  %v4171_v48 = vadd.f32 0.008332121, %v4170_v26 }
 0x28c   :  { %v4165_v52 = vmul.f32 %v4164_v0, %v4162_v41  ;;  %v4172_v50 = vmul.f32 %v4171_v48, %v4162_v41 }
 0x28e   :  { %v4166_v30 = vadd.f32 -0.4999988, %v4165_v52  ;;  %v4173_v63 = vadd.f32 -0.16666654, %v4172_v50 }
 0x290   :  { %v4167_v18 = vmul.f32 %v4166_v30, %v4162_v41  ;;  %v4174_v56 = vmul.f32 %v4173_v63, %v4162_v41 }
 0x292   :  { %v4168_v17 = vadd.f32 1.0, %v4167_v18  ;;  %v4175_v43 = vadd.f32 1.0, %v4174_v56 }
 0x294   :  { %v4176_v49 = vmul.f32 %v4175_v43, %v4160_v59  ;;  %v4185_v11 = vxor.u32 2147483648, %v4168_v17 }
 0x296   :  { %v4182_v27 = vxor.u32 2147483648, %v4176_v49  ;;  %v4186_v8 = vsel %vm4184_vm0, %v4185_v11, %v4176_v49 }
 0x298   :  { %v4183_v32 = vsel %vm4181_vm15, %v4168_v17, %v4182_v27 }
 0x299   :  { %v4187_v53 = vsel %vm4180_vm1, %v4183_v32, %v4186_v8 }
 0x29a   :  { %v4188_v10 = vsel %vm4177_vm2, nan, %v4187_v53 }
 0x29b   :  { %4197 = vst [vmem:[#allocation8 + $0x40] sm:$0xff] %v4188_v10 }
 0x29c   :  { %4208 = dma.vmem_to_hbm [thread:$0]  %s4204_s2, 1152, %s4206_s30, [#allocation4]  }
 0x29d   :  { %4359 = dma.done.wait [#allocation4], 1152  }
 0x29e   :  { %4360 = vsyncadd [#allocation4], 4294966144 }
 0x29f   :  { %4213 = vsyncpa [#allocation3], 1 }
 0x2a0   :  { %4214 = vsyncpa [#allocation6], 1 }
 0x2a1   :  { %4215 = vsyncpa [#allocation4], 1 }

</bundles_post_ra>
